<compile_context>
chip_gen: v7x
topology: tpu7x:2x2x1
jax: 0.10.0
libtpu: 0.0.40
codegen_flags: <defaults>
</compile_context>

<pallas_src>
import functools
import math

import jax
import jax.numpy as jnp
from jax.experimental import pallas as pl
from jax.experimental.pallas import tpu as pltpu

LN_EPS = 1e-5  # nn.LayerNorm default


# ----------------------------------------------------------------------------
# helpers
# ----------------------------------------------------------------------------
def _layernorm(x, gamma, beta):
    mu = jnp.mean(x, axis=-1, keepdims=True)
    xc = x - mu
    var = jnp.mean(xc * xc, axis=-1, keepdims=True)
    return xc * jax.lax.rsqrt(var + LN_EPS) * gamma + beta


def _gelu_tanh(x):
    # tanh-approx GELU: the tanh lands on the otherwise-idle EUP slot instead
    # of a VALU-heavy erf polynomial; |gelu_tanh - gelu_erf| < ~1e-3, far
    # below the test tolerance.
    c = math.sqrt(2.0 / math.pi)
    return 0.5 * x * (1.0 + jnp.tanh(c * (x + 0.044715 * (x * x * x))))


def _auto_batches_per_step(B, N, target_rows=256):
    # Smallest divisor of B giving >= target_rows matmul rows per grid step
    # (MXU M fill: 128 on v5e, 256 on v6e/v7x), capped at the whole batch.
    want = min(target_rows, B * N)
    for d in range(1, B + 1):
        if B % d == 0 and d * N >= want:
            return d
    return B


# ----------------------------------------------------------------------------
# Fused Block kernel: one grid step == `batches` batch elements (R = batches*N
# token rows), all intermediates stay in VMEM/vregs.
# ----------------------------------------------------------------------------
def _block_kernel(x_ref, vecC_ref, c1_ref, wq_ref, wkv_ref, wp_ref,
                  w1_ref, w2_ref, o_ref, *, num_heads, head_dim, seq_len,
                  batches):
    f32 = jnp.float32
    bf16 = jnp.bfloat16
    C = num_heads * head_dim
    N = seq_len

    # packed per-C vectors: [gamma1, beta1, b_proj, gamma2, beta2, b_fc2]
    g1 = vecC_ref[0:1, :]
    b1 = vecC_ref[1:2, :]
    bp = vecC_ref[2:3, :]
    g2 = vecC_ref[3:4, :]
    b2 = vecC_ref[4:5, :]
    c2 = vecC_ref[5:6, :]

    x = x_ref[...]                                           # (R, C) f32

    # ---- LayerNorm1 + q / kv projections (qkv_bias=False) -------------------
    # Attention scale is pre-folded into wq (host side), so q is pre-scaled.
    xn = _layernorm(x, g1, b1)
    xn_b = xn.astype(bf16)
    q = jnp.dot(xn_b, wq_ref[...], preferred_element_type=f32)      # (R, C)
    kv = jnp.dot(xn_b, wkv_ref[...], preferred_element_type=f32)    # (R, 2C)

    # cast once (hoisted out of the per-head loop)
    q_b = q.astype(bf16)
    k_b = kv[:, :C].astype(bf16)
    v_b = kv[:, C:].astype(bf16)

    wp = wp_ref[...]                                         # (C, C) bf16

    # ---- multi-head attention; the output projection is accumulated per head
    # (folds the head concat away -> every store stays 128-lane dense) --------
    outs = []
    for b in range(batches):                                 # static unroll
        r0 = b * N
        acc = jnp.zeros((N, C), f32)
        for h in range(num_heads):                           # static unroll
            lo = h * head_dim
            qh = q_b[r0:r0 + N, lo:lo + head_dim]
            kh = k_b[r0:r0 + N, lo:lo + head_dim]
            vh = v_b[r0:r0 + N, lo:lo + head_dim]
            s = jax.lax.dot_general(qh, kh, (((1,), (1,)), ((), ())),
                                    preferred_element_type=f32)   # (N, N) f32
            s = s - jnp.max(s, axis=-1, keepdims=True)
            p = jnp.exp(s)
            p = p * pl.reciprocal(jnp.sum(p, axis=-1, keepdims=True),
                                  approx=True)               # EUP, not VALU
            oh = jnp.dot(p.astype(bf16), vh, preferred_element_type=f32)
            acc = acc + jnp.dot(oh.astype(bf16), wp[lo:lo + head_dim, :],
                                preferred_element_type=f32)  # (N, C)
        outs.append(acc)
    attn = outs[0] if batches == 1 else jnp.concatenate(outs, axis=0)

    # ---- residual 1 ----------------------------------------------------------
    x1 = x + attn + bp

    # ---- LayerNorm2 + MLP (fc1 -> GELU -> fc2) + residual 2 ------------------
    x2n = _layernorm(x1, g2, b2)
    h1 = jnp.dot(x2n.astype(bf16), w1_ref[...],
                 preferred_element_type=f32) + c1_ref[...]
    h1 = _gelu_tanh(h1)
    h2 = jnp.dot(h1.astype(bf16), w2_ref[...],
                 preferred_element_type=f32) + c2
    o_ref[...] = x1 + h2


# ----------------------------------------------------------------------------
# Host-side parameter preparation (done ONCE, outside the hot path):
#   * pack the six length-C vectors into one (6, C) f32 array
#   * cast matmul weights to bf16 (MXU operand type)
#   * fold the attention scale (head_dim ** -0.5) into Wq
# ----------------------------------------------------------------------------
def prepare_block_params(params, *, num_heads):
    (g1, b1, wq, wkv, wp, bp, g2, b2, w1, c1, w2, c2) = params
    C = wq.shape[0]
    hd = C // num_heads
    scale = float(hd) ** -0.5
    bf16 = jnp.bfloat16

    vecC = jnp.stack([g1, b1, bp, g2, b2, c2]).astype(jnp.float32)  # (6, C)
    c1row = c1.reshape(1, -1).astype(jnp.float32)                   # (1, Hd)
    return (vecC, c1row,
            (wq * scale).astype(bf16),   # scale folded: zero in-kernel cost
            wkv.astype(bf16),
            wp.astype(bf16),
            w1.astype(bf16),
            w2.astype(bf16))


# ----------------------------------------------------------------------------
# Wrapper: one pallas_call for the whole Block forward
# ----------------------------------------------------------------------------
def block_forward(x, prepared, *, num_heads, batches_per_step=None):
    """Fused PVT Block forward.  x: (B, N, C) float32.  sr_ratio == 1 path."""
    (vecC, c1row, wq, wkv, wp, w1, w2) = prepared
    B, N, C = x.shape
    assert C % num_heads == 0
    hd = C // num_heads
    Hd = w1.shape[1]

    bps = (_auto_batches_per_step(B, N) if batches_per_step is None
           else batches_per_step)
    assert B % bps == 0
    R = bps * N                     # token rows per grid step (MXU M-dim)
    steps = B // bps

    x2d = x.reshape(B * N, C)       # flatten so matmuls see R-row slabs

    kernel = functools.partial(_block_kernel, num_heads=num_heads,
                               head_dim=hd, seq_len=N, batches=bps)

    full = lambda shape: pl.BlockSpec(shape, lambda g: (0,) * len(shape))

    flops = 2 * B * N * (C * C            # q proj
                         + 2 * C * C      # kv proj
                         + N * C          # q @ k^T (all heads)
                         + N * C          # p @ v   (all heads)
                         + C * C          # output proj (accumulated per head)
                         + C * Hd         # fc1
                         + Hd * C)        # fc2
    transcendentals = B * N * (num_heads * N + Hd + num_heads + 2)
    bytes_accessed = (2 * B * N * C * 4                                    # x in/out
                      + (C * C + 2 * C * C + C * C + C * Hd + Hd * C) * 2  # bf16 W
                      + (6 * C + Hd) * 4)                                  # vectors

    out = pl.pallas_call(
        kernel,
        out_shape=jax.ShapeDtypeStruct((B * N, C), jnp.float32),
        grid=(steps,),
        in_specs=[
            pl.BlockSpec((R, C), lambda g: (g, 0)),   # x rows for this step
            full((6, C)),                             # packed per-C vectors
            full((1, Hd)),                            # fc1 bias
            full((C, C)),                             # Wq (bf16, pre-scaled)
            full((C, 2 * C)),                         # Wkv (bf16)
            full((C, C)),                             # Wproj (bf16)
            full((C, Hd)),                            # fc1 W (bf16)
            full((Hd, C)),                            # fc2 W (bf16)
        ],
        out_specs=pl.BlockSpec((R, C), lambda g: (g, 0)),
        compiler_params=pltpu.CompilerParams(
            dimension_semantics=("parallel",),
            vmem_limit_bytes=64 * 1024 * 1024),
        cost_estimate=pl.CostEstimate(flops=flops,
                                      transcendentals=transcendentals,
                                      bytes_accessed=bytes_accessed),
    )(x2d, vecC, c1row, wq, wkv, wp, w1, w2)
    return out.reshape(B, N, C)


# ----------------------------------------------------------------------------
# Plain-JAX reference (module semantics: exact erf GELU, explicit scale)
# ----------------------------------------------------------------------------
def block_reference(x, params, *, num_heads):
    (g1, b1, wq, wkv, wp, bp, g2, b2, w1, c1, w2, c2) = params
    B, N, C = x.shape
    hd = C // num_heads
    bf16 = jnp.bfloat16
    mm = lambda a, w: jnp.dot(a.astype(bf16), w.astype(bf16),
                              preferred_element_type=jnp.float32)

    xn = _layernorm(x, g1, b1)
    q = mm(xn, wq).reshape(B, N, num_heads, hd).transpose(0, 2, 1, 3)
    kv = mm(xn, wkv)
    k = kv[..., :C].reshape(B, N, num_heads, hd).transpose(0, 2, 1, 3)
    v = kv[..., C:].reshape(B, N, num_heads, hd).transpose(0, 2, 1, 3)
    s = jnp.einsum("bhqd,bhkd->bhqk", q.astype(bf16), k.astype(bf16),
                   preferred_element_type=jnp.float32) * (hd ** -0.5)
    p = jax.nn.softmax(s, axis=-1)
    o = jnp.einsum("bhqk,bhkd->bhqd", p.astype(bf16), v.astype(bf16),
                   preferred_element_type=jnp.float32)
    o = o.transpose(0, 2, 1, 3).reshape(B, N, C)
    x1 = x + mm(o, wp) + bp
    x2n = _layernorm(x1, g2, b2)
    h = mm(x2n, w1) + c1
    h = jax.nn.gelu(h, approximate=False)          # exact erf GELU (nn.GELU)
    return x1 + mm(h, w2) + c2


# ----------------------------------------------------------------------------
# Parameter construction (PyTorch-like init)
# ----------------------------------------------------------------------------
def make_block_params(key, dim, num_heads, mlp_ratio=4.0):
    hidden = int(dim * mlp_ratio)
    ks = jax.random.split(key, 8)

    def linear(k, fan_in, fan_out):
        bound = 1.0 / math.sqrt(fan_in)
        kw, kb = jax.random.split(k)
        w = jax.random.uniform(kw, (fan_in, fan_out), jnp.float32, -bound, bound)
        b = jax.random.uniform(kb, (fan_out,), jnp.float32, -bound, bound)
        return w, b

    wq, _ = linear(ks[0], dim, dim)                 # qkv_bias=False
    wkv, _ = linear(ks[1], dim, 2 * dim)            # qkv_bias=False
    wp, bp = linear(ks[2], dim, dim)
    w1, c1 = linear(ks[3], dim, hidden)
    w2, c2 = linear(ks[4], hidden, dim)
    g1 = 1.0 + 0.1 * jax.random.normal(ks[5], (dim,), jnp.float32)
    b1 = 0.1 * jax.random.normal(ks[6], (dim,), jnp.float32)
    g2 = 1.0 + 0.05 * jax.random.normal(ks[7], (dim,), jnp.float32)
    b2 = jnp.zeros((dim,), jnp.float32)
    return (g1, b1, wq, wkv, wp, bp, g2, b2, w1, c1, w2, c2)


if __name__ == "__main__":
    key = jax.random.PRNGKey(0)
    kx, kp = jax.random.split(key)

    # small shapes consistent with the module: B=2, H=W=8 -> N=64 tokens,
    # dim=128 (lane-dense), num_heads=4, mlp_hidden=512
    B, H, W = 2, 8, 8
    dim, num_heads, mlp_ratio = 128, 4, 4.0
    N = H * W

    x = jax.random.normal(kx, (B, N, dim), jnp.float32)
    params = make_block_params(kp, dim, num_heads, mlp_ratio)
    prepared = prepare_block_params(params, num_heads=num_heads)  # once, host

    fwd = jax.jit(functools.partial(block_forward, num_heads=num_heads))
    out = fwd(x, prepared)
    jax.block_until_ready(out)

    assert out.shape == (B, N, dim), out.shape
    assert out.dtype == jnp.float32
    assert bool(jnp.all(jnp.isfinite(out)))

    ref = block_reference(x, params, num_heads=num_heads)
    max_err = float(jnp.max(jnp.abs(out - ref)))
    assert max_err < 5e-2, f"max abs err vs reference: {max_err}"

    print("KERNEL_OK")
</pallas_src>

<mosaic_0001>
module attributes {stable_mosaic.version = 11 : i64} {
  func.func @_block_kernel(%arg0: i32, %arg1: memref<128x128xf32, #tpu.memory_space<vmem>>, %arg2: memref<6x128xf32, #tpu.memory_space<vmem>>, %arg3: memref<1x512xf32, #tpu.memory_space<vmem>>, %arg4: memref<128x128xbf16, #tpu.memory_space<vmem>>, %arg5: memref<128x256xbf16, #tpu.memory_space<vmem>>, %arg6: memref<128x128xbf16, #tpu.memory_space<vmem>>, %arg7: memref<128x512xbf16, #tpu.memory_space<vmem>>, %arg8: memref<512x128xbf16, #tpu.memory_space<vmem>>, %arg9: memref<128x128xf32, #tpu.memory_space<vmem>>) attributes {dimension_semantics = [#tpu.dimension_semantics<parallel>], iteration_bounds = array<i64: 1>, scalar_prefetch = 0 : i64, scratch_operands = 0 : i64, tpu.core_type = #tpu.core_type<tc>, window_params = [{transform_indices = @transform_0, window_bounds = array<i64: 128, 128>}, {pipeline_mode = #tpu.pipeline_mode<synchronous>, transform_indices = @transform_1, window_bounds = array<i64: 6, 128>}, {pipeline_mode = #tpu.pipeline_mode<synchronous>, transform_indices = @transform_2, window_bounds = array<i64: 1, 512>}, {pipeline_mode = #tpu.pipeline_mode<synchronous>, transform_indices = @transform_3, window_bounds = array<i64: 128, 128>}, {pipeline_mode = #tpu.pipeline_mode<synchronous>, transform_indices = @transform_4, window_bounds = array<i64: 128, 256>}, {pipeline_mode = #tpu.pipeline_mode<synchronous>, transform_indices = @transform_5, window_bounds = array<i64: 128, 128>}, {pipeline_mode = #tpu.pipeline_mode<synchronous>, transform_indices = @transform_6, window_bounds = array<i64: 128, 512>}, {pipeline_mode = #tpu.pipeline_mode<synchronous>, transform_indices = @transform_7, window_bounds = array<i64: 512, 128>}, {transform_indices = @transform_8, window_bounds = array<i64: 128, 128>}]} {
    %c0 = arith.constant 0 : index
    %c0_0 = arith.constant 0 : index
    %0 = vector.load %arg2[%c0, %c0_0] : memref<6x128xf32, #tpu.memory_space<vmem>>, vector<1x128xf32>
    %c1 = arith.constant 1 : index
    %c0_1 = arith.constant 0 : index
    %1 = vector.load %arg2[%c1, %c0_1] : memref<6x128xf32, #tpu.memory_space<vmem>>, vector<1x128xf32>
    %c2 = arith.constant 2 : index
    %c0_2 = arith.constant 0 : index
    %2 = vector.load %arg2[%c2, %c0_2] : memref<6x128xf32, #tpu.memory_space<vmem>>, vector<1x128xf32>
    %c3 = arith.constant 3 : index
    %c0_3 = arith.constant 0 : index
    %3 = vector.load %arg2[%c3, %c0_3] : memref<6x128xf32, #tpu.memory_space<vmem>>, vector<1x128xf32>
    %c4 = arith.constant 4 : index
    %c0_4 = arith.constant 0 : index
    %4 = vector.load %arg2[%c4, %c0_4] : memref<6x128xf32, #tpu.memory_space<vmem>>, vector<1x128xf32>
    %c5 = arith.constant 5 : index
    %c0_5 = arith.constant 0 : index
    %5 = vector.load %arg2[%c5, %c0_5] : memref<6x128xf32, #tpu.memory_space<vmem>>, vector<1x128xf32>
    %c0_6 = arith.constant 0 : index
    %c0_7 = arith.constant 0 : index
    %6 = vector.load %arg1[%c0_6, %c0_7] : memref<128x128xf32, #tpu.memory_space<vmem>>, vector<128x128xf32>
    %cst = arith.constant dense<0.000000e+00> : vector<128xf32>
    %7 = vector.multi_reduction <add>, %6, %cst [1] : vector<128x128xf32> to vector<128xf32>
    %8 = vector.shape_cast %7 : vector<128xf32> to vector<128x1xf32>
    %cst_8 = arith.constant 1.280000e+02 : f32
    %9 = vector.broadcast %cst_8 : f32 to vector<128x1xf32>
    %10 = arith.divf %8, %9 : vector<128x1xf32>
    %11 = vector.broadcast %10 : vector<128x1xf32> to vector<128x128xf32>
    %12 = arith.subf %6, %11 : vector<128x128xf32>
    %13 = arith.mulf %12, %12 : vector<128x128xf32>
    %cst_9 = arith.constant dense<0.000000e+00> : vector<128xf32>
    %14 = vector.multi_reduction <add>, %13, %cst_9 [1] : vector<128x128xf32> to vector<128xf32>
    %15 = vector.shape_cast %14 : vector<128xf32> to vector<128x1xf32>
    %cst_10 = arith.constant 1.280000e+02 : f32
    %16 = vector.broadcast %cst_10 : f32 to vector<128x1xf32>
    %17 = arith.divf %15, %16 : vector<128x1xf32>
    %cst_11 = arith.constant 9.99999974E-6 : f32
    %18 = vector.broadcast %cst_11 : f32 to vector<128x1xf32>
    %19 = arith.addf %17, %18 : vector<128x1xf32>
    %20 = math.rsqrt %19 : vector<128x1xf32>
    %21 = vector.broadcast %20 : vector<128x1xf32> to vector<128x128xf32>
    %22 = arith.mulf %12, %21 : vector<128x128xf32>
    %23 = vector.broadcast %0 : vector<1x128xf32> to vector<128x128xf32>
    %24 = arith.mulf %22, %23 : vector<128x128xf32>
    %25 = vector.broadcast %1 : vector<1x128xf32> to vector<128x128xf32>
    %26 = arith.addf %24, %25 : vector<128x128xf32>
    %27 = arith.truncf %26 : vector<128x128xf32> to vector<128x128xbf16>
    %c0_12 = arith.constant 0 : index
    %c0_13 = arith.constant 0 : index
    %28 = vector.load %arg4[%c0_12, %c0_13] : memref<128x128xbf16, #tpu.memory_space<vmem>>, vector<128x128xbf16>
    %cst_14 = arith.constant dense<0.000000e+00> : vector<128x128xf32>
    %29 = tpu.matmul %27, %28, %cst_14 {dimension_numbers = #tpu.dot_dimension_numbers<[1], [0], [0], [1], [0, 0, 1, 1], [], []>} : vector<128x128xbf16>, vector<128x128xbf16>, vector<128x128xf32> -> vector<128x128xf32>
    %c0_15 = arith.constant 0 : index
    %c0_16 = arith.constant 0 : index
    %30 = vector.load %arg5[%c0_15, %c0_16] : memref<128x256xbf16, #tpu.memory_space<vmem>>, vector<128x256xbf16>
    %cst_17 = arith.constant dense<0.000000e+00> : vector<128x256xf32>
    %31 = tpu.matmul %27, %30, %cst_17 {dimension_numbers = #tpu.dot_dimension_numbers<[1], [0], [0], [1], [0, 0, 1, 1], [], []>} : vector<128x128xbf16>, vector<128x256xbf16>, vector<128x256xf32> -> vector<128x256xf32>
    %32 = arith.truncf %29 : vector<128x128xf32> to vector<128x128xbf16>
    %33 = vector.extract_strided_slice %31 {offsets = [0, 0], sizes = [128, 128], strides = [1, 1]} : vector<128x256xf32> to vector<128x128xf32>
    %34 = arith.truncf %33 : vector<128x128xf32> to vector<128x128xbf16>
    %35 = vector.extract_strided_slice %31 {offsets = [0, 128], sizes = [128, 128], strides = [1, 1]} : vector<128x256xf32> to vector<128x128xf32>
    %36 = arith.truncf %35 : vector<128x128xf32> to vector<128x128xbf16>
    %c0_18 = arith.constant 0 : index
    %c0_19 = arith.constant 0 : index
    %37 = vector.load %arg6[%c0_18, %c0_19] : memref<128x128xbf16, #tpu.memory_space<vmem>>, vector<128x128xbf16>
    %cst_20 = arith.constant 0.000000e+00 : f32
    %38 = vector.broadcast %cst_20 : f32 to vector<64x128xf32>
    %39 = vector.extract_strided_slice %32 {offsets = [0, 0], sizes = [64, 32], strides = [1, 1]} : vector<128x128xbf16> to vector<64x32xbf16>
    %40 = vector.extract_strided_slice %34 {offsets = [0, 0], sizes = [64, 32], strides = [1, 1]} : vector<128x128xbf16> to vector<64x32xbf16>
    %41 = vector.extract_strided_slice %36 {offsets = [0, 0], sizes = [64, 32], strides = [1, 1]} : vector<128x128xbf16> to vector<64x32xbf16>
    %cst_21 = arith.constant dense<0.000000e+00> : vector<64x64xf32>
    %42 = tpu.matmul %39, %40, %cst_21 {dimension_numbers = #tpu.dot_dimension_numbers<[1], [1], [0], [0], [0, 0, 1, 0], [], []>} : vector<64x32xbf16>, vector<64x32xbf16>, vector<64x64xf32> -> vector<64x64xf32>
    %cst_22 = arith.constant dense<0xFF800000> : vector<64xf32>
    %43 = vector.multi_reduction <maximumf>, %42, %cst_22 [1] : vector<64x64xf32> to vector<64xf32>
    %44 = vector.shape_cast %43 : vector<64xf32> to vector<64x1xf32>
    %45 = vector.broadcast %44 : vector<64x1xf32> to vector<64x64xf32>
    %46 = arith.subf %42, %45 : vector<64x64xf32>
    %47 = math.exp %46 : vector<64x64xf32>
    %cst_23 = arith.constant dense<0.000000e+00> : vector<64xf32>
    %48 = vector.multi_reduction <add>, %47, %cst_23 [1] : vector<64x64xf32> to vector<64xf32>
    %49 = vector.shape_cast %48 : vector<64xf32> to vector<64x1xf32>
    %50 = tpu.reciprocal %49 {approx = true} : vector<64x1xf32> -> vector<64x1xf32>
    %51 = vector.broadcast %50 : vector<64x1xf32> to vector<64x64xf32>
    %52 = arith.mulf %47, %51 : vector<64x64xf32>
    %53 = arith.truncf %52 : vector<64x64xf32> to vector<64x64xbf16>
    %cst_24 = arith.constant dense<0.000000e+00> : vector<64x32xf32>
    %54 = tpu.matmul %53, %41, %cst_24 {dimension_numbers = #tpu.dot_dimension_numbers<[1], [0], [0], [1], [0, 0, 1, 1], [], []>} : vector<64x64xbf16>, vector<64x32xbf16>, vector<64x32xf32> -> vector<64x32xf32>
    %55 = arith.truncf %54 : vector<64x32xf32> to vector<64x32xbf16>
    %56 = vector.extract_strided_slice %37 {offsets = [0, 0], sizes = [32, 128], strides = [1, 1]} : vector<128x128xbf16> to vector<32x128xbf16>
    %cst_25 = arith.constant dense<0.000000e+00> : vector<64x128xf32>
    %57 = tpu.matmul %55, %56, %cst_25 {dimension_numbers = #tpu.dot_dimension_numbers<[1], [0], [0], [1], [0, 0, 1, 1], [], []>} : vector<64x32xbf16>, vector<32x128xbf16>, vector<64x128xf32> -> vector<64x128xf32>
    %58 = arith.addf %38, %57 : vector<64x128xf32>
    %59 = vector.extract_strided_slice %32 {offsets = [0, 32], sizes = [64, 32], strides = [1, 1]} : vector<128x128xbf16> to vector<64x32xbf16>
    %60 = vector.extract_strided_slice %34 {offsets = [0, 32], sizes = [64, 32], strides = [1, 1]} : vector<128x128xbf16> to vector<64x32xbf16>
    %61 = vector.extract_strided_slice %36 {offsets = [0, 32], sizes = [64, 32], strides = [1, 1]} : vector<128x128xbf16> to vector<64x32xbf16>
    %cst_26 = arith.constant dense<0.000000e+00> : vector<64x64xf32>
    %62 = tpu.matmul %59, %60, %cst_26 {dimension_numbers = #tpu.dot_dimension_numbers<[1], [1], [0], [0], [0, 0, 1, 0], [], []>} : vector<64x32xbf16>, vector<64x32xbf16>, vector<64x64xf32> -> vector<64x64xf32>
    %cst_27 = arith.constant dense<0xFF800000> : vector<64xf32>
    %63 = vector.multi_reduction <maximumf>, %62, %cst_27 [1] : vector<64x64xf32> to vector<64xf32>
    %64 = vector.shape_cast %63 : vector<64xf32> to vector<64x1xf32>
    %65 = vector.broadcast %64 : vector<64x1xf32> to vector<64x64xf32>
    %66 = arith.subf %62, %65 : vector<64x64xf32>
    %67 = math.exp %66 : vector<64x64xf32>
    %cst_28 = arith.constant dense<0.000000e+00> : vector<64xf32>
    %68 = vector.multi_reduction <add>, %67, %cst_28 [1] : vector<64x64xf32> to vector<64xf32>
    %69 = vector.shape_cast %68 : vector<64xf32> to vector<64x1xf32>
    %70 = tpu.reciprocal %69 {approx = true} : vector<64x1xf32> -> vector<64x1xf32>
    %71 = vector.broadcast %70 : vector<64x1xf32> to vector<64x64xf32>
    %72 = arith.mulf %67, %71 : vector<64x64xf32>
    %73 = arith.truncf %72 : vector<64x64xf32> to vector<64x64xbf16>
    %cst_29 = arith.constant dense<0.000000e+00> : vector<64x32xf32>
    %74 = tpu.matmul %73, %61, %cst_29 {dimension_numbers = #tpu.dot_dimension_numbers<[1], [0], [0], [1], [0, 0, 1, 1], [], []>} : vector<64x64xbf16>, vector<64x32xbf16>, vector<64x32xf32> -> vector<64x32xf32>
    %75 = arith.truncf %74 : vector<64x32xf32> to vector<64x32xbf16>
    %76 = vector.extract_strided_slice %37 {offsets = [32, 0], sizes = [32, 128], strides = [1, 1]} : vector<128x128xbf16> to vector<32x128xbf16>
    %cst_30 = arith.constant dense<0.000000e+00> : vector<64x128xf32>
    %77 = tpu.matmul %75, %76, %cst_30 {dimension_numbers = #tpu.dot_dimension_numbers<[1], [0], [0], [1], [0, 0, 1, 1], [], []>} : vector<64x32xbf16>, vector<32x128xbf16>, vector<64x128xf32> -> vector<64x128xf32>
    %78 = arith.addf %58, %77 : vector<64x128xf32>
    %79 = vector.extract_strided_slice %32 {offsets = [0, 64], sizes = [64, 32], strides = [1, 1]} : vector<128x128xbf16> to vector<64x32xbf16>
    %80 = vector.extract_strided_slice %34 {offsets = [0, 64], sizes = [64, 32], strides = [1, 1]} : vector<128x128xbf16> to vector<64x32xbf16>
    %81 = vector.extract_strided_slice %36 {offsets = [0, 64], sizes = [64, 32], strides = [1, 1]} : vector<128x128xbf16> to vector<64x32xbf16>
    %cst_31 = arith.constant dense<0.000000e+00> : vector<64x64xf32>
    %82 = tpu.matmul %79, %80, %cst_31 {dimension_numbers = #tpu.dot_dimension_numbers<[1], [1], [0], [0], [0, 0, 1, 0], [], []>} : vector<64x32xbf16>, vector<64x32xbf16>, vector<64x64xf32> -> vector<64x64xf32>
    %cst_32 = arith.constant dense<0xFF800000> : vector<64xf32>
    %83 = vector.multi_reduction <maximumf>, %82, %cst_32 [1] : vector<64x64xf32> to vector<64xf32>
    %84 = vector.shape_cast %83 : vector<64xf32> to vector<64x1xf32>
    %85 = vector.broadcast %84 : vector<64x1xf32> to vector<64x64xf32>
    %86 = arith.subf %82, %85 : vector<64x64xf32>
    %87 = math.exp %86 : vector<64x64xf32>
    %cst_33 = arith.constant dense<0.000000e+00> : vector<64xf32>
    %88 = vector.multi_reduction <add>, %87, %cst_33 [1] : vector<64x64xf32> to vector<64xf32>
    %89 = vector.shape_cast %88 : vector<64xf32> to vector<64x1xf32>
    %90 = tpu.reciprocal %89 {approx = true} : vector<64x1xf32> -> vector<64x1xf32>
    %91 = vector.broadcast %90 : vector<64x1xf32> to vector<64x64xf32>
    %92 = arith.mulf %87, %91 : vector<64x64xf32>
    %93 = arith.truncf %92 : vector<64x64xf32> to vector<64x64xbf16>
    %cst_34 = arith.constant dense<0.000000e+00> : vector<64x32xf32>
    %94 = tpu.matmul %93, %81, %cst_34 {dimension_numbers = #tpu.dot_dimension_numbers<[1], [0], [0], [1], [0, 0, 1, 1], [], []>} : vector<64x64xbf16>, vector<64x32xbf16>, vector<64x32xf32> -> vector<64x32xf32>
    %95 = arith.truncf %94 : vector<64x32xf32> to vector<64x32xbf16>
    %96 = vector.extract_strided_slice %37 {offsets = [64, 0], sizes = [32, 128], strides = [1, 1]} : vector<128x128xbf16> to vector<32x128xbf16>
    %cst_35 = arith.constant dense<0.000000e+00> : vector<64x128xf32>
    %97 = tpu.matmul %95, %96, %cst_35 {dimension_numbers = #tpu.dot_dimension_numbers<[1], [0], [0], [1], [0, 0, 1, 1], [], []>} : vector<64x32xbf16>, vector<32x128xbf16>, vector<64x128xf32> -> vector<64x128xf32>
    %98 = arith.addf %78, %97 : vector<64x128xf32>
    %99 = vector.extract_strided_slice %32 {offsets = [0, 96], sizes = [64, 32], strides = [1, 1]} : vector<128x128xbf16> to vector<64x32xbf16>
    %100 = vector.extract_strided_slice %34 {offsets = [0, 96], sizes = [64, 32], strides = [1, 1]} : vector<128x128xbf16> to vector<64x32xbf16>
    %101 = vector.extract_strided_slice %36 {offsets = [0, 96], sizes = [64, 32], strides = [1, 1]} : vector<128x128xbf16> to vector<64x32xbf16>
    %cst_36 = arith.constant dense<0.000000e+00> : vector<64x64xf32>
    %102 = tpu.matmul %99, %100, %cst_36 {dimension_numbers = #tpu.dot_dimension_numbers<[1], [1], [0], [0], [0, 0, 1, 0], [], []>} : vector<64x32xbf16>, vector<64x32xbf16>, vector<64x64xf32> -> vector<64x64xf32>
    %cst_37 = arith.constant dense<0xFF800000> : vector<64xf32>
    %103 = vector.multi_reduction <maximumf>, %102, %cst_37 [1] : vector<64x64xf32> to vector<64xf32>
    %104 = vector.shape_cast %103 : vector<64xf32> to vector<64x1xf32>
    %105 = vector.broadcast %104 : vector<64x1xf32> to vector<64x64xf32>
    %106 = arith.subf %102, %105 : vector<64x64xf32>
    %107 = math.exp %106 : vector<64x64xf32>
    %cst_38 = arith.constant dense<0.000000e+00> : vector<64xf32>
    %108 = vector.multi_reduction <add>, %107, %cst_38 [1] : vector<64x64xf32> to vector<64xf32>
    %109 = vector.shape_cast %108 : vector<64xf32> to vector<64x1xf32>
    %110 = tpu.reciprocal %109 {approx = true} : vector<64x1xf32> -> vector<64x1xf32>
    %111 = vector.broadcast %110 : vector<64x1xf32> to vector<64x64xf32>
    %112 = arith.mulf %107, %111 : vector<64x64xf32>
    %113 = arith.truncf %112 : vector<64x64xf32> to vector<64x64xbf16>
    %cst_39 = arith.constant dense<0.000000e+00> : vector<64x32xf32>
    %114 = tpu.matmul %113, %101, %cst_39 {dimension_numbers = #tpu.dot_dimension_numbers<[1], [0], [0], [1], [0, 0, 1, 1], [], []>} : vector<64x64xbf16>, vector<64x32xbf16>, vector<64x32xf32> -> vector<64x32xf32>
    %115 = arith.truncf %114 : vector<64x32xf32> to vector<64x32xbf16>
    %116 = vector.extract_strided_slice %37 {offsets = [96, 0], sizes = [32, 128], strides = [1, 1]} : vector<128x128xbf16> to vector<32x128xbf16>
    %cst_40 = arith.constant dense<0.000000e+00> : vector<64x128xf32>
    %117 = tpu.matmul %115, %116, %cst_40 {dimension_numbers = #tpu.dot_dimension_numbers<[1], [0], [0], [1], [0, 0, 1, 1], [], []>} : vector<64x32xbf16>, vector<32x128xbf16>, vector<64x128xf32> -> vector<64x128xf32>
    %118 = arith.addf %98, %117 : vector<64x128xf32>
    %cst_41 = arith.constant 0.000000e+00 : f32
    %119 = vector.broadcast %cst_41 : f32 to vector<64x128xf32>
    %120 = vector.extract_strided_slice %32 {offsets = [64, 0], sizes = [64, 32], strides = [1, 1]} : vector<128x128xbf16> to vector<64x32xbf16>
    %121 = vector.extract_strided_slice %34 {offsets = [64, 0], sizes = [64, 32], strides = [1, 1]} : vector<128x128xbf16> to vector<64x32xbf16>
    %122 = vector.extract_strided_slice %36 {offsets = [64, 0], sizes = [64, 32], strides = [1, 1]} : vector<128x128xbf16> to vector<64x32xbf16>
    %cst_42 = arith.constant dense<0.000000e+00> : vector<64x64xf32>
    %123 = tpu.matmul %120, %121, %cst_42 {dimension_numbers = #tpu.dot_dimension_numbers<[1], [1], [0], [0], [0, 0, 1, 0], [], []>} : vector<64x32xbf16>, vector<64x32xbf16>, vector<64x64xf32> -> vector<64x64xf32>
    %cst_43 = arith.constant dense<0xFF800000> : vector<64xf32>
    %124 = vector.multi_reduction <maximumf>, %123, %cst_43 [1] : vector<64x64xf32> to vector<64xf32>
    %125 = vector.shape_cast %124 : vector<64xf32> to vector<64x1xf32>
    %126 = vector.broadcast %125 : vector<64x1xf32> to vector<64x64xf32>
    %127 = arith.subf %123, %126 : vector<64x64xf32>
    %128 = math.exp %127 : vector<64x64xf32>
    %cst_44 = arith.constant dense<0.000000e+00> : vector<64xf32>
    %129 = vector.multi_reduction <add>, %128, %cst_44 [1] : vector<64x64xf32> to vector<64xf32>
    %130 = vector.shape_cast %129 : vector<64xf32> to vector<64x1xf32>
    %131 = tpu.reciprocal %130 {approx = true} : vector<64x1xf32> -> vector<64x1xf32>
    %132 = vector.broadcast %131 : vector<64x1xf32> to vector<64x64xf32>
    %133 = arith.mulf %128, %132 : vector<64x64xf32>
    %134 = arith.truncf %133 : vector<64x64xf32> to vector<64x64xbf16>
    %cst_45 = arith.constant dense<0.000000e+00> : vector<64x32xf32>
    %135 = tpu.matmul %134, %122, %cst_45 {dimension_numbers = #tpu.dot_dimension_numbers<[1], [0], [0], [1], [0, 0, 1, 1], [], []>} : vector<64x64xbf16>, vector<64x32xbf16>, vector<64x32xf32> -> vector<64x32xf32>
    %136 = arith.truncf %135 : vector<64x32xf32> to vector<64x32xbf16>
    %137 = vector.extract_strided_slice %37 {offsets = [0, 0], sizes = [32, 128], strides = [1, 1]} : vector<128x128xbf16> to vector<32x128xbf16>
    %cst_46 = arith.constant dense<0.000000e+00> : vector<64x128xf32>
    %138 = tpu.matmul %136, %137, %cst_46 {dimension_numbers = #tpu.dot_dimension_numbers<[1], [0], [0], [1], [0, 0, 1, 1], [], []>} : vector<64x32xbf16>, vector<32x128xbf16>, vector<64x128xf32> -> vector<64x128xf32>
    %139 = arith.addf %119, %138 : vector<64x128xf32>
    %140 = vector.extract_strided_slice %32 {offsets = [64, 32], sizes = [64, 32], strides = [1, 1]} : vector<128x128xbf16> to vector<64x32xbf16>
    %141 = vector.extract_strided_slice %34 {offsets = [64, 32], sizes = [64, 32], strides = [1, 1]} : vector<128x128xbf16> to vector<64x32xbf16>
    %142 = vector.extract_strided_slice %36 {offsets = [64, 32], sizes = [64, 32], strides = [1, 1]} : vector<128x128xbf16> to vector<64x32xbf16>
    %cst_47 = arith.constant dense<0.000000e+00> : vector<64x64xf32>
    %143 = tpu.matmul %140, %141, %cst_47 {dimension_numbers = #tpu.dot_dimension_numbers<[1], [1], [0], [0], [0, 0, 1, 0], [], []>} : vector<64x32xbf16>, vector<64x32xbf16>, vector<64x64xf32> -> vector<64x64xf32>
    %cst_48 = arith.constant dense<0xFF800000> : vector<64xf32>
    %144 = vector.multi_reduction <maximumf>, %143, %cst_48 [1] : vector<64x64xf32> to vector<64xf32>
    %145 = vector.shape_cast %144 : vector<64xf32> to vector<64x1xf32>
    %146 = vector.broadcast %145 : vector<64x1xf32> to vector<64x64xf32>
    %147 = arith.subf %143, %146 : vector<64x64xf32>
    %148 = math.exp %147 : vector<64x64xf32>
    %cst_49 = arith.constant dense<0.000000e+00> : vector<64xf32>
    %149 = vector.multi_reduction <add>, %148, %cst_49 [1] : vector<64x64xf32> to vector<64xf32>
    %150 = vector.shape_cast %149 : vector<64xf32> to vector<64x1xf32>
    %151 = tpu.reciprocal %150 {approx = true} : vector<64x1xf32> -> vector<64x1xf32>
    %152 = vector.broadcast %151 : vector<64x1xf32> to vector<64x64xf32>
    %153 = arith.mulf %148, %152 : vector<64x64xf32>
    %154 = arith.truncf %153 : vector<64x64xf32> to vector<64x64xbf16>
    %cst_50 = arith.constant dense<0.000000e+00> : vector<64x32xf32>
    %155 = tpu.matmul %154, %142, %cst_50 {dimension_numbers = #tpu.dot_dimension_numbers<[1], [0], [0], [1], [0, 0, 1, 1], [], []>} : vector<64x64xbf16>, vector<64x32xbf16>, vector<64x32xf32> -> vector<64x32xf32>
    %156 = arith.truncf %155 : vector<64x32xf32> to vector<64x32xbf16>
    %157 = vector.extract_strided_slice %37 {offsets = [32, 0], sizes = [32, 128], strides = [1, 1]} : vector<128x128xbf16> to vector<32x128xbf16>
    %cst_51 = arith.constant dense<0.000000e+00> : vector<64x128xf32>
    %158 = tpu.matmul %156, %157, %cst_51 {dimension_numbers = #tpu.dot_dimension_numbers<[1], [0], [0], [1], [0, 0, 1, 1], [], []>} : vector<64x32xbf16>, vector<32x128xbf16>, vector<64x128xf32> -> vector<64x128xf32>
    %159 = arith.addf %139, %158 : vector<64x128xf32>
    %160 = vector.extract_strided_slice %32 {offsets = [64, 64], sizes = [64, 32], strides = [1, 1]} : vector<128x128xbf16> to vector<64x32xbf16>
    %161 = vector.extract_strided_slice %34 {offsets = [64, 64], sizes = [64, 32], strides = [1, 1]} : vector<128x128xbf16> to vector<64x32xbf16>
    %162 = vector.extract_strided_slice %36 {offsets = [64, 64], sizes = [64, 32], strides = [1, 1]} : vector<128x128xbf16> to vector<64x32xbf16>
    %cst_52 = arith.constant dense<0.000000e+00> : vector<64x64xf32>
    %163 = tpu.matmul %160, %161, %cst_52 {dimension_numbers = #tpu.dot_dimension_numbers<[1], [1], [0], [0], [0, 0, 1, 0], [], []>} : vector<64x32xbf16>, vector<64x32xbf16>, vector<64x64xf32> -> vector<64x64xf32>
    %cst_53 = arith.constant dense<0xFF800000> : vector<64xf32>
    %164 = vector.multi_reduction <maximumf>, %163, %cst_53 [1] : vector<64x64xf32> to vector<64xf32>
    %165 = vector.shape_cast %164 : vector<64xf32> to vector<64x1xf32>
    %166 = vector.broadcast %165 : vector<64x1xf32> to vector<64x64xf32>
    %167 = arith.subf %163, %166 : vector<64x64xf32>
    %168 = math.exp %167 : vector<64x64xf32>
    %cst_54 = arith.constant dense<0.000000e+00> : vector<64xf32>
    %169 = vector.multi_reduction <add>, %168, %cst_54 [1] : vector<64x64xf32> to vector<64xf32>
    %170 = vector.shape_cast %169 : vector<64xf32> to vector<64x1xf32>
    %171 = tpu.reciprocal %170 {approx = true} : vector<64x1xf32> -> vector<64x1xf32>
    %172 = vector.broadcast %171 : vector<64x1xf32> to vector<64x64xf32>
    %173 = arith.mulf %168, %172 : vector<64x64xf32>
    %174 = arith.truncf %173 : vector<64x64xf32> to vector<64x64xbf16>
    %cst_55 = arith.constant dense<0.000000e+00> : vector<64x32xf32>
    %175 = tpu.matmul %174, %162, %cst_55 {dimension_numbers = #tpu.dot_dimension_numbers<[1], [0], [0], [1], [0, 0, 1, 1], [], []>} : vector<64x64xbf16>, vector<64x32xbf16>, vector<64x32xf32> -> vector<64x32xf32>
    %176 = arith.truncf %175 : vector<64x32xf32> to vector<64x32xbf16>
    %177 = vector.extract_strided_slice %37 {offsets = [64, 0], sizes = [32, 128], strides = [1, 1]} : vector<128x128xbf16> to vector<32x128xbf16>
    %cst_56 = arith.constant dense<0.000000e+00> : vector<64x128xf32>
    %178 = tpu.matmul %176, %177, %cst_56 {dimension_numbers = #tpu.dot_dimension_numbers<[1], [0], [0], [1], [0, 0, 1, 1], [], []>} : vector<64x32xbf16>, vector<32x128xbf16>, vector<64x128xf32> -> vector<64x128xf32>
    %179 = arith.addf %159, %178 : vector<64x128xf32>
    %180 = vector.extract_strided_slice %32 {offsets = [64, 96], sizes = [64, 32], strides = [1, 1]} : vector<128x128xbf16> to vector<64x32xbf16>
    %181 = vector.extract_strided_slice %34 {offsets = [64, 96], sizes = [64, 32], strides = [1, 1]} : vector<128x128xbf16> to vector<64x32xbf16>
    %182 = vector.extract_strided_slice %36 {offsets = [64, 96], sizes = [64, 32], strides = [1, 1]} : vector<128x128xbf16> to vector<64x32xbf16>
    %cst_57 = arith.constant dense<0.000000e+00> : vector<64x64xf32>
    %183 = tpu.matmul %180, %181, %cst_57 {dimension_numbers = #tpu.dot_dimension_numbers<[1], [1], [0], [0], [0, 0, 1, 0], [], []>} : vector<64x32xbf16>, vector<64x32xbf16>, vector<64x64xf32> -> vector<64x64xf32>
    %cst_58 = arith.constant dense<0xFF800000> : vector<64xf32>
    %184 = vector.multi_reduction <maximumf>, %183, %cst_58 [1] : vector<64x64xf32> to vector<64xf32>
    %185 = vector.shape_cast %184 : vector<64xf32> to vector<64x1xf32>
    %186 = vector.broadcast %185 : vector<64x1xf32> to vector<64x64xf32>
    %187 = arith.subf %183, %186 : vector<64x64xf32>
    %188 = math.exp %187 : vector<64x64xf32>
    %cst_59 = arith.constant dense<0.000000e+00> : vector<64xf32>
    %189 = vector.multi_reduction <add>, %188, %cst_59 [1] : vector<64x64xf32> to vector<64xf32>
    %190 = vector.shape_cast %189 : vector<64xf32> to vector<64x1xf32>
    %191 = tpu.reciprocal %190 {approx = true} : vector<64x1xf32> -> vector<64x1xf32>
    %192 = vector.broadcast %191 : vector<64x1xf32> to vector<64x64xf32>
    %193 = arith.mulf %188, %192 : vector<64x64xf32>
    %194 = arith.truncf %193 : vector<64x64xf32> to vector<64x64xbf16>
    %cst_60 = arith.constant dense<0.000000e+00> : vector<64x32xf32>
    %195 = tpu.matmul %194, %182, %cst_60 {dimension_numbers = #tpu.dot_dimension_numbers<[1], [0], [0], [1], [0, 0, 1, 1], [], []>} : vector<64x64xbf16>, vector<64x32xbf16>, vector<64x32xf32> -> vector<64x32xf32>
    %196 = arith.truncf %195 : vector<64x32xf32> to vector<64x32xbf16>
    %197 = vector.extract_strided_slice %37 {offsets = [96, 0], sizes = [32, 128], strides = [1, 1]} : vector<128x128xbf16> to vector<32x128xbf16>
    %cst_61 = arith.constant dense<0.000000e+00> : vector<64x128xf32>
    %198 = tpu.matmul %196, %197, %cst_61 {dimension_numbers = #tpu.dot_dimension_numbers<[1], [0], [0], [1], [0, 0, 1, 1], [], []>} : vector<64x32xbf16>, vector<32x128xbf16>, vector<64x128xf32> -> vector<64x128xf32>
    %199 = arith.addf %179, %198 : vector<64x128xf32>
    %200 = tpu.concatenate %118, %199 in 0 : vector<64x128xf32>, vector<64x128xf32> -> vector<128x128xf32>
    %201 = arith.addf %6, %200 : vector<128x128xf32>
    %202 = vector.broadcast %2 : vector<1x128xf32> to vector<128x128xf32>
    %203 = arith.addf %201, %202 : vector<128x128xf32>
    %cst_62 = arith.constant dense<0.000000e+00> : vector<128xf32>
    %204 = vector.multi_reduction <add>, %203, %cst_62 [1] : vector<128x128xf32> to vector<128xf32>
    %205 = vector.shape_cast %204 : vector<128xf32> to vector<128x1xf32>
    %cst_63 = arith.constant 1.280000e+02 : f32
    %206 = vector.broadcast %cst_63 : f32 to vector<128x1xf32>
    %207 = arith.divf %205, %206 : vector<128x1xf32>
    %208 = vector.broadcast %207 : vector<128x1xf32> to vector<128x128xf32>
    %209 = arith.subf %203, %208 : vector<128x128xf32>
    %210 = arith.mulf %209, %209 : vector<128x128xf32>
    %cst_64 = arith.constant dense<0.000000e+00> : vector<128xf32>
    %211 = vector.multi_reduction <add>, %210, %cst_64 [1] : vector<128x128xf32> to vector<128xf32>
    %212 = vector.shape_cast %211 : vector<128xf32> to vector<128x1xf32>
    %cst_65 = arith.constant 1.280000e+02 : f32
    %213 = vector.broadcast %cst_65 : f32 to vector<128x1xf32>
    %214 = arith.divf %212, %213 : vector<128x1xf32>
    %cst_66 = arith.constant 9.99999974E-6 : f32
    %215 = vector.broadcast %cst_66 : f32 to vector<128x1xf32>
    %216 = arith.addf %214, %215 : vector<128x1xf32>
    %217 = math.rsqrt %216 : vector<128x1xf32>
    %218 = vector.broadcast %217 : vector<128x1xf32> to vector<128x128xf32>
    %219 = arith.mulf %209, %218 : vector<128x128xf32>
    %220 = vector.broadcast %3 : vector<1x128xf32> to vector<128x128xf32>
    %221 = arith.mulf %219, %220 : vector<128x128xf32>
    %222 = vector.broadcast %4 : vector<1x128xf32> to vector<128x128xf32>
    %223 = arith.addf %221, %222 : vector<128x128xf32>
    %224 = arith.truncf %223 : vector<128x128xf32> to vector<128x128xbf16>
    %c0_67 = arith.constant 0 : index
    %c0_68 = arith.constant 0 : index
    %225 = vector.load %arg7[%c0_67, %c0_68] : memref<128x512xbf16, #tpu.memory_space<vmem>>, vector<128x512xbf16>
    %cst_69 = arith.constant dense<0.000000e+00> : vector<128x512xf32>
    %226 = tpu.matmul %224, %225, %cst_69 {dimension_numbers = #tpu.dot_dimension_numbers<[1], [0], [0], [1], [0, 0, 1, 1], [], []>} : vector<128x128xbf16>, vector<128x512xbf16>, vector<128x512xf32> -> vector<128x512xf32>
    %c0_70 = arith.constant 0 : index
    %c0_71 = arith.constant 0 : index
    %227 = vector.load %arg3[%c0_70, %c0_71] : memref<1x512xf32, #tpu.memory_space<vmem>>, vector<1x512xf32>
    %228 = vector.broadcast %227 : vector<1x512xf32> to vector<128x512xf32>
    %229 = arith.addf %226, %228 : vector<128x512xf32>
    %cst_72 = arith.constant 5.000000e-01 : f32
    %230 = vector.broadcast %cst_72 : f32 to vector<128x512xf32>
    %231 = arith.mulf %230, %229 : vector<128x512xf32>
    %232 = arith.mulf %229, %229 : vector<128x512xf32>
    %233 = arith.mulf %232, %229 : vector<128x512xf32>
    %cst_73 = arith.constant 4.471500e-02 : f32
    %234 = vector.broadcast %cst_73 : f32 to vector<128x512xf32>
    %235 = arith.mulf %234, %233 : vector<128x512xf32>
    %236 = arith.addf %229, %235 : vector<128x512xf32>
    %cst_74 = arith.constant 0.797884583 : f32
    %237 = vector.broadcast %cst_74 : f32 to vector<128x512xf32>
    %238 = arith.mulf %237, %236 : vector<128x512xf32>
    %239 = math.tanh %238 : vector<128x512xf32>
    %cst_75 = arith.constant 1.000000e+00 : f32
    %240 = vector.broadcast %cst_75 : f32 to vector<128x512xf32>
    %241 = arith.addf %240, %239 : vector<128x512xf32>
    %242 = arith.mulf %231, %241 : vector<128x512xf32>
    %243 = arith.truncf %242 : vector<128x512xf32> to vector<128x512xbf16>
    %c0_76 = arith.constant 0 : index
    %c0_77 = arith.constant 0 : index
    %244 = vector.load %arg8[%c0_76, %c0_77] : memref<512x128xbf16, #tpu.memory_space<vmem>>, vector<512x128xbf16>
    %cst_78 = arith.constant dense<0.000000e+00> : vector<128x128xf32>
    %245 = tpu.matmul %243, %244, %cst_78 {dimension_numbers = #tpu.dot_dimension_numbers<[1], [0], [0], [1], [0, 0, 1, 1], [], []>} : vector<128x512xbf16>, vector<512x128xbf16>, vector<128x128xf32> -> vector<128x128xf32>
    %246 = vector.broadcast %5 : vector<1x128xf32> to vector<128x128xf32>
    %247 = arith.addf %245, %246 : vector<128x128xf32>
    %248 = arith.addf %203, %247 : vector<128x128xf32>
    %c0_79 = arith.constant 0 : index
    %c0_80 = arith.constant 0 : index
    %249 = vector.load %arg9[%c0_79, %c0_80] : memref<128x128xf32, #tpu.memory_space<vmem>>, vector<128x128xf32>
    tpu.vector_store %arg9[%c0_79, %c0_80], %248 {strides = array<i32>} : memref<128x128xf32, #tpu.memory_space<vmem>>, vector<128x128xf32>,
    return
  }
  func.func @transform_0(%arg0: i32) -> (i32, i32) {
    %c0_i32 = arith.constant 0 : i32
    %c0_i32_0 = arith.constant 0 : i32
    return %arg0, %c0_i32 : i32, i32
  }
  func.func @transform_1(%arg0: i32) -> (i32, i32) {
    %c0_i32 = arith.constant 0 : i32
    %c0_i32_0 = arith.constant 0 : i32
    %c0_i32_1 = arith.constant 0 : i32
    return %c0_i32, %c0_i32_0 : i32, i32
  }
  func.func @transform_2(%arg0: i32) -> (i32, i32) {
    %c0_i32 = arith.constant 0 : i32
    %c0_i32_0 = arith.constant 0 : i32
    %c0_i32_1 = arith.constant 0 : i32
    return %c0_i32, %c0_i32_0 : i32, i32
  }
  func.func @transform_3(%arg0: i32) -> (i32, i32) {
    %c0_i32 = arith.constant 0 : i32
    %c0_i32_0 = arith.constant 0 : i32
    %c0_i32_1 = arith.constant 0 : i32
    return %c0_i32, %c0_i32_0 : i32, i32
  }
  func.func @transform_4(%arg0: i32) -> (i32, i32) {
    %c0_i32 = arith.constant 0 : i32
    %c0_i32_0 = arith.constant 0 : i32
    %c0_i32_1 = arith.constant 0 : i32
    return %c0_i32, %c0_i32_0 : i32, i32
  }
  func.func @transform_5(%arg0: i32) -> (i32, i32) {
    %c0_i32 = arith.constant 0 : i32
    %c0_i32_0 = arith.constant 0 : i32
    %c0_i32_1 = arith.constant 0 : i32
    return %c0_i32, %c0_i32_0 : i32, i32
  }
  func.func @transform_6(%arg0: i32) -> (i32, i32) {
    %c0_i32 = arith.constant 0 : i32
    %c0_i32_0 = arith.constant 0 : i32
    %c0_i32_1 = arith.constant 0 : i32
    return %c0_i32, %c0_i32_0 : i32, i32
  }
  func.func @transform_7(%arg0: i32) -> (i32, i32) {
    %c0_i32 = arith.constant 0 : i32
    %c0_i32_0 = arith.constant 0 : i32
    %c0_i32_1 = arith.constant 0 : i32
    return %c0_i32, %c0_i32_0 : i32, i32
  }
  func.func @transform_8(%arg0: i32) -> (i32, i32) {
    %c0_i32 = arith.constant 0 : i32
    %c0_i32_0 = arith.constant 0 : i32
    return %arg0, %c0_i32 : i32, i32
  }
}

</mosaic_0001>

<bundles_post_ra>
// kernel: block_forward.1
= control target key start
LH: loop header
LB: loop body
LE: loop exit
PB: predicated region body
PF: predicated region fallthrough
CT: control target
= control target key end

     0   :  { %13 = vsyncpa [#allocation3], 0  ;;  %s9856_s0 = inlined_call_operand.hbm [shape: f32[128,128], index: 0, kind: input, shape index: {}]   ;;  %s9857_s1 = inlined_call_operand.hbm [shape: f32[6,128], index: 1, kind: input, shape index: {}]   ;;  %s9858_s2 = inlined_call_operand.hbm [shape: f32[1,512], index: 2, kind: input, shape index: {}]   ;;  %s9859_s3 = inlined_call_operand.hbm [shape: bf16[128,128], index: 3, kind: input, shape index: {}]   ;;  %s9860_s4 = inlined_call_operand.hbm [shape: bf16[128,256], index: 4, kind: input, shape index: {}]   ;;  %s9861_s5 = inlined_call_operand.hbm [shape: bf16[128,128], index: 5, kind: input, shape index: {}]   ;;  %s9862_s6 = inlined_call_operand.hbm [shape: bf16[128,512], index: 6, kind: input, shape index: {}]   ;;  %s9863_s7 = inlined_call_operand.hbm [shape: bf16[512,128], index: 7, kind: input, shape index: {}]   ;;  %s9864_s8 = inlined_call_operand.hbm [shape: f32[128,128], index: 8, kind: output, shape index: {}]  }
   0x1   :  { %14 = vsyncpa [#allocation6], 0 }
   0x2   :  { %15 = vsyncpa [#allocation9], 0 }
   0x3   :  { %16 = vsyncpa [#allocation12], 0 }
   0x4   :  { %17 = vsyncpa [#allocation15], 0 }
   0x5   :  { %18 = vsyncpa [#allocation4], 0  ;;  %s7396_s27 = smov [#allocation5]   ;;  %s7397_s29 = smov [#allocation8]  }
   0x6   :  { %s37_s28 = sshll.u32 %s7396_s27, 4  ;;  %s56_s30 = sshll.u32 %s7397_s29, 4  ;;  %s38_s28 = int_to_ptr.vmem [resolvable:$true] %s37_s28  ;;  %s7459_s30 = int_to_ptr.vmem [resolvable:$true] %s56_s30 }
   0x7   :  { %s7186_s11 = scalar_lea.hbm %s9857_s1, 128 }
   0x8   :  { %p7187_p0 = scmp.ne.s32.totalorder %s9857_s1, %s7186_s11  ;;  %p7190_p1 = scmp.lt.u32.totalorder %s7186_s11, %s9857_s1 }
   0xa   :  { %p7192_p2 = pnand %p7190_p1, %p7187_p0 }
   0xc   :  { %7195 = shalt.err (!%p7192_p2)
}
   0xd   :  { %s7196_s16 = scalar_lea.vmem %s38_s28, 128  ;;  %p7201_p4 = scmp.lt.s32.totalorder %s38_s28, %s38_s28 }
   0xe   :  { %p7197_p3 = scmp.ne.s32.totalorder %s38_s28, %s7196_s16  ;;  %p7202_p5 = scmp.lt.s32.totalorder %s7196_s16, %s7196_s16 }
  0x10   :  { %p7203_p6 = por %p7202_p5, %p7201_p4 }
  0x12   :  { %p7204_p7 = pnand %p7203_p6, %p7197_p3 }
  0x14   :  { %7207 = shalt.err (!%p7204_p7)
}
  0x15   :  { %40 = dma.hbm_to_vmem [thread:$0]  %s9857_s1, 128, %s38_s28, [#allocation6]  }
  0x16   :  { %s7208_s21 = scalar_lea.hbm %s9859_s3, 1024 }
  0x17   :  { %p7209_p8 = scmp.ne.s32.totalorder %s9859_s3, %s7208_s21  ;;  %p7212_p9 = scmp.lt.u32.totalorder %s7208_s21, %s9859_s3 }
  0x19   :  { %p7214_p10 = pnand %p7212_p9, %p7209_p8 }
  0x1b   :  { %7217 = shalt.err (!%p7214_p10)
}
  0x1c   :  { %s7218_s26 = scalar_lea.vmem %s7459_s30, 1024  ;;  %p7223_p12 = scmp.lt.s32.totalorder %s7459_s30, %s7459_s30 }
  0x1d   :  { %p7219_p11 = scmp.ne.s32.totalorder %s7459_s30, %s7218_s26  ;;  %p7224_p13 = scmp.lt.s32.totalorder %s7218_s26, %s7218_s26 }
  0x1f   :  { %p7225_p0 = por %p7224_p13, %p7223_p12 }
  0x21   :  { %p7226_p1 = pnand %p7225_p0, %p7219_p11 }
  0x23   :  { %7229 = shalt.err (!%p7226_p1)
}
  0x24   :  { %s7398_s1 = smov 64   ;;  %s7399_s27 = smov 4  }
  0x25   :  { %62 = dma.hbm_to_vmem [thread:$0]  %s9859_s3, 1024, %s7459_s30, [#allocation9], %s7398_s1, %s7398_s1, %s7399_s27  }
  0x26   :  { %s7400_s9 = smov [#allocation11]   ;;  %s7401_s11 = smov [#allocation2]  }
  0x27   :  { %s80_s10 = sshll.u32 %s7400_s9, 4  ;;  %s24_s12 = sshll.u32 %s7401_s11, 4  ;;  %s81_s10 = int_to_ptr.vmem [resolvable:$true] %s80_s10  ;;  %s7493_s12 = int_to_ptr.vmem [resolvable:$true] %s24_s12 }
  0x28   :  { %s7230_s15 = scalar_lea.hbm %s9861_s5, 1024 }
  0x29   :  { %p7231_p2 = scmp.ne.s32.totalorder %s9861_s5, %s7230_s15  ;;  %p7234_p3 = scmp.lt.u32.totalorder %s7230_s15, %s9861_s5 }
  0x2b   :  { %p7236_p4 = pnand %p7234_p3, %p7231_p2 }
  0x2d   :  { %7239 = shalt.err (!%p7236_p4)
}
  0x2e   :  { %s7240_s3 = scalar_lea.vmem %s81_s10, 1024  ;;  %p7245_p6 = scmp.lt.s32.totalorder %s81_s10, %s81_s10 }
  0x2f   :  { %p7241_p5 = scmp.ne.s32.totalorder %s81_s10, %s7240_s3  ;;  %p7246_p7 = scmp.lt.s32.totalorder %s7240_s3, %s7240_s3 }
  0x31   :  { %p7247_p8 = por %p7246_p7, %p7245_p6 }
  0x33   :  { %p7248_p9 = pnand %p7247_p8, %p7241_p5 }
  0x35   :  { %7251 = shalt.err (!%p7248_p9)
}
  0x36   :  { %86 = dma.hbm_to_vmem [thread:$0]  %s9861_s5, 1024, %s81_s10, [#allocation12], %s7398_s1, %s7398_s1, %s7399_s27  }
  0x37   :  { %s7252_s23 = scalar_lea.hbm %s9856_s0, 2048 }
  0x38   :  { %p7253_p10 = scmp.ne.s32.totalorder %s9856_s0, %s7252_s23  ;;  %p7256_p11 = scmp.lt.u32.totalorder %s7252_s23, %s9856_s0 }
  0x3a   :  { %p7258_p12 = pnand %p7256_p11, %p7253_p10 }
  0x3c   :  { %7261 = shalt.err (!%p7258_p12)
}
  0x3d   :  { %s7262_s29 = scalar_lea.vmem %s7493_s12, 2048  ;;  %p7267_p0 = scmp.lt.s32.totalorder %s7493_s12, %s7493_s12 }
  0x3e   :  { %p7263_p13 = scmp.ne.s32.totalorder %s7493_s12, %s7262_s29  ;;  %p7268_p1 = scmp.lt.s32.totalorder %s7262_s29, %s7262_s29 }
  0x40   :  { %p7269_p2 = por %p7268_p1, %p7267_p0 }
  0x42   :  { %p7270_p3 = pnand %p7269_p2, %p7263_p13 }
  0x44   :  { %7273 = shalt.err (!%p7270_p3)
}
  0x45   :  { %s7402_s5 = smov 128   ;;  %s7403_s9 = smov 8  }
  0x46   :  { %30 = dma.hbm_to_vmem [thread:$0]  %s9856_s0, 2048, %s7493_s12, [#allocation3], %s7402_s5, %s7402_s5, %s7403_s9  }
  0x47   :  { %s7404_s13 = smov [#allocation7]   ;;  %s7405_s15 = smov [#allocation10]  }
  0x48   :  { %s47_s14 = sshll.u32 %s7404_s13, 4  ;;  %s68_s16 = sshll.u32 %s7405_s15, 4  ;;  %s48_s14 = int_to_ptr.vmem [resolvable:$true] %s47_s14  ;;  %s7530_s16 = int_to_ptr.vmem [resolvable:$true] %s68_s16 }
  0x49   :  { %s7274_s19 = scalar_lea.hbm %s9858_s2, 64 }
  0x4a   :  { %p7275_p4 = scmp.ne.s32.totalorder %s9858_s2, %s7274_s19  ;;  %p7278_p5 = scmp.lt.u32.totalorder %s7274_s19, %s9858_s2 }
  0x4c   :  { %p7280_p6 = pnand %p7278_p5, %p7275_p4 }
  0x4e   :  { %7283 = shalt.err (!%p7280_p6)
}
  0x4f   :  { %s7284_s0 = scalar_lea.vmem %s48_s14, 64  ;;  %p7289_p8 = scmp.lt.s32.totalorder %s48_s14, %s48_s14 }
  0x50   :  { %p7285_p7 = scmp.ne.s32.totalorder %s48_s14, %s7284_s0  ;;  %p7290_p9 = scmp.lt.s32.totalorder %s7284_s0, %s7284_s0 }
  0x52   :  { %p7291_p10 = por %p7290_p9, %p7289_p8 }
  0x54   :  { %p7292_p11 = pnand %p7291_p10, %p7285_p7 }
  0x56   :  { %7295 = shalt.err (!%p7292_p11)
}
  0x57   :  { %50 = dma.hbm_to_vmem [thread:$0]  %s9858_s2, 64, %s48_s14, [#allocation6]  }
  0x58   :  { %s7296_s25 = scalar_lea.hbm %s9860_s4, 2048 }
  0x59   :  { %p7297_p12 = scmp.ne.s32.totalorder %s9860_s4, %s7296_s25  ;;  %p7300_p13 = scmp.lt.u32.totalorder %s7296_s25, %s9860_s4 }
  0x5b   :  { %p7302_p0 = pnand %p7300_p13, %p7297_p12 }
  0x5d   :  { %7305 = shalt.err (!%p7302_p0)
}
  0x5e   :  { %s7306_s11 = scalar_lea.vmem %s7530_s16, 2048  ;;  %p7311_p2 = scmp.lt.s32.totalorder %s7530_s16, %s7530_s16 }
  0x5f   :  { %p7307_p1 = scmp.ne.s32.totalorder %s7530_s16, %s7306_s11  ;;  %p7312_p3 = scmp.lt.s32.totalorder %s7306_s11, %s7306_s11 }
  0x61   :  { %p7313_p4 = por %p7312_p3, %p7311_p2 }
  0x63   :  { %p7314_p5 = pnand %p7313_p4, %p7307_p1 }
  0x65   :  { %7317 = shalt.err (!%p7314_p5)
}
  0x66   :  { %74 = dma.hbm_to_vmem [thread:$0]  %s9860_s4, 2048, %s7530_s16, [#allocation9], %s7402_s5, %s7402_s5, %s7403_s9  }
  0x67   :  { %s7406_s14 = smov [#allocation13]   ;;  %s7318_s19 = scalar_lea.hbm %s9862_s6, 4096 }
  0x68   :  { %s92_s15 = sshll.u32 %s7406_s14, 4  ;;  %p7319_p6 = scmp.ne.s32.totalorder %s9862_s6, %s7318_s19  ;;  %s93_s15 = int_to_ptr.vmem [resolvable:$true] %s92_s15 }
  0x69   :  { %p7322_p7 = scmp.lt.u32.totalorder %s7318_s19, %s9862_s6 }
  0x6b   :  { %p7324_p8 = pnand %p7322_p7, %p7319_p6 }
  0x6d   :  { %7327 = shalt.err (!%p7324_p8)
}
  0x6e   :  { %s7328_s0 = scalar_lea.vmem %s93_s15, 4096  ;;  %p7333_p10 = scmp.lt.s32.totalorder %s93_s15, %s93_s15 }
  0x6f   :  { %p7329_p9 = scmp.ne.s32.totalorder %s93_s15, %s7328_s0  ;;  %p7334_p11 = scmp.lt.s32.totalorder %s7328_s0, %s7328_s0 }
  0x71   :  { %p7335_p12 = por %p7334_p11, %p7333_p10 }
  0x73   :  { %p7336_p13 = pnand %p7335_p12, %p7329_p9 }
  0x75   :  { %7339 = shalt.err (!%p7336_p13)
}
  0x76   :  { %s7407_s4 = smov 256   ;;  %s7408_s16 = smov 16  }
  0x77   :  { %98 = dma.hbm_to_vmem [thread:$0]  %s9862_s6, 4096, %s93_s15, [#allocation12], %s7407_s4, %s7407_s4, %s7408_s16  }
  0x78   :  { %s7409_s23 = smov [#allocation14]   ;;  %s7340_s28 = scalar_lea.hbm %s9863_s7, 4096 }
  0x79   :  { %s104_s24 = sshll.u32 %s7409_s23, 4  ;;  %p7341_p0 = scmp.ne.s32.totalorder %s9863_s7, %s7340_s28  ;;  %s105_s24 = int_to_ptr.vmem [resolvable:$true] %s104_s24 }
  0x7a   :  { %p7344_p1 = scmp.lt.u32.totalorder %s7340_s28, %s9863_s7 }
  0x7c   :  { %p7346_p2 = pnand %p7344_p1, %p7341_p0 }
  0x7e   :  { %7349 = shalt.err (!%p7346_p2)
}
  0x7f   :  { %s7350_s13 = scalar_lea.vmem %s105_s24, 4096  ;;  %p7355_p4 = scmp.lt.s32.totalorder %s105_s24, %s105_s24 }
  0x80   :  { %p7351_p3 = scmp.ne.s32.totalorder %s105_s24, %s7350_s13  ;;  %p7356_p5 = scmp.lt.s32.totalorder %s7350_s13, %s7350_s13 }
  0x82   :  { %p7357_p6 = por %p7356_p5, %p7355_p4 }
  0x84   :  { %p7358_p7 = pnand %p7357_p6, %p7351_p3 }
  0x86   :  { %7361 = shalt.err (!%p7358_p7)
}
  0x87   :  { %110 = dma.hbm_to_vmem [thread:$0]  %s9863_s7, 4096, %s105_s24, [#allocation15], %s7398_s1, %s7398_s1, %s7399_s27  }
  0x88   :  { %7384 = dma.done.wait [#allocation3], 2048  }
  0x89   :  { %7385 = vsyncadd [#allocation3], 4294965248 }
  0x8a   :  { %7386 = dma.done.wait [#allocation6], 192  }
  0x8b   :  { %7387 = vsyncadd [#allocation6], 4294967104 }
  0x8c   :  { %7388 = dma.done.wait [#allocation9], 3072  }
  0x8d   :  { %7389 = vsyncadd [#allocation9], 4294964224 }
  0x8e   :  { %7390 = dma.done.wait [#allocation12], 5120  }
  0x8f   :  { %7391 = vsyncadd [#allocation12], 4294962176 }
  0x90   :  { %7392 = dma.done.wait [#allocation15], 4096  }
  0x91   :  { %7393 = vsyncadd [#allocation15], 4294963200  ;;  %v142_v0 = vld [vmem:[#allocation2] sm:$0xff]  ;;  %v144_v1 = vld [vmem:[#allocation2 + $0x10] sm:$0xff]  ;;  %vm793_vm0 = vcmask 261120   ;;  %s7411_s7 = smov 96  }
  0x92   :  { %158 = vadd.xlane.f32.xlu0 %v142_v0  ;;  %162 = vadd.xlane.f32.xlu1 %v144_v1  ;;  %v143_v2 = vld [vmem:[#allocation2 + $0x8] sm:$0xff]  ;;  %v145_v3 = vld [vmem:[#allocation2 + $0x18] sm:$0xff]  ;;  %v146_v4 = vld [vmem:[#allocation2 + $0x20] sm:$0xff]  ;;  %vm883_vm1 = vcmask 523264   ;;  %s7412_s27 = smov 32  }
  0x93   :  { %v147_v5 = vld [vmem:[#allocation2 + $0x28] sm:$0xff]  ;;  %v148_v6 = vld [vmem:[#allocation2 + $0x30] sm:$0xff]  ;;  %v149_v7 = vld [vmem:[#allocation2 + $0x38] sm:$0xff] }
  0x94   :  { %v6594_v8 = vld [vmem:[#allocation10 + $0x4] ss:$8 sps:$4 sm:$0xff]   ;;  %v6596_v9 = vld [vmem:[#allocation10] ss:$8 sps:$4 sm:$0xff]   ;;  %v6598_v11 = vld [vmem:[#allocation10 + $0x14] ss:$8 sps:$4 sm:$0xff]  }
  0x95   :  { %v6597_v10 = vld [vmem:[#allocation8] sm:$0xff]   ;;  %640 = vmatprep.subr.bf16.mxu1 %v6594_v8  ;;  %v6600_v44 = vld [vmem:[#allocation10 + $0x10] ss:$8 sps:$4 sm:$0xff]   ;;  %v6601_v46 = vld [vmem:[#allocation8 + $0x8] sm:$0xff]  }
  0x96   :  { %160 = vadd.xlane.f32.xlu0 %v143_v2  ;;  %164 = vadd.xlane.f32.xlu1 %v145_v3  ;;  %v7623_v45 = vld [vmem:[#allocation2 + $0x40] sm:$0xff]  ;;  %v6602_v47 = vld [vmem:[#allocation10 + $0x24] ss:$8 sps:$4 sm:$0xff]   ;;  %v7626_v48 = vld [vmem:[#allocation2 + $0x48] sm:$0xff] }
  0x97   :  { %641 = vmatpush1.bf16.msra.mxu1 %v6596_v9  ;;  %6112 = vmatprep.subr.bf16.mxu0 %v6597_v10  ;;  %v7628_v49 = vld [vmem:[#allocation2 + $0x50] sm:$0xff]  ;;  %v6605_v51 = vld [vmem:[#allocation8 + $0x10] sm:$0xff]   ;;  %v6609_v56 = vld [vmem:[#allocation8 + $0x18] sm:$0xff]  }
  0x98   :  { %642 = vmatprep.subr.bf16.mxu1 %v6598_v11  ;;  %6113 = vmatpush3.bf16.msra.mxu0 %v6597_v10  ;;  %v6604_v50 = vld [vmem:[#allocation10 + $0x20] ss:$8 sps:$4 sm:$0xff]   ;;  %v6606_v52 = vld [vmem:[#allocation10 + $0x34] ss:$8 sps:$4 sm:$0xff]   ;;  %v7632_v53 = vld [vmem:[#allocation2 + $0x58] sm:$0xff] }
  0x99   :  { %6114 = vmatprep.subr.bf16.mxu0 %v6601_v46  ;;  %v7634_v54 = vld [vmem:[#allocation2 + $0x60] sm:$0xff]  ;;  %v6610_v57 = vld [vmem:[#allocation10 + $0x44] ss:$8 sps:$4 sm:$0xff]   ;;  %v7638_v58 = vld [vmem:[#allocation2 + $0x68] sm:$0xff] }
  0x9a   :  { %166 = vadd.xlane.f32.xlu0 %v146_v4  ;;  %168 = vadd.xlane.f32.xlu1 %v147_v5  ;;  %v6608_v55 = vld [vmem:[#allocation10 + $0x30] ss:$8 sps:$4 sm:$0xff]   ;;  %v7640_v59 = vld [vmem:[#allocation2 + $0x70] sm:$0xff]  ;;  %v6614_v62 = vld [vmem:[#allocation10 + $0x54] ss:$8 sps:$4 sm:$0xff]  }
  0x9b   :  { %643 = vmatpush1.bf16.msra.mxu1 %v6600_v44  ;;  %v6612_v60 = vld [vmem:[#allocation10 + $0x40] ss:$8 sps:$4 sm:$0xff]   ;;  %v7644_v63 = vld [vmem:[#allocation2 + $0x78] sm:$0xff]  ;;  %v6625_v8 = vld [vmem:[#allocation8 + $0x38] sm:$0xff]  }
  0x9c   :  { %644 = vmatprep.subr.bf16.mxu1 %v6602_v47  ;;  %6115 = vmatpush3.bf16.msra.mxu0 %v6601_v46  ;;  %v6613_v61 = vld [vmem:[#allocation8 + $0x20] sm:$0xff]   ;;  %v7649_v44 = vld [vmem:[#allocation5] ss:$0 sm:$0xff] }
  0x9d   :  { %6116 = vmatprep.subr.bf16.mxu0 %v6605_v51 }
  0x9e   :  { %170 = vadd.xlane.f32.xlu0 %v148_v6  ;;  %172 = vadd.xlane.f32.xlu1 %v149_v7 }
  0x9f   :  { %645 = vmatpush1.bf16.msra.mxu1 %v6604_v50 }
  0xa0   :  { %646 = vmatprep.subr.bf16.mxu1 %v6606_v52  ;;  %6117 = vmatpush3.bf16.msra.mxu0 %v6605_v51 }
  0xa1   :  { %6118 = vmatprep.subr.bf16.mxu0 %v6609_v56 }
  0xa3   :  { %647 = vmatpush1.bf16.msra.mxu1 %v6608_v55 }
  0xa4   :  { %648 = vmatprep.subr.bf16.mxu1 %v6610_v57  ;;  %6119 = vmatpush3.bf16.msra.mxu0 %v6609_v56 }
  0xa5   :  { %6120 = vmatprep.subr.bf16.mxu0 %v6613_v61 }
  0xa7   :  { %649 = vmatpush1.bf16.msra.mxu1 %v6612_v60 }
  0xa8   :  { %650 = vmatprep.subr.bf16.mxu1 %v6614_v62  ;;  %6121 = vmatpush3.bf16.msra.mxu0 %v6613_v61  ;;  %v7658_v62 = vld [vmem:[#allocation5 + $0x1] ss:$0 sm:$0xff] }
 0x11f   :  { %v159_v12 = vpop.xlane.xlu0 %158  ;;  %v163_v13 = vpop.xlane.xlu1 %162 }
 0x120   :  { %v191_v14 = vmul.f32 0.0078125, %v159_v12  ;;  %v193_v15 = vmul.f32 0.0078125, %v163_v13 }
 0x122   :  { %v7591_v16 = vsub.f32 %v142_v0, %v191_v14  ;;  %v7593_v17 = vsub.f32 %v144_v1, %v193_v15  ;;  %v6616_v0 = vld [vmem:[#allocation10 + $0x50] ss:$8 sps:$4 sm:$0xff]   ;;  %v6617_v1 = vld [vmem:[#allocation8 + $0x28] sm:$0xff]  }
 0x123   :  { %v161_v18 = vpop.xlane.xlu0 %160  ;;  %v165_v19 = vpop.xlane.xlu1 %164  ;;  %651 = vmatpush1.bf16.msra.mxu1 %v6616_v0  ;;  %6122 = vmatprep.subr.bf16.mxu0 %v6617_v1 }
 0x124   :  { %v192_v20 = vmul.f32 0.0078125, %v161_v18  ;;  %v223_v21 = vmul.f32 %v7591_v16, %v7591_v16  ;;  %v194_v22 = vmul.f32 0.0078125, %v165_v19  ;;  %v225_v23 = vmul.f32 %v7593_v17, %v7593_v17  ;;  %6123 = vmatpush3.bf16.msra.mxu0 %v6617_v1 }
 0x126   :  { %239 = vadd.xlane.f32.xlu0 %v223_v21  ;;  %v7599_v24 = vsub.f32 %v143_v2, %v192_v20  ;;  %v7601_v25 = vsub.f32 %v145_v3, %v194_v22  ;;  %v6618_v2 = vld [vmem:[#allocation10 + $0x64] ss:$8 sps:$4 sm:$0xff]   ;;  %v6620_v3 = vld [vmem:[#allocation10 + $0x60] ss:$8 sps:$4 sm:$0xff]  }
 0x127   :  { %v167_v26 = vpop.xlane.xlu0 %166  ;;  %v169_v27 = vpop.xlane.xlu1 %168  ;;  %652 = vmatprep.subr.bf16.mxu1 %v6618_v2 }
 0x128   :  { %v195_v28 = vmul.f32 0.0078125, %v167_v26  ;;  %v224_v29 = vmul.f32 %v7599_v24, %v7599_v24  ;;  %v196_v30 = vmul.f32 0.0078125, %v169_v27  ;;  %v226_v31 = vmul.f32 %v7601_v25, %v7601_v25  ;;  %653 = vmatpush1.bf16.msra.mxu1 %v6620_v3 }
 0x12a   :  { %243 = vadd.xlane.f32.xlu0 %v225_v23  ;;  %241 = vadd.xlane.f32.xlu1 %v224_v29  ;;  %v7607_v32 = vsub.f32 %v146_v4, %v195_v28  ;;  %v7609_v33 = vsub.f32 %v147_v5, %v196_v30  ;;  %v6621_v4 = vld [vmem:[#allocation8 + $0x30] sm:$0xff]  }
 0x12b   :  { %v171_v34 = vpop.xlane.xlu0 %170  ;;  %v173_v35 = vpop.xlane.xlu1 %172  ;;  %v6622_v5 = vld [vmem:[#allocation10 + $0x74] ss:$8 sps:$4 sm:$0xff]   ;;  %6124 = vmatprep.subr.bf16.mxu0 %v6621_v4 }
 0x12c   :  { %v197_v36 = vmul.f32 0.0078125, %v171_v34  ;;  %v227_v37 = vmul.f32 %v7607_v32, %v7607_v32  ;;  %v198_v38 = vmul.f32 0.0078125, %v173_v35  ;;  %v228_v39 = vmul.f32 %v7609_v33, %v7609_v33  ;;  %654 = vmatprep.subr.bf16.mxu1 %v6622_v5  ;;  %6125 = vmatpush3.bf16.msra.mxu0 %v6621_v4 }
 0x12d   :  { %6126 = vmatprep.subr.bf16.mxu0 %v6625_v8 }
 0x12e   :  { %245 = vadd.xlane.f32.xlu1 %v226_v31  ;;  %247 = vadd.xlane.f32.xlu0 %v227_v37  ;;  %v7615_v40 = vsub.f32 %v148_v6, %v197_v36  ;;  %v7617_v41 = vsub.f32 %v149_v7, %v198_v38  ;;  %v6624_v6 = vld [vmem:[#allocation10 + $0x70] ss:$8 sps:$4 sm:$0xff]   ;;  %v7410_v7 = vmov 0  }
 0x12f   :  { %672 = vmatprep.mubr.bf16.mxu1 %v7410_v7  ;;  %655 = vmatpush1.bf16.msra.mxu1 %v6624_v6 }
 0x130   :  { %v229_v42 = vmul.f32 %v7615_v40, %v7615_v40  ;;  %v230_v43 = vmul.f32 %v7617_v41, %v7617_v41  ;;  %6127 = vmatpush3.bf16.msra.mxu0 %v6625_v8 }
 0x132   :  { %249 = vadd.xlane.f32.xlu1 %v228_v39  ;;  %251 = vadd.xlane.f32.xlu0 %v229_v42 }
 0x136   :  { %253 = vadd.xlane.f32.xlu1 %v230_v43  ;;  %174 = vadd.xlane.f32.xlu0 %v7623_v45 }
 0x13a   :  { %176 = vadd.xlane.f32.xlu1 %v7626_v48  ;;  %178 = vadd.xlane.f32.xlu0 %v7628_v49 }
 0x13e   :  { %180 = vadd.xlane.f32.xlu1 %v7632_v53  ;;  %182 = vadd.xlane.f32.xlu0 %v7634_v54 }
 0x142   :  { %184 = vadd.xlane.f32.xlu1 %v7638_v58  ;;  %186 = vadd.xlane.f32.xlu0 %v7640_v59 }
 0x146   :  { %188 = vadd.xlane.f32.xlu1 %v7644_v63 }
 0x1b3   :  { %v240_v9 = vpop.xlane.xlu0 %239 }
 0x1b4   :  { %v271_v10 = vmul.f32 0.0078125, %v240_v9 }
 0x1b6   :  { %v287_v11 = vadd.f32 1e-05, %v271_v10 }
 0x1b7   :  { %v242_v12 = vpop.xlane.xlu1 %241  ;;  %v244_v13 = vpop.xlane.xlu0 %243 }
 0x1b8   :  { %6714 = vrsqrt.f32 %v287_v11  ;;  %v272_v14 = vmul.f32 0.0078125, %v242_v12  ;;  %v273_v15 = vmul.f32 0.0078125, %v244_v13 }
 0x1ba   :  { %v288_v18 = vadd.f32 1e-05, %v272_v14  ;;  %v289_v19 = vadd.f32 1e-05, %v273_v15 }
 0x1bb   :  { %v246_v20 = vpop.xlane.xlu1 %245  ;;  %v248_v21 = vpop.xlane.xlu0 %247 }
 0x1bc   :  { %6716 = vrsqrt.f32 %v288_v18  ;;  %v274_v22 = vmul.f32 0.0078125, %v246_v20  ;;  %v275_v23 = vmul.f32 0.0078125, %v248_v21 }
 0x1bd   :  { %6718 = vrsqrt.f32 %v289_v19 }
 0x1be   :  { %v290_v26 = vadd.f32 1e-05, %v274_v22  ;;  %v291_v27 = vadd.f32 1e-05, %v275_v23 }
 0x1bf   :  { %v250_v28 = vpop.xlane.xlu1 %249  ;;  %v252_v29 = vpop.xlane.xlu0 %251 }
 0x1c0   :  { %6720 = vrsqrt.f32 %v290_v26  ;;  %v276_v30 = vmul.f32 0.0078125, %v250_v28  ;;  %v277_v31 = vmul.f32 0.0078125, %v252_v29 }
 0x1c1   :  { %6722 = vrsqrt.f32 %v291_v27 }
 0x1c2   :  { %v6715_v34 = vpop.eup %6714  ;;  %v292_v35 = vadd.f32 1e-05, %v276_v30  ;;  %v293_v36 = vadd.f32 1e-05, %v277_v31 }
 0x1c3   :  { %v254_v37 = vpop.xlane.xlu1 %253  ;;  %v175_v38 = vpop.xlane.xlu0 %174  ;;  %v319_v39 = vmul.f32 %v6715_v34, %v7591_v16 }
 0x1c4   :  { %6724 = vrsqrt.f32 %v292_v35  ;;  %v278_v42 = vmul.f32 0.0078125, %v254_v37  ;;  %v199_v43 = vmul.f32 0.0078125, %v175_v38 }
 0x1c5   :  { %6726 = vrsqrt.f32 %v293_v36  ;;  %v339_v57 = vmul.f32 %v7649_v44, %v319_v39 }
 0x1c6   :  { %v6717_v46 = vpop.eup %6716  ;;  %v294_v47 = vadd.f32 1e-05, %v278_v42  ;;  %v7652_v50 = vsub.f32 %v7623_v45, %v199_v43 }
 0x1c7   :  { %v6719_v51 = vpop.eup %6718  ;;  %v177_v52 = vpop.xlane.xlu1 %176  ;;  %v320_v56 = vmul.f32 %v6717_v46, %v7599_v24  ;;  %v359_v5 = vadd.f32 %v7658_v62, %v339_v57 }
 0x1c8   :  { %v179_v55 = vpop.xlane.xlu0 %178  ;;  %6728 = vrsqrt.f32 %v294_v47  ;;  %v200_v16 = vmul.f32 0.0078125, %v177_v52  ;;  %v231_v60 = vmul.f32 %v7652_v50, %v7652_v50  ;;  %v321_v45 = vmul.f32 %v6719_v51, %v7593_v17 }
 0x1c9   :  { %v201_v61 = vmul.f32 0.0078125, %v179_v55  ;;  %v340_v0 = vmul.f32 %v7649_v44, %v320_v56 }
 0x1ca   :  { %v6721_v1 = vpop.eup %6720  ;;  %v7663_v2 = vsub.f32 %v7626_v48, %v200_v16  ;;  %255 = vadd.xlane.f32.xlu0 %v231_v60  ;;  %v341_v9 = vmul.f32 %v7649_v44, %v321_v45 }
 0x1cb   :  { %v7666_v24 = vsub.f32 %v7628_v49, %v201_v61  ;;  %v6723_v3 = vpop.eup %6722  ;;  %v181_v4 = vpop.xlane.xlu1 %180  ;;  %v360_v6 = vadd.f32 %v7658_v62, %v340_v0  ;;  %v322_v8 = vmul.f32 %v6721_v1, %v7601_v25 }
 0x1cc   :  { %v183_v10 = vpop.xlane.xlu0 %182  ;;  %v232_v17 = vmul.f32 %v7663_v2, %v7663_v2  ;;  %v202_v48 = vmul.f32 0.0078125, %v181_v4  ;;  %v323_v14 = vmul.f32 %v6723_v3, %v7607_v32  ;;  %v361_v25 = vadd.f32 %v7658_v62, %v341_v9 }
 0x1cd   :  { %v233_v11 = vmul.f32 %v7666_v24, %v7666_v24  ;;  %v203_v49 = vmul.f32 0.0078125, %v183_v10  ;;  %v375_v12 = vpack.c.bf16 %v360_v6, %v359_v5  ;;  %v342_v13 = vmul.f32 %v7649_v44, %v322_v8 }
 0x1ce   :  { %v6725_v15 = vpop.eup %6724  ;;  %257 = vadd.xlane.f32.xlu1 %v232_v17  ;;  %v7680_v18 = vsub.f32 %v7632_v53, %v202_v48  ;;  %v343_v32 = vmul.f32 %v7649_v44, %v323_v14 }
 0x1cf   :  { %259 = vadd.xlane.f32.xlu0 %v233_v11  ;;  %v7683_v19 = vsub.f32 %v7634_v54, %v203_v49  ;;  %v6727_v20 = vpop.eup %6726  ;;  %6128 = vmatprep.mubr.bf16.mxu0 %v375_v12  ;;  %v362_v21 = vadd.f32 %v7658_v62, %v342_v13  ;;  %v185_v22 = vpop.xlane.xlu1 %184  ;;  %v324_v23 = vmul.f32 %v6725_v15, %v7609_v33 }
 0x1d0   :  { %673 = vmatmul.mubr.bf16.vlgmr.msra.gmra.mrb[0].mxu1 %v375_v12  ;;  %v187_v26 = vpop.xlane.xlu0 %186  ;;  %v234_v27 = vmul.f32 %v7680_v18, %v7680_v18  ;;  %v204_v53 = vmul.f32 0.0078125, %v185_v22  ;;  %v325_v54 = vmul.f32 %v6727_v20, %v7615_v40  ;;  %v363_v33 = vadd.f32 %v7658_v62, %v343_v32 }
 0x1d1   :  { %682 = vmatprep.mubr.bf16.mxu1 %v7410_v7  ;;  %v235_v28 = vmul.f32 %v7683_v19, %v7683_v19  ;;  %v376_v29 = vpack.c.bf16 %v362_v21, %v361_v25  ;;  %v344_v30 = vmul.f32 %v7649_v44, %v324_v23  ;;  %v205_v31 = vmul.f32 0.0078125, %v187_v26 }
 0x1d2   :  { %v6729_v34 = vpop.eup %6728  ;;  %261 = vadd.xlane.f32.xlu1 %v234_v27  ;;  %v7697_v35 = vsub.f32 %v7638_v58, %v204_v53  ;;  %v345_v37 = vmul.f32 %v7649_v44, %v325_v54 }
 0x1d3   :  { %263 = vadd.xlane.f32.xlu0 %v235_v28  ;;  %6129 = vmatmul.mubr.bf16.vlgmr.msra.gmra.mrb[0].mxu0 %v376_v29  ;;  %v364_v36 = vadd.f32 %v7658_v62, %v344_v30  ;;  %v326_v40 = vmul.f32 %v6729_v34, %v7617_v41  ;;  %v189_v38 = vpop.xlane.xlu1 %188  ;;  %v7703_v39 = vsub.f32 %v7640_v59, %v205_v31 }
 0x1d4   :  { %v236_v42 = vmul.f32 %v7697_v35, %v7697_v35  ;;  %v206_v43 = vmul.f32 0.0078125, %v189_v38  ;;  %v365_v41 = vadd.f32 %v7658_v62, %v345_v37 }
 0x1d5   :  { %v377_v46 = vpack.c.bf16 %v364_v36, %v363_v33  ;;  %v346_v58 = vmul.f32 %v7649_v44, %v326_v40  ;;  %v237_v47 = vmul.f32 %v7703_v39, %v7703_v39 }
 0x1d6   :  { %265 = vadd.xlane.f32.xlu1 %v236_v42  ;;  %v7711_v51 = vsub.f32 %v7644_v63, %v206_v43 }
 0x1d7   :  { %6132 = vmatprep.mubr.bf16.mxu0 %v377_v46  ;;  %v366_v59 = vadd.f32 %v7658_v62, %v346_v58  ;;  %267 = vadd.xlane.f32.xlu0 %v237_v47 }
 0x1d8   :  { %683 = vmatmul.mubr.bf16.gmra.mrb[4].mxu1 %v376_v29  ;;  %v238_v52 = vmul.f32 %v7711_v51, %v7711_v51 }
 0x1d9   :  { %692 = vmatprep.mubr.bf16.mxu1 %v7410_v7  ;;  %v378_v55 = vpack.c.bf16 %v366_v59, %v365_v41 }
 0x1da   :  { %269 = vadd.xlane.f32.xlu1 %v238_v52 }
 0x1db   :  { %6133 = vmatmul.mubr.bf16.gmra.mrb[4].mxu0 %v378_v55 }
 0x1e0   :  { %693 = vmatmul.mubr.bf16.gmra.mrb[8].mxu1 %v377_v46 }
 0x1e1   :  { %702 = vmatprep.mubr.bf16.mxu1 %v7410_v7 }
 0x1e8   :  { %703 = vmatmul.mubr.bf16.gmra.mrb[12].mxu1 %v378_v55 }
 0x1e9   :  { %712 = vmatprep.mubr.bf16.mxu1 %v7410_v7 }
 0x257   :  { %v256_v63 = vpop.xlane.xlu0 %255 }
 0x258   :  { %v279_v56 = vmul.f32 0.0078125, %v256_v63 }
 0x25a   :  { %v295_v57 = vadd.f32 1e-05, %v279_v56 }
 0x25b   :  { %v258_v16 = vpop.xlane.xlu1 %257 }
 0x25c   :  { %v260_v60 = vpop.xlane.xlu0 %259  ;;  %v280_v61 = vmul.f32 0.0078125, %v258_v16  ;;  %6730 = vrsqrt.f32 %v295_v57 }
 0x25d   :  { %v281_v0 = vmul.f32 0.0078125, %v260_v60 }
 0x25e   :  { %v296_v45 = vadd.f32 1e-05, %v280_v61 }
 0x25f   :  { %v297_v1 = vadd.f32 1e-05, %v281_v0  ;;  %v262_v3 = vpop.xlane.xlu1 %261 }
 0x260   :  { %v264_v4 = vpop.xlane.xlu0 %263  ;;  %6732 = vrsqrt.f32 %v296_v45  ;;  %v282_v5 = vmul.f32 0.0078125, %v262_v3 }
 0x261   :  { %v283_v6 = vmul.f32 0.0078125, %v264_v4  ;;  %6734 = vrsqrt.f32 %v297_v1 }
 0x262   :  { %v298_v8 = vadd.f32 1e-05, %v282_v5 }
 0x263   :  { %v299_v9 = vadd.f32 1e-05, %v283_v6  ;;  %v266_v10 = vpop.xlane.xlu1 %265 }
 0x264   :  { %6736 = vrsqrt.f32 %v298_v8  ;;  %v284_v17 = vmul.f32 0.0078125, %v266_v10  ;;  %v268_v48 = vpop.xlane.xlu0 %267 }
 0x265   :  { %6738 = vrsqrt.f32 %v299_v9  ;;  %v285_v12 = vmul.f32 0.0078125, %v268_v48 }
 0x266   :  { %v6731_v11 = vpop.eup %6730  ;;  %v300_v49 = vadd.f32 1e-05, %v284_v17 }
 0x267   :  { %v270_v13 = vpop.xlane.xlu1 %269  ;;  %v327_v14 = vmul.f32 %v6731_v11, %v7652_v50  ;;  %v301_v25 = vadd.f32 1e-05, %v285_v12 }
 0x268   :  { %6740 = vrsqrt.f32 %v300_v49  ;;  %v286_v15 = vmul.f32 0.0078125, %v270_v13 }
 0x269   :  { %v347_v20 = vmul.f32 %v7649_v44, %v327_v14  ;;  %6742 = vrsqrt.f32 %v301_v25 }
 0x26a   :  { %v6733_v21 = vpop.eup %6732  ;;  %v302_v22 = vadd.f32 1e-05, %v286_v15 }
 0x26b   :  { %v6735_v23 = vpop.eup %6734  ;;  %v328_v32 = vmul.f32 %v6733_v21, %v7663_v2  ;;  %v367_v53 = vadd.f32 %v7658_v62, %v347_v20 }
 0x26c   :  { %6744 = vrsqrt.f32 %v302_v22  ;;  %v329_v26 = vmul.f32 %v6735_v23, %v7666_v24 }
 0x26d   :  { %v348_v27 = vmul.f32 %v7649_v44, %v328_v32 }
 0x26e   :  { %v6737_v54 = vpop.eup %6736  ;;  %v349_v50 = vmul.f32 %v7649_v44, %v329_v26 }
 0x26f   :  { %v6739_v28 = vpop.eup %6738  ;;  %v368_v29 = vadd.f32 %v7658_v62, %v348_v27  ;;  %v330_v30 = vmul.f32 %v6737_v54, %v7680_v18 }
 0x270   :  { %v331_v31 = vmul.f32 %v6739_v28, %v7683_v19  ;;  %v369_v33 = vadd.f32 %v7658_v62, %v349_v50 }
 0x271   :  { %v379_v34 = vpack.c.bf16 %v368_v29, %v367_v53  ;;  %v350_v2 = vmul.f32 %v7649_v44, %v330_v30 }
 0x272   :  { %v6741_v24 = vpop.eup %6740  ;;  %v351_v36 = vmul.f32 %v7649_v44, %v331_v31 }
 0x273   :  { %713 = vmatmul.mubr.bf16.gmra.mrb[16].mxu1 %v379_v34  ;;  %v370_v40 = vadd.f32 %v7658_v62, %v350_v2  ;;  %6136 = vmatprep.mubr.bf16.mxu0 %v379_v34  ;;  %v332_v37 = vmul.f32 %v6741_v24, %v7697_v35  ;;  %v6743_v38 = vpop.eup %6742 }
 0x274   :  { %722 = vmatprep.mubr.bf16.mxu1 %v7410_v7  ;;  %v371_v42 = vadd.f32 %v7658_v62, %v351_v36  ;;  %v333_v43 = vmul.f32 %v6743_v38, %v7703_v39 }
 0x275   :  { %v380_v18 = vpack.c.bf16 %v370_v40, %v369_v33  ;;  %v352_v19 = vmul.f32 %v7649_v44, %v332_v37 }
 0x276   :  { %v6745_v46 = vpop.eup %6744  ;;  %v353_v41 = vmul.f32 %v7649_v44, %v333_v43 }
 0x277   :  { %6137 = vmatmul.mubr.bf16.gmra.mrb[8].mxu0 %v380_v18  ;;  %v372_v58 = vadd.f32 %v7658_v62, %v352_v19  ;;  %v334_v47 = vmul.f32 %v6745_v46, %v7711_v51 }
 0x278   :  { %v373_v52 = vadd.f32 %v7658_v62, %v353_v41 }
 0x279   :  { %v381_v59 = vpack.c.bf16 %v372_v58, %v371_v42  ;;  %v354_v35 = vmul.f32 %v7649_v44, %v334_v47 }
 0x27b   :  { %723 = vmatmul.mubr.bf16.gmra.mrb[20].mxu1 %v380_v18  ;;  %6140 = vmatprep.mubr.bf16.mxu0 %v381_v59  ;;  %v374_v55 = vadd.f32 %v7658_v62, %v354_v35 }
 0x27c   :  { %732 = vmatprep.mubr.bf16.mxu1 %v7410_v7 }
 0x27d   :  { %v382_v39 = vpack.c.bf16 %v374_v55, %v373_v52 }
 0x27f   :  { %6141 = vmatmul.mubr.bf16.gmra.mrb[12].mxu0 %v382_v39 }
 0x283   :  { %733 = vmatmul.mubr.bf16.gmra.mrb[24].mxu1 %v381_v59 }
 0x284   :  { %742 = vmatprep.mubr.bf16.mxu1 %v7410_v7 }
 0x28b   :  { %743 = vmatmul.mubr.bf16.gmra.mrb[28].mxu1 %v382_v39 }
 0x2a3   :  { %v674_v51 = vpop.f32.mrb[0].mxu1 }
 0x2a4   :  { %v676_v63 = vpop.f32.mrb[1].mxu1 }
 0x2a5   :  { %v678_v56 = vpop.f32.mrb[2].mxu1 }
 0x2a6   :  { %v7747_v57 = vpack.c.bf16 %v678_v56, %v674_v51  ;;  %v680_v44 = vpop.f32.mrb[3].mxu1  ;;  %v6130_v60 = vpop.f32.mrb[0].mxu0 }
 0x2a7   :  { %v7749_v16 = vpack.c.bf16 %v680_v44, %v676_v63  ;;  %v481_v62 = vpop.f32.mrb[1].mxu0 }
 0x2a8   :  { %1073 = vrot.lane.b32.xlu0 %v7747_v57, %s7411_s7  ;;  %6544 = vmatprep.subr.msk.bf16.mxu0 %vm793_vm0, %v7747_v57  ;;  %v807_v61 = vsel %vm793_vm0, %v7747_v57, 0  ;;  %v6131_v0 = vpop.f32.mrb[2].mxu0 }
 0x2a9   :  { %6145 = vmatpush3.bf16.xpose.msra.mxu0 %v807_v61  ;;  %v7757_v45 = vpack.c.bf16 %v6131_v0, %v6130_v60  ;;  %v484_v1 = vpop.f32.mrb[3].mxu0 }
 0x2aa   :  { %v7759_v3 = vpack.c.bf16 %v484_v1, %v481_v62 }
 0x2ab   :  { %v684_v4 = vpop.f32.mrb[4].mxu1 }
 0x2ac   :  { %v686_v5 = vpop.f32.mrb[5].mxu1  ;;  %1061 = vrot.lane.b32.xlu0 %v7759_v3, %s7411_s7  ;;  %6152 = vmatprep.mubr.msk.bf16.mxu0 %vm793_vm0, %v7759_v3 }
 0x2ad   :  { %v688_v6 = vpop.f32.mrb[6].mxu1 }
 0x2ae   :  { %v7765_v8 = vpack.c.bf16 %v688_v6, %v684_v4  ;;  %v690_v9 = vpop.f32.mrb[7].mxu1  ;;  %v6134_v17 = vpop.f32.mrb[4].mxu0 }
 0x2af   :  { %v7767_v10 = vpack.c.bf16 %v690_v9, %v686_v5  ;;  %v497_v48 = vpop.f32.mrb[5].mxu0 }
 0x2b0   :  { %1075 = vrot.lane.b32.xlu1 %v7765_v8, %s7411_s7  ;;  %6545 = vmatprep.subr.msk.bf16.mxu0 %vm793_vm0, %v7765_v8  ;;  %v810_v11 = vsel %vm793_vm0, %v7765_v8, 0  ;;  %v6135_v49 = vpop.f32.mrb[6].mxu0 }
 0x2b1   :  { %6147 = vmatpush3.bf16.xpose.msra.mxu0 %v810_v11  ;;  %v7775_v12 = vpack.c.bf16 %v6135_v49, %v6134_v17  ;;  %v500_v13 = vpop.f32.mrb[7].mxu0 }
 0x2b2   :  { %v7777_v14 = vpack.c.bf16 %v500_v13, %v497_v48 }
 0x2b3   :  { %v694_v15 = vpop.f32.mrb[8].mxu1 }
 0x2b4   :  { %v696_v25 = vpop.f32.mrb[9].mxu1  ;;  %1065 = vrot.lane.b32.xlu0 %v7777_v14, %s7411_s7 }
 0x2b5   :  { %v698_v20 = vpop.f32.mrb[10].mxu1 }
 0x2b6   :  { %v7781_v21 = vpack.c.bf16 %v698_v20, %v694_v15  ;;  %v700_v22 = vpop.f32.mrb[11].mxu1 }
 0x2b7   :  { %v7783_v23 = vpack.c.bf16 %v700_v22, %v696_v25 }
 0x2b8   :  { %1077 = vrot.lane.b32.xlu1 %v7781_v21, %s7411_s7  ;;  %6546 = vmatprep.subr.msk.bf16.mxu0 %vm793_vm0, %v7781_v21  ;;  %v813_v32 = vsel %vm793_vm0, %v7781_v21, 0 }
 0x2b9   :  { %6149 = vmatpush3.bf16.xpose.msra.mxu0 %v813_v32 }
 0x2bb   :  { %v704_v26 = vpop.f32.mrb[12].mxu1 }
 0x2bc   :  { %v706_v27 = vpop.f32.mrb[13].mxu1 }
 0x2bd   :  { %v708_v53 = vpop.f32.mrb[14].mxu1 }
 0x2be   :  { %v7791_v54 = vpack.c.bf16 %v708_v53, %v704_v26  ;;  %v710_v50 = vpop.f32.mrb[15].mxu1 }
 0x2bf   :  { %v7793_v28 = vpack.c.bf16 %v710_v50, %v706_v27 }
 0x2c0   :  { %1079 = vrot.lane.b32.xlu1 %v7791_v54, %s7411_s7  ;;  %6547 = vmatprep.subr.msk.bf16.mxu0 %vm793_vm0, %v7791_v54  ;;  %v816_v29 = vsel %vm793_vm0, %v7791_v54, 0 }
 0x2c1   :  { %6151 = vmatpush3.bf16.xpose.msra.mxu0 %v816_v29 }
 0x2c2   :  { %6160 = vmatprep.subr.bf16.mxu0 %v7749_v16 }
 0x2c4   :  { %1063 = vrot.lane.b32.xlu1 %v7757_v45, %s7411_s7 }
 0x2c8   :  { %6153 = vmatmul.mubr.msk.bf16.vlgmr.msra.gmra.mrb[16].mxu0 %vm793_vm0, %v7757_v45  ;;  %1067 = vrot.lane.b32.xlu1 %v7775_v12, %s7411_s7 }
 0x2c9   :  { %6156 = vmatprep.mubr.msk.bf16.mxu0 %vm793_vm0, %v7777_v14  ;;  %6161 = vmatpush3.bf16.msra.mxu0 %v7749_v16 }
 0x2ca   :  { %6162 = vmatprep.subr.bf16.mxu0 %v7767_v10 }
 0x2cd   :  { %6163 = vmatpush3.bf16.msra.mxu0 %v7767_v10 }
 0x2ce   :  { %6164 = vmatprep.subr.bf16.mxu0 %v7783_v23 }
 0x2d0   :  { %6157 = vmatmul.mubr.msk.bf16.gmra.mrb[20].mxu0 %vm793_vm0, %v7775_v12 }
 0x2d1   :  { %6165 = vmatpush3.bf16.msra.mxu0 %v7783_v23 }
 0x2d2   :  { %6166 = vmatprep.subr.bf16.mxu0 %v7793_v28 }
 0x2d5   :  { %6167 = vmatpush3.bf16.msra.mxu0 %v7793_v28 }
 0x31a   :  { %v1074_v30 = vpop.permute.xlu0 %1073 }
 0x31b   :  { %6548 = vmatprep.subr.msk.bf16.mxu1 %vm793_vm0, %v1074_v30  ;;  %v1094_v31 = vsel %vm793_vm0, %v1074_v30, 0 }
 0x31c   :  { %6177 = vmatpush3.bf16.xpose.msra.mxu1 %v1094_v31 }
 0x31e   :  { %v1062_v34 = vpop.permute.xlu0 %1061 }
 0x31f   :  { %6184 = vmatprep.mubr.msk.bf16.mxu1 %vm793_vm0, %v1062_v34 }
 0x322   :  { %v1076_v2 = vpop.permute.xlu1 %1075 }
 0x323   :  { %6549 = vmatprep.subr.msk.bf16.mxu1 %vm793_vm0, %v1076_v2  ;;  %v1097_v33 = vsel %vm793_vm0, %v1076_v2, 0 }
 0x324   :  { %6179 = vmatpush3.bf16.xpose.msra.mxu1 %v1097_v33 }
 0x326   :  { %v1066_v18 = vpop.permute.xlu0 %1065 }
 0x32a   :  { %v1078_v24 = vpop.permute.xlu1 %1077 }
 0x32b   :  { %6550 = vmatprep.subr.msk.bf16.mxu1 %vm793_vm0, %v1078_v24  ;;  %v1100_v36 = vsel %vm793_vm0, %v1078_v24, 0 }
 0x32c   :  { %6181 = vmatpush3.bf16.xpose.msra.mxu1 %v1100_v36 }
 0x332   :  { %v1080_v40 = vpop.permute.xlu1 %1079 }
 0x333   :  { %6551 = vmatprep.subr.msk.bf16.mxu1 %vm793_vm0, %v1080_v40  ;;  %v1103_v37 = vsel %vm793_vm0, %v1080_v40, 0 }
 0x334   :  { %6183 = vmatpush3.bf16.xpose.msra.mxu1 %v1103_v37 }
 0x336   :  { %v1064_v38 = vpop.permute.xlu1 %1063 }
 0x33a   :  { %v1068_v19 = vpop.permute.xlu1 %1067 }
 0x33b   :  { %6185 = vmatmul.mubr.msk.bf16.vlgmr.msra.gmra.mrb[32].mxu1 %vm793_vm0, %v1064_v38 }
 0x33c   :  { %6188 = vmatprep.mubr.msk.bf16.mxu1 %vm793_vm0, %v1066_v18 }
 0x343   :  { %6189 = vmatmul.mubr.msk.bf16.gmra.mrb[36].mxu1 %vm793_vm0, %v1068_v19 }
 0x346   :  { %v714_v42 = vpop.f32.mrb[16].mxu1 }
 0x347   :  { %v716_v43 = vpop.f32.mrb[17].mxu1 }
 0x348   :  { %v718_v46 = vpop.f32.mrb[18].mxu1 }
 0x349   :  { %v7831_v58 = vpack.c.bf16 %v718_v46, %v714_v42  ;;  %v720_v47 = vpop.f32.mrb[19].mxu1 }
 0x34a   :  { %v7833_v41 = vpack.c.bf16 %v720_v47, %v716_v43  ;;  %v6138_v59 = vpop.f32.mrb[8].mxu0 }
 0x34b   :  { %v513_v35 = vpop.f32.mrb[9].mxu0 }
 0x34c   :  { %v6139_v52 = vpop.f32.mrb[10].mxu0 }
 0x34d   :  { %v7835_v55 = vpack.c.bf16 %v6139_v52, %v6138_v59  ;;  %v516_v39 = vpop.f32.mrb[11].mxu0 }
 0x34e   :  { %v724_v51 = vpop.f32.mrb[20].mxu1  ;;  %v7837_v63 = vpack.c.bf16 %v516_v39, %v513_v35 }
 0x34f   :  { %v726_v56 = vpop.f32.mrb[21].mxu1 }
 0x350   :  { %v728_v44 = vpop.f32.mrb[22].mxu1 }
 0x351   :  { %v7839_v60 = vpack.c.bf16 %v728_v44, %v724_v51  ;;  %v730_v62 = vpop.f32.mrb[23].mxu1 }
 0x352   :  { %v7841_v61 = vpack.c.bf16 %v730_v62, %v726_v56  ;;  %v6142_v0 = vpop.f32.mrb[12].mxu0 }
 0x353   :  { %v529_v1 = vpop.f32.mrb[13].mxu0 }
 0x354   :  { %v6143_v4 = vpop.f32.mrb[14].mxu0 }
 0x355   :  { %v7843_v5 = vpack.c.bf16 %v6143_v4, %v6142_v0  ;;  %v532_v6 = vpop.f32.mrb[15].mxu0 }
 0x356   :  { %v734_v9 = vpop.f32.mrb[24].mxu1  ;;  %v7845_v17 = vpack.c.bf16 %v532_v6, %v529_v1 }
 0x357   :  { %v736_v48 = vpop.f32.mrb[25].mxu1 }
 0x358   :  { %v738_v11 = vpop.f32.mrb[26].mxu1 }
 0x359   :  { %v7847_v49 = vpack.c.bf16 %v738_v11, %v734_v9  ;;  %v740_v13 = vpop.f32.mrb[27].mxu1 }
 0x35a   :  { %v7849_v15 = vpack.c.bf16 %v740_v13, %v736_v48 }
 0x35e   :  { %v744_v25 = vpop.f32.mrb[28].mxu1 }
 0x35f   :  { %v746_v20 = vpop.f32.mrb[29].mxu1 }
 0x360   :  { %v748_v22 = vpop.f32.mrb[30].mxu1 }
 0x361   :  { %v7851_v32 = vpack.c.bf16 %v748_v22, %v744_v25  ;;  %v750_v26 = vpop.f32.mrb[31].mxu1 }
 0x362   :  { %v7853_v27 = vpack.c.bf16 %v750_v26, %v746_v20 }
 0x39b   :  { %v7855_v53 = vpop.f32.mrb[16].mxu0 }
 0x39c   :  { %v7857_v50 = vpop.f32.mrb[17].mxu0 }
 0x39d   :  { %v7859_v29 = vpop.f32.mrb[18].mxu0 }
 0x39e   :  { %v7861_v30 = vpop.f32.mrb[19].mxu0 }
 0x3a3   :  { %v7863_v31 = vpop.f32.mrb[20].mxu0 }
 0x3a4   :  { %v7865_v34 = vpop.f32.mrb[21].mxu0 }
 0x3a5   :  { %v7867_v2 = vpop.f32.mrb[22].mxu0 }
 0x3a6   :  { %v7869_v33 = vpop.f32.mrb[23].mxu0 }
 0x40e   :  { %v6186_v24 = vpop.f32.mrb[32].mxu1 }
 0x40f   :  { %v1139_v36 = vpop.f32.mrb[33].mxu1  ;;  %v1176_v40 = vsel %vm883_vm1, %v6186_v24, -inf }
 0x410   :  { %v6187_v37 = vpop.f32.mrb[34].mxu1  ;;  %1177 = vmax.xlane.f32.xlu0 %v1176_v40  ;;  %v1170_v19 = vsel %vm883_vm1, %v1139_v36, -inf }
 0x411   :  { %v1142_v38 = vpop.f32.mrb[35].mxu1  ;;  %v1179_v46 = vsel %vm883_vm1, %v6187_v37, -inf }
 0x412   :  { %v1173_v18 = vsel %vm883_vm1, %v1142_v38, -inf }
 0x413   :  { %1174 = vmax.xlane.f32.xlu1 %v1173_v18 }
 0x414   :  { %1171 = vmax.xlane.f32.xlu0 %v1170_v19 }
 0x416   :  { %v6190_v42 = vpop.f32.mrb[36].mxu1 }
 0x417   :  { %v1155_v43 = vpop.f32.mrb[37].mxu1  ;;  %v1188_v35 = vsel %vm883_vm1, %v6190_v42, -inf }
 0x418   :  { %1180 = vmax.xlane.f32.xlu0 %v1179_v46  ;;  %v7875_v47 = vpop.f32.mrb[38].mxu1  ;;  %v1182_v52 = vsel %vm883_vm1, %v1155_v43, -inf }
 0x419   :  { %v7877_v59 = vpop.f32.mrb[39].mxu1  ;;  %v1191_v39 = vsel %vm883_vm1, %v7875_v47, -inf }
 0x41a   :  { %v1185_v51 = vsel %vm883_vm1, %v7877_v59, -inf }
 0x41c   :  { %1189 = vmax.xlane.f32.xlu0 %v1188_v35 }
 0x420   :  { %1183 = vmax.xlane.f32.xlu0 %v1182_v52 }
 0x424   :  { %1268 = vrot.lane.b32.xlu1 %v7767_v10, %s7411_s7 }
 0x428   :  { %1270 = vrot.lane.b32.xlu1 %v7783_v23, %s7411_s7 }
 0x436   :  { %1266 = vrot.lane.b32.xlu0 %v7749_v16, %s7411_s7 }
 0x44c   :  { %1192 = vmax.xlane.f32.xlu1 %v1191_v39 }
 0x450   :  { %1186 = vmax.xlane.f32.xlu1 %v1185_v51 }
 0x461   :  { %1272 = vrot.lane.b32.xlu1 %v7793_v28, %s7411_s7 }
 0x49d   :  { %v1178_v56 = vpop.xlane.xlu0 %1177 }
 0x49e   :  { %v1196_v44 = vsub.f32 %v6186_v24, %v1178_v56 }
 0x4a0   :  { %v1206_v62 = vmul.f32 1.442695, %v1196_v44  ;;  %v1175_v0 = vpop.xlane.xlu1 %1174 }
 0x4a1   :  { %v1172_v1 = vpop.xlane.xlu0 %1171  ;;  %v1195_v6 = vsub.f32 %v1142_v38, %v1175_v0 }
 0x4a2   :  { %6746 = vpow2.f32 %v1206_v62  ;;  %v1194_v4 = vsub.f32 %v1139_v36, %v1172_v1 }
 0x4a3   :  { %v1204_v13 = vmul.f32 1.442695, %v1195_v6 }
 0x4a4   :  { %v1202_v9 = vmul.f32 1.442695, %v1194_v4 }
 0x4a5   :  { %v1181_v48 = vpop.xlane.xlu0 %1180 }
 0x4a6   :  { %6748 = vpow2.f32 %v1202_v9  ;;  %v1197_v11 = vsub.f32 %v6187_v37, %v1181_v48  ;;  %v1269_v37 = vpop.permute.xlu1 %1268 }
 0x4a8   :  { %v1208_v25 = vmul.f32 1.442695, %v1197_v11 }
 0x4a9   :  { %v1190_v20 = vpop.xlane.xlu0 %1189 }
 0x4aa   :  { %6750 = vpow2.f32 %v1208_v25  ;;  %v1200_v22 = vsub.f32 %v6190_v42, %v1190_v20  ;;  %v1271_v39 = vpop.permute.xlu1 %1270 }
 0x4ab   :  { %6752 = vpow2.f32 %v1204_v13 }
 0x4ac   :  { %v7893_v26 = vpop.eup %6746  ;;  %v1214_v40 = vmul.f32 1.442695, %v1200_v22 }
 0x4ad   :  { %v1184_v24 = vpop.xlane.xlu0 %1183  ;;  %v1224_v18 = vsel %vm883_vm1, %v7893_v26, 0.0 }
 0x4ae   :  { %6754 = vpow2.f32 %v1214_v40  ;;  %v1198_v36 = vsub.f32 %v1155_v43, %v1184_v24  ;;  %1225 = vadd.xlane.f32.xlu0 %v1224_v18  ;;  %v890_v40 = vsel %vm883_vm1, %v7855_v53, -inf  ;;  %v893_v24 = vsel %vm883_vm1, %v7859_v29, -inf }
 0x4af   :  { %v887_v18 = vsel %vm883_vm1, %v7861_v30, -inf }
 0x4b0   :  { %v7897_v38 = vpop.eup %6748  ;;  %v1210_v19 = vmul.f32 1.442695, %v1198_v36  ;;  %v896_v36 = vsel %vm883_vm1, %v7865_v34, -inf }
 0x4b1   :  { %v1267_v46 = vpop.permute.xlu0 %1266  ;;  %v1218_v35 = vsel %vm883_vm1, %v7897_v38, 0.0 }
 0x4b2   :  { %6756 = vpow2.f32 %v1210_v19  ;;  %1219 = vadd.xlane.f32.xlu0 %v1218_v35  ;;  %6192 = vmatprep.subr.bf16.mxu1 %v1267_v46  ;;  %v899_v19 = vsel %vm883_vm1, %v7869_v33, -inf }
 0x4b3   :  { %6193 = vmatpush3.bf16.msra.mxu1 %v1267_v46  ;;  %v905_v46 = vsel %vm883_vm1, %v7867_v2, -inf }
 0x4b4   :  { %v7901_v42 = vpop.eup %6750  ;;  %6194 = vmatprep.subr.bf16.mxu1 %v1269_v37 }
 0x4b5   :  { %v1227_v52 = vsel %vm883_vm1, %v7901_v42, 0.0  ;;  %v7905_v43 = vpop.eup %6752 }
 0x4b6   :  { %1228 = vadd.xlane.f32.xlu1 %v1227_v52  ;;  %v1221_v56 = vsel %vm883_vm1, %v7905_v43, 0.0 }
 0x4b7   :  { %6195 = vmatpush3.bf16.msra.mxu1 %v1269_v37  ;;  %v902_v37 = vsel %vm883_vm1, %v7863_v31, -inf }
 0x4b8   :  { %v7907_v51 = vpop.eup %6754  ;;  %6196 = vmatprep.subr.bf16.mxu1 %v1271_v39 }
 0x4b9   :  { %v1236_v44 = vsel %vm883_vm1, %v7907_v51, 0.0 }
 0x4ba   :  { %1222 = vadd.xlane.f32.xlu1 %v1221_v56  ;;  %1237 = vadd.xlane.f32.xlu0 %v1236_v44 }
 0x4bb   :  { %6197 = vmatpush3.bf16.msra.mxu1 %v1271_v39 }
 0x4bc   :  { %v7913_v62 = vpop.eup %6756 }
 0x4bd   :  { %v1230_v0 = vsel %vm883_vm1, %v7913_v62, 0.0 }
 0x4be   :  { %1231 = vadd.xlane.f32.xlu0 %v1230_v0 }
 0x4cb   :  { %1547 = vrot.lane.b32.xlu1 %v7765_v8, %s7398_s1 }
 0x4cf   :  { %1549 = vrot.lane.b32.xlu1 %v7781_v21, %s7398_s1 }
 0x4d9   :  { %v1193_v1 = vpop.xlane.xlu1 %1192 }
 0x4da   :  { %v1201_v4 = vsub.f32 %v7875_v47, %v1193_v1 }
 0x4dc   :  { %v1216_v6 = vmul.f32 1.442695, %v1201_v4 }
 0x4dd   :  { %v1187_v9 = vpop.xlane.xlu1 %1186 }
 0x4de   :  { %6758 = vpow2.f32 %v1216_v6  ;;  %v1199_v48 = vsub.f32 %v7877_v59, %v1187_v9  ;;  %v884_v59 = vsel %vm883_vm1, %v7857_v50, -inf }
 0x4e0   :  { %v1212_v11 = vmul.f32 1.442695, %v1199_v48 }
 0x4e1   :  { %v1273_v13 = vpop.permute.xlu1 %1272 }
 0x4e2   :  { %6198 = vmatprep.subr.bf16.mxu1 %v1273_v13  ;;  %6760 = vpow2.f32 %v1212_v11 }
 0x4e3   :  { %6199 = vmatpush3.bf16.msra.mxu1 %v1273_v13 }
 0x4e8   :  { %v7923_v25 = vpop.eup %6758 }
 0x4e9   :  { %v1239_v20 = vsel %vm883_vm1, %v7923_v25, 0.0 }
 0x4ea   :  { %1240 = vadd.xlane.f32.xlu0 %v1239_v20 }
 0x4ec   :  { %v7927_v22 = vpop.eup %6760 }
 0x4ed   :  { %v1233_v47 = vsel %vm883_vm1, %v7927_v22, 0.0 }
 0x4f3   :  { %1234 = vadd.xlane.f32.xlu1 %v1233_v47 }
 0x500   :  { %1545 = vrot.lane.b32.xlu0 %v7747_v57, %s7398_s1 }
 0x504   :  { %1551 = vrot.lane.b32.xlu1 %v7791_v54, %s7398_s1  ;;  %1537 = vrot.lane.b32.xlu0 %v7759_v3, %s7398_s1 }
 0x508   :  { %1539 = vrot.lane.b32.xlu1 %v7757_v45, %s7398_s1  ;;  %1541 = vrot.lane.b32.xlu0 %v7777_v14, %s7398_s1 }
 0x50c   :  { %1543 = vrot.lane.b32.xlu1 %v7775_v12, %s7398_s1 }
 0x527   :  { %885 = vmax.xlane.f32.xlu0 %v884_v59 }
 0x52b   :  { %891 = vmax.xlane.f32.xlu0 %v890_v40 }
 0x52f   :  { %894 = vmax.xlane.f32.xlu0 %v893_v24 }
 0x530   :  { %888 = vmax.xlane.f32.xlu1 %v887_v18 }
 0x533   :  { %897 = vmax.xlane.f32.xlu0 %v896_v36 }
 0x534   :  { %900 = vmax.xlane.f32.xlu1 %v899_v19 }
 0x537   :  { %903 = vmax.xlane.f32.xlu0 %v902_v37 }
 0x538   :  { %906 = vmax.xlane.f32.xlu1 %v905_v46 }
 0x53b   :  { %v1226_v35 = vpop.xlane.xlu0 %1225 }
 0x53f   :  { %v1220_v52 = vpop.xlane.xlu0 %1219 }
 0x543   :  { %v1229_v39 = vpop.xlane.xlu1 %1228 }
 0x544   :  { %6762 = vrcp.f32 %v1229_v39 }
 0x545   :  { %6764 = vrcp.f32 %v1220_v52 }
 0x546   :  { %6766 = vrcp.f32 %v1226_v35 }
 0x547   :  { %v1223_v56 = vpop.xlane.xlu1 %1222  ;;  %v1238_v47 = vpop.xlane.xlu0 %1237 }
 0x548   :  { %6768 = vrcp.f32 %v1223_v56 }
 0x54b   :  { %v1232_v59 = vpop.xlane.xlu0 %1231  ;;  %v1548_v40 = vpop.permute.xlu1 %1547 }
 0x54e   :  { %v6763_v44 = vpop.eup %6762 }
 0x54f   :  { %v6765_v0 = vpop.eup %6764  ;;  %v1253_v6 = vmul.f32 %v6763_v44, %v7901_v42  ;;  %v1550_v36 = vpop.permute.xlu1 %1549  ;;  %v1569_v42 = vsel %vm793_vm0, %v1548_v40, 0 }
 0x550   :  { %v6767_v1 = vpop.eup %6766  ;;  %v1250_v9 = vmul.f32 %v6765_v0, %v7897_v38  ;;  %v1572_v52 = vsel %vm793_vm0, %v1550_v36, 0 }
 0x551   :  { %v1252_v11 = vmul.f32 %v6767_v1, %v7893_v26 }
 0x552   :  { %v6769_v4 = vpop.eup %6768 }
 0x553   :  { %v1251_v48 = vmul.f32 %v6769_v4, %v7905_v43  ;;  %v1259_v20 = vpack.c.bf16 %v1253_v6, %v1252_v11 }
 0x555   :  { %v1258_v13 = vpack.c.bf16 %v1251_v48, %v1250_v9 }
 0x557   :  { %6200 = vmatprep.mubr.msk.bf16.mxu1 %vm883_vm1, %v1258_v13 }
 0x558   :  { %6201 = vmatmul.mubr.msk.bf16.vlgmr.msra.gmra.mrb[40].mxu1 %vm883_vm1, %v1259_v20 }
 0x577   :  { %v1241_v24 = vpop.xlane.xlu0 %1240 }
 0x578   :  { %6770 = vrcp.f32 %v1241_v24 }
 0x579   :  { %6772 = vrcp.f32 %v1232_v59 }
 0x57a   :  { %6774 = vrcp.f32 %v1238_v47 }
 0x57b   :  { %v1546_v18 = vpop.permute.xlu0 %1545 }
 0x57c   :  { %6552 = vmatprep.subr.msk.bf16.mxu1 %vm793_vm0, %v1546_v18  ;;  %v1566_v38 = vsel %vm793_vm0, %v1546_v18, 0 }
 0x57d   :  { %6233 = vmatpush3.bf16.xpose.msra.mxu1 %v1566_v38 }
 0x57e   :  { %6553 = vmatprep.subr.msk.bf16.mxu1 %vm793_vm0, %v1548_v40 }
 0x57f   :  { %v1538_v6 = vpop.permute.xlu0 %1537 }
 0x580   :  { %v1235_v26 = vpop.xlane.xlu1 %1234 }
 0x581   :  { %6776 = vrcp.f32 %v1235_v26 }
 0x582   :  { %v6771_v43 = vpop.eup %6770 }
 0x583   :  { %v6773_v19 = vpop.eup %6772  ;;  %v1257_v35 = vmul.f32 %v6771_v43, %v7923_v25 }
 0x584   :  { %v6775_v37 = vpop.eup %6774  ;;  %v1254_v39 = vmul.f32 %v6773_v19, %v7913_v62  ;;  %v1552_v44 = vpop.permute.xlu1 %1551 }
 0x585   :  { %6235 = vmatpush3.bf16.xpose.msra.mxu1 %v1569_v42  ;;  %v1256_v0 = vmul.f32 %v6775_v37, %v7907_v51  ;;  %v1575_v25 = vsel %vm793_vm0, %v1552_v44, 0 }
 0x586   :  { %6554 = vmatprep.subr.msk.bf16.mxu1 %vm793_vm0, %v1550_v36 }
 0x587   :  { %v1261_v4 = vpack.c.bf16 %v1257_v35, %v1256_v0 }
 0x588   :  { %v1540_v62 = vpop.permute.xlu1 %1539 }
 0x58b   :  { %v6777_v46 = vpop.eup %6776 }
 0x58c   :  { %v1255_v56 = vmul.f32 %v6777_v46, %v7927_v22  ;;  %v1542_v22 = vpop.permute.xlu0 %1541  ;;  %v1544_v51 = vpop.permute.xlu1 %1543 }
 0x58d   :  { %6237 = vmatpush3.bf16.xpose.msra.mxu1 %v1572_v52 }
 0x58e   :  { %6555 = vmatprep.subr.msk.bf16.mxu1 %vm793_vm0, %v1552_v44  ;;  %v1260_v1 = vpack.c.bf16 %v1255_v56, %v1254_v39 }
 0x590   :  { %6204 = vmatprep.mubr.msk.bf16.mxu1 %vm883_vm1, %v1260_v1 }
 0x591   :  { %6205 = vmatmul.mubr.msk.bf16.gmra.mrb[44].mxu1 %vm883_vm1, %v1261_v4 }
 0x592   :  { %6240 = vmatprep.mubr.msk.bf16.mxu1 %vm793_vm0, %v1538_v6 }
 0x595   :  { %6239 = vmatpush3.bf16.xpose.msra.mxu1 %v1575_v25 }
 0x59c   :  { %6241 = vmatmul.mubr.msk.bf16.vlgmr.msra.gmra.mrb[48].mxu1 %vm793_vm0, %v1540_v62 }
 0x59d   :  { %6244 = vmatprep.mubr.msk.bf16.mxu1 %vm793_vm0, %v1542_v22 }
 0x5a4   :  { %6245 = vmatmul.mubr.msk.bf16.gmra.mrb[52].mxu1 %vm793_vm0, %v1544_v51 }
 0x5b4   :  { %v886_v9 = vpop.xlane.xlu0 %885 }
 0x5b5   :  { %v908_v48 = vsub.f32 %v7857_v50, %v886_v9 }
 0x5b7   :  { %v916_v11 = vmul.f32 1.442695, %v908_v48  ;;  %v6626_v48 = vld [vmem:[#allocation11 + $0x10] sm:$0xff]  }
 0x5b8   :  { %v892_v13 = vpop.xlane.xlu0 %891  ;;  %6208 = vmatprep.subr.bf16.mxu0 %v6626_v48 }
 0x5b9   :  { %6778 = vpow2.f32 %v916_v11  ;;  %v910_v20 = vsub.f32 %v7855_v53, %v892_v13 }
 0x5bb   :  { %v920_v47 = vmul.f32 1.442695, %v910_v20 }
 0x5bc   :  { %v895_v59 = vpop.xlane.xlu0 %894 }
 0x5bd   :  { %6780 = vpow2.f32 %v920_v47  ;;  %v911_v40 = vsub.f32 %v7859_v29, %v895_v59  ;;  %v889_v24 = vpop.xlane.xlu1 %888 }
 0x5be   :  { %v909_v18 = vsub.f32 %v7861_v30, %v889_v24 }
 0x5bf   :  { %v922_v36 = vmul.f32 1.442695, %v911_v40 }
 0x5c0   :  { %v918_v38 = vmul.f32 1.442695, %v909_v18  ;;  %v898_v26 = vpop.xlane.xlu0 %897 }
 0x5c1   :  { %v912_v42 = vsub.f32 %v7865_v34, %v898_v26  ;;  %v901_v43 = vpop.xlane.xlu1 %900 }
 0x5c2   :  { %6782 = vpow2.f32 %v918_v38  ;;  %v913_v50 = vsub.f32 %v7869_v33, %v901_v43 }
 0x5c3   :  { %v7989_v19 = vpop.eup %6778  ;;  %v924_v53 = vmul.f32 1.442695, %v912_v42  ;;  %6784 = vpow2.f32 %v922_v36 }
 0x5c4   :  { %v926_v37 = vmul.f32 1.442695, %v913_v50  ;;  %v904_v46 = vpop.xlane.xlu0 %903  ;;  %v932_v29 = vsel %vm883_vm1, %v7989_v19, 0.0 }
 0x5c5   :  { %6786 = vpow2.f32 %v924_v53  ;;  %v914_v30 = vsub.f32 %v7863_v31, %v904_v46  ;;  %933 = vadd.xlane.f32.xlu0 %v932_v29  ;;  %v907_v35 = vpop.xlane.xlu1 %906 }
 0x5c6   :  { %v915_v34 = vsub.f32 %v7867_v2, %v907_v35  ;;  %6788 = vpow2.f32 %v926_v37 }
 0x5c7   :  { %v7995_v52 = vpop.eup %6780  ;;  %v928_v39 = vmul.f32 1.442695, %v914_v30 }
 0x5c8   :  { %v930_v33 = vmul.f32 1.442695, %v915_v34  ;;  %v938_v56 = vsel %vm883_vm1, %v7995_v52, 0.0 }
 0x5c9   :  { %6790 = vpow2.f32 %v928_v39  ;;  %939 = vadd.xlane.f32.xlu0 %v938_v56 }
 0x5ca   :  { %6792 = vpow2.f32 %v930_v33 }
 0x5cc   :  { %v6783_v44 = vpop.eup %6782 }
 0x5cd   :  { %v935_v0 = vsel %vm883_vm1, %v6783_v44, 0.0  ;;  %v8000_v1 = vpop.eup %6784 }
 0x5ce   :  { %936 = vadd.xlane.f32.xlu1 %v935_v0  ;;  %v941_v4 = vsel %vm883_vm1, %v8000_v1, 0.0 }
 0x5cf   :  { %v8002_v31 = vpop.eup %6786 }
 0x5d0   :  { %v944_v2 = vsel %vm883_vm1, %v8002_v31, 0.0  ;;  %v8008_v6 = vpop.eup %6788 }
 0x5d1   :  { %945 = vadd.xlane.f32.xlu0 %v944_v2  ;;  %v947_v22 = vsel %vm883_vm1, %v8008_v6, 0.0  ;;  %v6627_v2 = vld [vmem:[#allocation11 + $0x18] sm:$0xff]  }
 0x5d2   :  { %942 = vadd.xlane.f32.xlu1 %v941_v4 }
 0x5d3   :  { %v8010_v25 = vpop.eup %6790 }
 0x5d4   :  { %v950_v62 = vsel %vm883_vm1, %v8010_v25, 0.0  ;;  %v8016_v51 = vpop.eup %6792 }
 0x5d5   :  { %951 = vadd.xlane.f32.xlu0 %v950_v62  ;;  %v953_v9 = vsel %vm883_vm1, %v8016_v51, 0.0 }
 0x5d6   :  { %948 = vadd.xlane.f32.xlu1 %v947_v22 }
 0x5da   :  { %954 = vadd.xlane.f32.xlu1 %v953_v9 }
 0x5eb   :  { %1932 = vrot.lane.b32.xlu0 %v7747_v57, %s7412_s27  ;;  %1934 = vrot.lane.b32.xlu1 %v7765_v8, %s7412_s27 }
 0x5ef   :  { %1924 = vrot.lane.b32.xlu0 %v7759_v3, %s7412_s27  ;;  %1936 = vrot.lane.b32.xlu1 %v7781_v21, %s7412_s27 }
 0x5f3   :  { %1928 = vrot.lane.b32.xlu0 %v7777_v14, %s7412_s27  ;;  %1938 = vrot.lane.b32.xlu1 %v7791_v54, %s7412_s27 }
 0x5f7   :  { %1926 = vrot.lane.b32.xlu1 %v7757_v45, %s7412_s27 }
 0x5fb   :  { %1930 = vrot.lane.b32.xlu1 %v7775_v12, %s7412_s27 }
 0x62b   :  { %v8036_v57 = vpop.f32.mrb[40].mxu1 }
 0x62c   :  { %v8038_v3 = vpop.f32.mrb[41].mxu1 }
 0x62d   :  { %v8040_v8 = vpop.f32.mrb[42].mxu1 }
 0x62e   :  { %v1356_v14 = vpack.c.bf16 %v8040_v8, %v8036_v57  ;;  %v8044_v21 = vpop.f32.mrb[43].mxu1  ;;  %v2324_v8 = vsel %vm793_vm0, %v7831_v58, 0 }
 0x62f   :  { %v1355_v54 = vpack.c.bf16 %v8044_v21, %v8038_v3 }
 0x652   :  { %v934_v45 = vpop.xlane.xlu0 %933 }
 0x653   :  { %6794 = vrcp.f32 %v934_v45 }
 0x656   :  { %v940_v11 = vpop.xlane.xlu0 %939 }
 0x65b   :  { %v937_v13 = vpop.xlane.xlu1 %936 }
 0x65c   :  { %6796 = vrcp.f32 %v937_v13 }
 0x65d   :  { %6798 = vrcp.f32 %v940_v11  ;;  %v6795_v40 = vpop.eup %6794 }
 0x65e   :  { %v946_v12 = vpop.xlane.xlu0 %945  ;;  %v964_v37 = vmul.f32 %v6795_v40, %v7989_v19 }
 0x65f   :  { %v943_v20 = vpop.xlane.xlu1 %942 }
 0x660   :  { %6800 = vrcp.f32 %v943_v20 }
 0x661   :  { %6802 = vrcp.f32 %v946_v12 }
 0x662   :  { %v952_v47 = vpop.xlane.xlu0 %951 }
 0x663   :  { %v949_v59 = vpop.xlane.xlu1 %948 }
 0x664   :  { %6804 = vrcp.f32 %v949_v59  ;;  %v8048_v24 = vpop.f32.mrb[44].mxu1 }
 0x665   :  { %v8050_v18 = vpop.f32.mrb[45].mxu1  ;;  %6806 = vrcp.f32 %v952_v47 }
 0x666   :  { %v6797_v36 = vpop.eup %6796  ;;  %v8052_v38 = vpop.f32.mrb[46].mxu1 }
 0x667   :  { %v1933_v26 = vpop.permute.xlu0 %1932  ;;  %v1358_v42 = vpack.c.bf16 %v8052_v38, %v8048_v24  ;;  %v8056_v43 = vpop.f32.mrb[47].mxu1  ;;  %v965_v46 = vmul.f32 %v6797_v36, %v6783_v44  ;;  %v2327_v24 = vsel %vm793_vm0, %v7839_v60, 0  ;;  %v2330_v38 = vsel %vm793_vm0, %v7847_v49, 0 }
 0x668   :  { %6556 = vmatprep.subr.msk.bf16.mxu1 %vm793_vm0, %v1933_v26  ;;  %v955_v50 = vpop.xlane.xlu1 %954  ;;  %v1953_v53 = vsel %vm793_vm0, %v1933_v26, 0  ;;  %v6799_v29 = vpop.eup %6798  ;;  %v1357_v30 = vpack.c.bf16 %v8056_v43, %v8050_v18 }
 0x669   :  { %6808 = vrcp.f32 %v955_v50  ;;  %6277 = vmatpush3.bf16.xpose.msra.mxu1 %v1953_v53  ;;  %v972_v35 = vpack.c.bf16 %v965_v46, %v964_v37  ;;  %v966_v33 = vmul.f32 %v6799_v29, %v7995_v52 }
 0x66a   :  { %v6801_v34 = vpop.eup %6800 }
 0x66b   :  { %v1925_v39 = vpop.permute.xlu0 %1924  ;;  %v967_v56 = vmul.f32 %v6801_v34, %v8000_v1  ;;  %6168 = vmatprep.mubr.msk.bf16.mxu0 %vm883_vm1, %v972_v35  ;;  %v6803_v19 = vpop.eup %6802  ;;  %v6629_v35 = vld [vmem:[#allocation11 + $0x8] sm:$0xff]  }
 0x66c   :  { %6284 = vmatprep.mubr.msk.bf16.mxu1 %vm793_vm0, %v1925_v39  ;;  %v1935_v0 = vpop.permute.xlu1 %1934  ;;  %v968_v1 = vmul.f32 %v6803_v19, %v8002_v31 }
 0x66d   :  { %6557 = vmatprep.subr.msk.bf16.mxu1 %vm793_vm0, %v1935_v0  ;;  %v973_v44 = vpack.c.bf16 %v967_v56, %v966_v33  ;;  %v1956_v52 = vsel %vm793_vm0, %v1935_v0, 0 }
 0x66e   :  { %v6805_v4 = vpop.eup %6804 }
 0x66f   :  { %6169 = vmatmul.mubr.msk.bf16.vlgmr.msra.gmra.mrb[24].mxu0 %vm883_vm1, %v973_v44  ;;  %v8069_v62 = vpop.f32.mrb[48].mxu1  ;;  %v969_v9 = vmul.f32 %v6805_v4, %v8008_v6  ;;  %v6807_v45 = vpop.eup %6806 }
 0x670   :  { %v1937_v22 = vpop.permute.xlu1 %1936  ;;  %v8074_v11 = vpop.f32.mrb[49].mxu1  ;;  %6209 = vmatpush3.bf16.msra.mxu0 %v6626_v48  ;;  %v970_v6 = vmul.f32 %v6807_v45, %v8010_v25  ;;  %v1648_v40 = vsel %vm883_vm1, %v8069_v62, -inf }
 0x671   :  { %6279 = vmatpush3.bf16.xpose.msra.mxu1 %v1956_v52  ;;  %v8076_v13 = vpop.f32.mrb[50].mxu1  ;;  %v1642_v12 = vsel %vm883_vm1, %v8074_v11, -inf  ;;  %v974_v20 = vpack.c.bf16 %v969_v9, %v968_v1  ;;  %6210 = vmatprep.subr.bf16.mxu0 %v6627_v2  ;;  %v1959_v26 = vsel %vm793_vm0, %v1937_v22, 0  ;;  %v1929_v57 = vpop.permute.xlu0 %1928 }
 0x672   :  { %6558 = vmatprep.subr.msk.bf16.mxu1 %vm793_vm0, %v1937_v22  ;;  %v8081_v59 = vpop.f32.mrb[51].mxu1  ;;  %1643 = vmax.xlane.f32.xlu0 %v1642_v12  ;;  %v1651_v50 = vsel %vm883_vm1, %v8076_v13, -inf }
 0x673   :  { %v6809_v47 = vpop.eup %6808  ;;  %6172 = vmatprep.mubr.msk.bf16.mxu0 %vm883_vm1, %v974_v20  ;;  %v1645_v31 = vsel %vm883_vm1, %v8081_v59, -inf }
 0x674   :  { %v971_v48 = vmul.f32 %v6809_v47, %v8016_v51  ;;  %1646 = vmax.xlane.f32.xlu1 %v1645_v31  ;;  %6211 = vmatpush3.bf16.msra.mxu0 %v6627_v2  ;;  %v1939_v43 = vpop.permute.xlu1 %1938 }
 0x676   :  { %v975_v18 = vpack.c.bf16 %v971_v48, %v970_v6  ;;  %1649 = vmax.xlane.f32.xlu0 %v1648_v40 }
 0x677   :  { %v8091_v36 = vpop.f32.mrb[52].mxu1 }
 0x678   :  { %6173 = vmatmul.mubr.msk.bf16.gmra.mrb[28].mxu0 %vm883_vm1, %v975_v18  ;;  %v8098_v25 = vpop.f32.mrb[53].mxu1  ;;  %v1660_v46 = vsel %vm883_vm1, %v8091_v36, -inf  ;;  %v1927_v29 = vpop.permute.xlu1 %1926 }
 0x679   :  { %6212 = vmatprep.mubr.msk.bf16.mxu0 %vm793_vm0, %v1355_v54  ;;  %6281 = vmatpush3.bf16.xpose.msra.mxu1 %v1959_v26  ;;  %v8100_v51 = vpop.f32.mrb[54].mxu1  ;;  %v1654_v3 = vsel %vm883_vm1, %v8098_v25, -inf  ;;  %v1962_v54 = vsel %vm793_vm0, %v1939_v43, 0 }
 0x67a   :  { %6559 = vmatprep.subr.msk.bf16.mxu1 %vm793_vm0, %v1939_v43  ;;  %v8105_v53 = vpop.f32.mrb[55].mxu1  ;;  %1652 = vmax.xlane.f32.xlu0 %v1651_v50  ;;  %v1663_v21 = vsel %vm883_vm1, %v8100_v51, -inf }
 0x67b   :  { %v1657_v37 = vsel %vm883_vm1, %v8105_v53, -inf }
 0x67c   :  { %1658 = vmax.xlane.f32.xlu1 %v1657_v37 }
 0x67e   :  { %1655 = vmax.xlane.f32.xlu0 %v1654_v3 }
 0x680   :  { %6213 = vmatmul.mubr.msk.bf16.vlgmr.msra.gmra.mrb[32].mxu0 %vm793_vm0, %v1356_v14  ;;  %1664 = vmax.xlane.f32.xlu1 %v1663_v21  ;;  %v1931_v14 = vpop.permute.xlu1 %1930 }
 0x681   :  { %6216 = vmatprep.mubr.msk.bf16.mxu0 %vm793_vm0, %v1357_v30  ;;  %6283 = vmatpush3.bf16.xpose.msra.mxu1 %v1962_v54  ;;  %v6628_v30 = vld [vmem:[#allocation11] sm:$0xff]  }
 0x682   :  { %6560 = vmatprep.subr.msk.bf16.mxu1 %vm793_vm0, %v7831_v58  ;;  %1661 = vmax.xlane.f32.xlu0 %v1660_v46 }
 0x683   :  { %6220 = vmatprep.subr.bf16.mxu0 %v6628_v30 }
 0x684   :  { %6221 = vmatpush3.bf16.msra.mxu0 %v6628_v30 }
 0x685   :  { %6222 = vmatprep.subr.bf16.mxu0 %v6629_v35 }
 0x688   :  { %6217 = vmatmul.mubr.msk.bf16.gmra.mrb[36].mxu0 %vm793_vm0, %v1358_v42  ;;  %6285 = vmatmul.mubr.msk.bf16.vlgmr.msra.gmra.mrb[56].mxu1 %vm793_vm0, %v1927_v29  ;;  %v2333_v42 = vsel %vm793_vm0, %v7851_v32, 0 }
 0x689   :  { %6288 = vmatprep.mubr.msk.bf16.mxu1 %vm793_vm0, %v1929_v57  ;;  %6321 = vmatpush3.bf16.xpose.msra.mxu1 %v2324_v8 }
 0x68a   :  { %6561 = vmatprep.subr.msk.bf16.mxu1 %vm793_vm0, %v7839_v60  ;;  %6223 = vmatpush3.bf16.msra.mxu0 %v6629_v35 }
 0x690   :  { %6289 = vmatmul.mubr.msk.bf16.gmra.mrb[60].mxu1 %vm793_vm0, %v1931_v14 }
 0x691   :  { %6323 = vmatpush3.bf16.xpose.msra.mxu1 %v2327_v24  ;;  %6328 = vmatprep.mubr.msk.bf16.mxu1 %vm793_vm0, %v7837_v63 }
 0x692   :  { %6562 = vmatprep.subr.msk.bf16.mxu1 %vm793_vm0, %v7847_v49 }
 0x699   :  { %6325 = vmatpush3.bf16.xpose.msra.mxu1 %v2330_v38 }
 0x69a   :  { %6563 = vmatprep.subr.msk.bf16.mxu1 %vm793_vm0, %v7851_v32 }
 0x6a1   :  { %6327 = vmatpush3.bf16.xpose.msra.mxu1 %v2333_v42 }
 0x6a8   :  { %6329 = vmatmul.mubr.msk.bf16.vlgmr.msra.gmra.mrb[64].mxu1 %vm793_vm0, %v7835_v55 }
 0x6a9   :  { %6332 = vmatprep.mubr.msk.bf16.mxu1 %vm793_vm0, %v7845_v17 }
 0x6b0   :  { %6333 = vmatmul.mubr.msk.bf16.gmra.mrb[68].mxu1 %vm793_vm0, %v7843_v5 }
 0x6ff   :  { %v1644_v34 = vpop.xlane.xlu0 %1643 }
 0x700   :  { %v1666_v39 = vsub.f32 %v8074_v11, %v1644_v34 }
 0x701   :  { %v1647_v33 = vpop.xlane.xlu1 %1646 }
 0x702   :  { %v1674_v19 = vmul.f32 1.442695, %v1666_v39  ;;  %v1667_v44 = vsub.f32 %v8081_v59, %v1647_v33 }
 0x703   :  { %v1650_v56 = vpop.xlane.xlu0 %1649 }
 0x704   :  { %v1668_v0 = vsub.f32 %v8069_v62, %v1650_v56  ;;  %v1676_v52 = vmul.f32 1.442695, %v1667_v44 }
 0x706   :  { %v1678_v2 = vmul.f32 1.442695, %v1668_v0 }
 0x707   :  { %v1653_v4 = vpop.xlane.xlu0 %1652 }
 0x708   :  { %6810 = vpow2.f32 %v1678_v2  ;;  %v1669_v22 = vsub.f32 %v8076_v13, %v1653_v4 }
 0x709   :  { %6812 = vpow2.f32 %v1674_v19  ;;  %v1659_v50 = vpop.xlane.xlu1 %1658 }
 0x70a   :  { %v1680_v1 = vmul.f32 1.442695, %v1669_v22  ;;  %v1671_v54 = vsub.f32 %v8105_v53, %v1659_v50 }
 0x70b   :  { %v1656_v9 = vpop.xlane.xlu0 %1655 }
 0x70c   :  { %6814 = vpow2.f32 %v1680_v1  ;;  %v1670_v45 = vsub.f32 %v8098_v25, %v1656_v9  ;;  %v1684_v38 = vmul.f32 1.442695, %v1671_v54 }
 0x70d   :  { %6816 = vpow2.f32 %v1676_v52  ;;  %v1665_v37 = vpop.xlane.xlu1 %1664 }
 0x70e   :  { %v1682_v20 = vmul.f32 1.442695, %v1670_v45  ;;  %v1673_v3 = vsub.f32 %v8100_v51, %v1665_v37 }
 0x70f   :  { %v1662_v11 = vpop.xlane.xlu0 %1661 }
 0x710   :  { %v1672_v12 = vsub.f32 %v8091_v36, %v1662_v11  ;;  %v1688_v46 = vmul.f32 1.442695, %v1673_v3 }
 0x712   :  { %v8158_v62 = vpop.eup %6810  ;;  %v1686_v47 = vmul.f32 1.442695, %v1672_v12 }
 0x713   :  { %v1696_v59 = vsel %vm883_vm1, %v8158_v62, 0.0  ;;  %v8162_v31 = vpop.eup %6812 }
 0x714   :  { %6818 = vpow2.f32 %v1686_v47  ;;  %1697 = vadd.xlane.f32.xlu0 %v1696_v59  ;;  %v1690_v6 = vsel %vm883_vm1, %v8162_v31, 0.0 }
 0x715   :  { %6820 = vpow2.f32 %v1682_v20 }
 0x716   :  { %v8164_v13 = vpop.eup %6814  ;;  %6822 = vpow2.f32 %v1688_v46 }
 0x717   :  { %v1699_v48 = vsel %vm883_vm1, %v8164_v13, 0.0  ;;  %v8170_v40 = vpop.eup %6816  ;;  %6824 = vpow2.f32 %v1684_v38 }
 0x718   :  { %1691 = vadd.xlane.f32.xlu0 %v1690_v6  ;;  %1700 = vadd.xlane.f32.xlu1 %v1699_v48  ;;  %v1693_v18 = vsel %vm883_vm1, %v8170_v40, 0.0 }
 0x71c   :  { %1694 = vadd.xlane.f32.xlu1 %v1693_v18 }
 0x71e   :  { %v8174_v36 = vpop.eup %6818 }
 0x71f   :  { %v1708_v26 = vsel %vm883_vm1, %v8174_v36, 0.0  ;;  %v8178_v43 = vpop.eup %6820 }
 0x720   :  { %1709 = vadd.xlane.f32.xlu0 %v1708_v26  ;;  %v1702_v25 = vsel %vm883_vm1, %v8178_v43, 0.0  ;;  %v8201_v39 = vpop.eup %6822 }
 0x721   :  { %v1711_v33 = vsel %vm883_vm1, %v8201_v39, 0.0  ;;  %v8206_v56 = vpop.eup %6824 }
 0x722   :  { %v1705_v0 = vsel %vm883_vm1, %v8206_v56, 0.0 }
 0x724   :  { %1703 = vadd.xlane.f32.xlu0 %v1702_v25 }
 0x72d   :  { %1736 = vrot.lane.b32.xlu1 %v7767_v10, %s7398_s1 }
 0x731   :  { %1738 = vrot.lane.b32.xlu1 %v7783_v23, %s7398_s1 }
 0x73a   :  { %1734 = vrot.lane.b32.xlu0 %v7749_v16, %s7398_s1 }
 0x73e   :  { %2589 = vrot.lane.b32.xlu0 %v7831_v58, %s7411_s7 }
 0x742   :  { %2593 = vrot.lane.b32.xlu0 %v7847_v49, %s7411_s7  ;;  %v6170_v21 = vpop.f32.mrb[24].mxu0 }
 0x743   :  { %v1022_v29 = vpop.f32.mrb[25].mxu0 }
 0x744   :  { %v6171_v57 = vpop.f32.mrb[26].mxu0 }
 0x745   :  { %v1054_v8 = vpack.c.bf16 %v6171_v57, %v6170_v21  ;;  %v1025_v14 = vpop.f32.mrb[27].mxu0 }
 0x746   :  { %v1053_v24 = vpack.c.bf16 %v1025_v14, %v1022_v29  ;;  %2577 = vrot.lane.b32.xlu0 %v7837_v63, %s7411_s7 }
 0x748   :  { %6224 = vmatprep.mubr.msk.bf16.mxu0 %vm793_vm0, %v1053_v24 }
 0x749   :  { %6225 = vmatmul.mubr.msk.bf16.vlgmr.msra.gmra.mrb[32].mxu0 %vm793_vm0, %v1054_v8 }
 0x74a   :  { %2581 = vrot.lane.b32.xlu0 %v7845_v17, %s7411_s7 }
 0x74b   :  { %v6174_v51 = vpop.f32.mrb[28].mxu0 }
 0x74c   :  { %v1038_v53 = vpop.f32.mrb[29].mxu0 }
 0x74d   :  { %v6175_v42 = vpop.f32.mrb[30].mxu0 }
 0x74e   :  { %v1056_v30 = vpack.c.bf16 %v6175_v42, %v6174_v51  ;;  %v1041_v35 = vpop.f32.mrb[31].mxu0 }
 0x74f   :  { %v1055_v34 = vpack.c.bf16 %v1041_v35, %v1038_v53 }
 0x751   :  { %6228 = vmatprep.mubr.msk.bf16.mxu0 %vm793_vm0, %v1055_v34 }
 0x752   :  { %6229 = vmatmul.mubr.msk.bf16.gmra.mrb[36].mxu0 %vm793_vm0, %v1056_v30 }
 0x755   :  { %1712 = vadd.xlane.f32.xlu1 %v1711_v33 }
 0x759   :  { %1706 = vadd.xlane.f32.xlu1 %v1705_v0 }
 0x75b   :  { %v8210_v19 = vpop.f32.mrb[56].mxu1 }
 0x75c   :  { %v8212_v44 = vpop.f32.mrb[57].mxu1  ;;  %v2035_v11 = vsel %vm883_vm1, %v8210_v19, -inf }
 0x75d   :  { %v8214_v2 = vpop.f32.mrb[58].mxu1  ;;  %v2029_v45 = vsel %vm883_vm1, %v8212_v44, -inf }
 0x75e   :  { %v8216_v4 = vpop.f32.mrb[59].mxu1  ;;  %v2038_v12 = vsel %vm883_vm1, %v8214_v2, -inf }
 0x75f   :  { %v2032_v3 = vsel %vm883_vm1, %v8216_v4, -inf }
 0x763   :  { %v8218_v22 = vpop.f32.mrb[60].mxu1 }
 0x764   :  { %v8220_v52 = vpop.f32.mrb[61].mxu1  ;;  %v2047_v47 = vsel %vm883_vm1, %v8218_v22, -inf }
 0x765   :  { %v8222_v1 = vpop.f32.mrb[62].mxu1  ;;  %v2041_v20 = vsel %vm883_vm1, %v8220_v52, -inf }
 0x766   :  { %v8224_v9 = vpop.f32.mrb[63].mxu1  ;;  %v2050_v57 = vsel %vm883_vm1, %v8222_v1, -inf }
 0x767   :  { %v2044_v54 = vsel %vm883_vm1, %v8224_v9, -inf }
 0x769   :  { %2030 = vmax.xlane.f32.xlu0 %v2029_v45 }
 0x76a   :  { %1740 = vrot.lane.b32.xlu1 %v7793_v28, %s7398_s1 }
 0x76d   :  { %2036 = vmax.xlane.f32.xlu0 %v2035_v11 }
 0x76e   :  { %2591 = vrot.lane.b32.xlu1 %v7839_v60, %s7411_s7 }
 0x771   :  { %2039 = vmax.xlane.f32.xlu0 %v2038_v12 }
 0x772   :  { %2595 = vrot.lane.b32.xlu1 %v7851_v32, %s7411_s7 }
 0x775   :  { %2042 = vmax.xlane.f32.xlu0 %v2041_v20 }
 0x776   :  { %2579 = vrot.lane.b32.xlu1 %v7835_v55, %s7411_s7 }
 0x779   :  { %2048 = vmax.xlane.f32.xlu0 %v2047_v47 }
 0x77a   :  { %2583 = vrot.lane.b32.xlu1 %v7843_v5, %s7411_s7 }
 0x77b   :  { %v8246_v59 = vpop.f32.mrb[64].mxu1 }
 0x77c   :  { %v8248_v6 = vpop.f32.mrb[65].mxu1 }
 0x77d   :  { %v8250_v48 = vpop.f32.mrb[66].mxu1 }
 0x77e   :  { %v8252_v18 = vpop.f32.mrb[67].mxu1 }
 0x783   :  { %v8254_v26 = vpop.f32.mrb[68].mxu1 }
 0x784   :  { %v8256_v25 = vpop.f32.mrb[69].mxu1 }
 0x785   :  { %v8258_v50 = vpop.f32.mrb[70].mxu1 }
 0x786   :  { %v8260_v37 = vpop.f32.mrb[71].mxu1 }
 0x79e   :  { %2033 = vmax.xlane.f32.xlu1 %v2032_v3 }
 0x7a1   :  { %v1698_v21 = vpop.xlane.xlu0 %1697 }
 0x7a2   :  { %2045 = vmax.xlane.f32.xlu1 %v2044_v54 }
 0x7a5   :  { %v1692_v46 = vpop.xlane.xlu0 %1691  ;;  %v1701_v29 = vpop.xlane.xlu1 %1700 }
 0x7a6   :  { %2051 = vmax.xlane.f32.xlu1 %v2050_v57  ;;  %6826 = vrcp.f32 %v1692_v46 }
 0x7a9   :  { %v1695_v8 = vpop.xlane.xlu1 %1694 }
 0x7aa   :  { %6828 = vrcp.f32 %v1695_v8 }
 0x7ab   :  { %6830 = vrcp.f32 %v1701_v29 }
 0x7ac   :  { %6832 = vrcp.f32 %v1698_v21 }
 0x7ad   :  { %v1710_v14 = vpop.xlane.xlu0 %1709  ;;  %v1737_v53 = vpop.permute.xlu1 %1736 }
 0x7b0   :  { %v6827_v38 = vpop.eup %6826 }
 0x7b1   :  { %v1704_v24 = vpop.xlane.xlu0 %1703  ;;  %v1722_v30 = vmul.f32 %v6827_v38, %v8162_v31  ;;  %v1739_v45 = vpop.permute.xlu1 %1738 }
 0x7b4   :  { %v6829_v51 = vpop.eup %6828 }
 0x7b5   :  { %v1735_v42 = vpop.permute.xlu0 %1734  ;;  %v1723_v35 = vmul.f32 %v6829_v51, %v8170_v40  ;;  %v6831_v12 = vpop.eup %6830 }
 0x7b6   :  { %6248 = vmatprep.subr.bf16.mxu0 %v1735_v42  ;;  %v6833_v47 = vpop.eup %6832  ;;  %v1725_v3 = vmul.f32 %v6831_v12, %v8164_v13 }
 0x7b7   :  { %6249 = vmatpush3.bf16.msra.mxu0 %v1735_v42  ;;  %v1730_v34 = vpack.c.bf16 %v1723_v35, %v1722_v30  ;;  %v1724_v46 = vmul.f32 %v6833_v47, %v8158_v62 }
 0x7b8   :  { %6250 = vmatprep.subr.bf16.mxu0 %v1737_v53 }
 0x7b9   :  { %v2590_v33 = vpop.permute.xlu0 %2589  ;;  %6256 = vmatprep.mubr.msk.bf16.mxu0 %vm883_vm1, %v1730_v34  ;;  %v1731_v57 = vpack.c.bf16 %v1725_v3, %v1724_v46 }
 0x7ba   :  { %6564 = vmatprep.subr.msk.bf16.mxu1 %vm793_vm0, %v2590_v33  ;;  %v2610_v0 = vsel %vm793_vm0, %v2590_v33, 0 }
 0x7bb   :  { %6251 = vmatpush3.bf16.msra.mxu0 %v1737_v53  ;;  %6353 = vmatpush3.bf16.xpose.msra.mxu1 %v2610_v0 }
 0x7bc   :  { %6252 = vmatprep.subr.bf16.mxu0 %v1739_v45 }
 0x7bd   :  { %v2594_v11 = vpop.permute.xlu0 %2593 }
 0x7be   :  { %v2616_v33 = vsel %vm793_vm0, %v2594_v11, 0 }
 0x7bf   :  { %6253 = vmatpush3.bf16.msra.mxu0 %v1739_v45 }
 0x7c1   :  { %v2578_v31 = vpop.permute.xlu0 %2577 }
 0x7c2   :  { %6360 = vmatprep.mubr.msk.bf16.mxu1 %vm793_vm0, %v2578_v31 }
 0x7c5   :  { %v2582_v62 = vpop.permute.xlu0 %2581 }
 0x7e2   :  { %v1713_v40 = vpop.xlane.xlu1 %1712 }
 0x7e3   :  { %6834 = vrcp.f32 %v1713_v40 }
 0x7e4   :  { %6836 = vrcp.f32 %v1704_v24 }
 0x7e5   :  { %6838 = vrcp.f32 %v1710_v14 }
 0x7e6   :  { %v1707_v20 = vpop.xlane.xlu1 %1706 }
 0x7e7   :  { %6840 = vrcp.f32 %v1707_v20 }
 0x7ea   :  { %v1741_v54 = vpop.permute.xlu1 %1740 }
 0x7eb   :  { %6254 = vmatprep.subr.bf16.mxu0 %v1741_v54 }
 0x7ec   :  { %6255 = vmatpush3.bf16.msra.mxu0 %v1741_v54 }
 0x7ed   :  { %v6835_v8 = vpop.eup %6834 }
 0x7ee   :  { %v2592_v38 = vpop.permute.xlu1 %2591  ;;  %v6837_v29 = vpop.eup %6836  ;;  %v1729_v13 = vmul.f32 %v6835_v8, %v8201_v39 }
 0x7ef   :  { %6257 = vmatmul.mubr.msk.bf16.vlgmr.msra.gmra.mrb[40].mxu0 %vm883_vm1, %v1731_v57  ;;  %6565 = vmatprep.subr.msk.bf16.mxu1 %vm793_vm0, %v2592_v38  ;;  %v2613_v21 = vsel %vm793_vm0, %v2592_v38, 0  ;;  %v6839_v14 = vpop.eup %6838  ;;  %v1726_v51 = vmul.f32 %v6837_v29, %v8178_v43 }
 0x7f0   :  { %6355 = vmatpush3.bf16.xpose.msra.mxu1 %v2613_v21  ;;  %v1728_v42 = vmul.f32 %v6839_v14, %v8174_v36 }
 0x7f1   :  { %v6841_v24 = vpop.eup %6840  ;;  %6566 = vmatprep.subr.msk.bf16.mxu1 %vm793_vm0, %v2594_v11 }
 0x7f2   :  { %v1727_v53 = vmul.f32 %v6841_v24, %v8206_v56  ;;  %v1733_v35 = vpack.c.bf16 %v1729_v13, %v1728_v42  ;;  %v2596_v0 = vpop.permute.xlu1 %2595 }
 0x7f3   :  { %v2619_v12 = vsel %vm793_vm0, %v2596_v0, 0 }
 0x7f4   :  { %v1732_v30 = vpack.c.bf16 %v1727_v53, %v1726_v51  ;;  %v6631_v51 = vld [vmem:[#allocation11 + $0x28] sm:$0xff]  }
 0x7f6   :  { %6260 = vmatprep.mubr.msk.bf16.mxu0 %vm883_vm1, %v1732_v30  ;;  %v2031_v34 = vpop.xlane.xlu0 %2030  ;;  %v2580_v47 = vpop.permute.xlu1 %2579 }
 0x7f7   :  { %6261 = vmatmul.mubr.msk.bf16.gmra.mrb[44].mxu0 %vm883_vm1, %v1733_v35  ;;  %v2053_v39 = vsub.f32 %v8212_v44, %v2031_v34 }
 0x7f8   :  { %6357 = vmatpush3.bf16.xpose.msra.mxu1 %v2616_v33 }
 0x7f9   :  { %6567 = vmatprep.subr.msk.bf16.mxu1 %vm793_vm0, %v2596_v0  ;;  %v2061_v45 = vmul.f32 1.442695, %v2053_v39  ;;  %v2403_v0 = vsel %vm883_vm1, %v8252_v18, -inf }
 0x7fa   :  { %v2037_v43 = vpop.xlane.xlu0 %2036  ;;  %v2584_v29 = vpop.permute.xlu1 %2583 }
 0x7fb   :  { %v2055_v56 = vsub.f32 %v8210_v19, %v2037_v43 }
 0x7fd   :  { %v2065_v36 = vmul.f32 1.442695, %v2055_v56 }
 0x7fe   :  { %v2040_v31 = vpop.xlane.xlu0 %2039 }
 0x7ff   :  { %6842 = vpow2.f32 %v2065_v36  ;;  %v2056_v40 = vsub.f32 %v8214_v2, %v2040_v31 }
 0x800   :  { %6359 = vmatpush3.bf16.xpose.msra.mxu1 %v2619_v12  ;;  %6844 = vpow2.f32 %v2061_v45 }
 0x801   :  { %v2067_v11 = vmul.f32 1.442695, %v2056_v40 }
 0x802   :  { %v2043_v20 = vpop.xlane.xlu0 %2042 }
 0x803   :  { %6846 = vpow2.f32 %v2067_v11  ;;  %v2057_v44 = vsub.f32 %v8220_v52, %v2043_v20 }
 0x805   :  { %v2069_v2 = vmul.f32 1.442695, %v2057_v44 }
 0x806   :  { %v2049_v3 = vpop.xlane.xlu0 %2048 }
 0x807   :  { %v2059_v54 = vsub.f32 %v8218_v22, %v2049_v3  ;;  %6361 = vmatmul.mubr.msk.bf16.vlgmr.msra.gmra.mrb[72].mxu1 %vm793_vm0, %v2580_v47  ;;  %v2400_v3 = vsel %vm883_vm1, %v8248_v6, -inf }
 0x808   :  { %6364 = vmatprep.mubr.msk.bf16.mxu1 %vm793_vm0, %v2582_v62  ;;  %v6630_v62 = vld [vmem:[#allocation11 + $0x20] sm:$0xff]  }
 0x809   :  { %v8296_v19 = vpop.eup %6842  ;;  %v2073_v46 = vmul.f32 1.442695, %v2059_v54  ;;  %6264 = vmatprep.subr.bf16.mxu0 %v6630_v62  ;;  %v2406_v54 = vsel %vm883_vm1, %v8246_v59, -inf }
 0x80a   :  { %v2083_v57 = vsel %vm883_vm1, %v8296_v19, 0.0  ;;  %v8300_v8 = vpop.eup %6844  ;;  %6265 = vmatpush3.bf16.msra.mxu0 %v6630_v62 }
 0x80b   :  { %6848 = vpow2.f32 %v2073_v46  ;;  %2084 = vadd.xlane.f32.xlu0 %v2083_v57  ;;  %v2077_v22 = vsel %vm883_vm1, %v8300_v8, 0.0  ;;  %6266 = vmatprep.subr.bf16.mxu0 %v6631_v51 }
 0x80c   :  { %6850 = vpow2.f32 %v2069_v2  ;;  %v2409_v2 = vsel %vm883_vm1, %v8250_v48, -inf }
 0x80d   :  { %v8302_v52 = vpop.eup %6846 }
 0x80e   :  { %v2086_v38 = vsel %vm883_vm1, %v8302_v52, 0.0  ;;  %6267 = vmatpush3.bf16.msra.mxu0 %v6631_v51 }
 0x80f   :  { %2078 = vadd.xlane.f32.xlu0 %v2077_v22  ;;  %2087 = vadd.xlane.f32.xlu1 %v2086_v38 }
 0x810   :  { %6365 = vmatmul.mubr.msk.bf16.gmra.mrb[76].mxu1 %vm793_vm0, %v2584_v29 }
 0x815   :  { %v8309_v21 = vpop.eup %6848 }
 0x816   :  { %v2095_v14 = vsel %vm883_vm1, %v8309_v21, 0.0  ;;  %v8313_v24 = vpop.eup %6850 }
 0x817   :  { %2096 = vadd.xlane.f32.xlu0 %v2095_v14  ;;  %v2089_v13 = vsel %vm883_vm1, %v8313_v24, 0.0 }
 0x81b   :  { %2090 = vadd.xlane.f32.xlu0 %v2089_v13  ;;  %v2412_v13 = vsel %vm883_vm1, %v8256_v25, -inf }
 0x82b   :  { %v2034_v53 = vpop.xlane.xlu1 %2033 }
 0x82c   :  { %v2054_v42 = vsub.f32 %v8216_v4, %v2034_v53  ;;  %v2415_v53 = vsel %vm883_vm1, %v8260_v37, -inf }
 0x82e   :  { %v2063_v30 = vmul.f32 1.442695, %v2054_v42 }
 0x830   :  { %6852 = vpow2.f32 %v2063_v30 }
 0x831   :  { %2121 = vrot.lane.b32.xlu0 %v7749_v16, %s7412_s27  ;;  %v2046_v16 = vpop.xlane.xlu1 %2045 }
 0x832   :  { %v2058_v39 = vsub.f32 %v8224_v9, %v2046_v16  ;;  %v2421_v9 = vsel %vm883_vm1, %v8258_v50, -inf }
 0x834   :  { %v2071_v56 = vmul.f32 1.442695, %v2058_v39 }
 0x835   :  { %3037 = vrot.lane.b32.xlu0 %v7831_v58, %s7398_s1  ;;  %v2052_v4 = vpop.xlane.xlu1 %2051 }
 0x836   :  { %v2060_v33 = vsub.f32 %v8222_v1, %v2052_v4 }
 0x838   :  { %v2075_v43 = vmul.f32 1.442695, %v2060_v33 }
 0x839   :  { %3041 = vrot.lane.b32.xlu0 %v7847_v49, %s7398_s1 }
 0x83a   :  { %v8324_v35 = vpop.eup %6852  ;;  %6854 = vpow2.f32 %v2075_v43 }
 0x83b   :  { %v2080_v34 = vsel %vm883_vm1, %v8324_v35, 0.0  ;;  %6856 = vpow2.f32 %v2071_v56 }
 0x83c   :  { %2081 = vadd.xlane.f32.xlu1 %v2080_v34 }
 0x83d   :  { %3029 = vrot.lane.b32.xlu0 %v7837_v63, %s7398_s1 }
 0x841   :  { %3033 = vrot.lane.b32.xlu0 %v7845_v17, %s7398_s1 }
 0x844   :  { %v8340_v45 = vpop.eup %6854 }
 0x84d   :  { %2123 = vrot.lane.b32.xlu1 %v7767_v10, %s7412_s27  ;;  %v2098_v10 = vsel %vm883_vm1, %v8340_v45, 0.0 }
 0x851   :  { %2125 = vrot.lane.b32.xlu1 %v7783_v23, %s7412_s27  ;;  %v8344_v23 = vpop.eup %6856 }
 0x852   :  { %v2092_v1 = vsel %vm883_vm1, %v8344_v23, 0.0 }
 0x860   :  { %2404 = vmax.xlane.f32.xlu0 %v2403_v0  ;;  %v2418_v0 = vsel %vm883_vm1, %v8254_v26, -inf }
 0x875   :  { %2099 = vadd.xlane.f32.xlu1 %v2098_v10 }
 0x876   :  { %3035 = vrot.lane.b32.xlu0 %v7843_v5, %s7398_s1 }
 0x879   :  { %2093 = vadd.xlane.f32.xlu1 %v2092_v1 }
 0x88a   :  { %2127 = vrot.lane.b32.xlu1 %v7793_v28, %s7412_s27 }
 0x88e   :  { %3039 = vrot.lane.b32.xlu1 %v7839_v60, %s7398_s1 }
 0x892   :  { %3043 = vrot.lane.b32.xlu1 %v7851_v32, %s7398_s1 }
 0x895   :  { %2422 = vmax.xlane.f32.xlu0 %v2421_v9 }
 0x896   :  { %3031 = vrot.lane.b32.xlu1 %v7835_v55, %s7398_s1 }
 0x898   :  { %v8360_v36 = vpop.xlane.xlu0 %2084 }
 0x89c   :  { %v2079_v31 = vpop.xlane.xlu0 %2078  ;;  %v2088_v38 = vpop.xlane.xlu1 %2087 }
 0x89d   :  { %6858 = vrcp.f32 %v2079_v31 }
 0x8a4   :  { %v8362_v40 = vpop.xlane.xlu0 %2096 }
 0x8a7   :  { %v6859_v56 = vpop.eup %6858 }
 0x8a8   :  { %v8364_v12 = vpop.xlane.xlu0 %2090  ;;  %v2109_v1 = vmul.f32 %v6859_v56, %v8300_v8 }
 0x8ab   :  { %2782 = vrot.lane.b32.xlu0 %v7833_v41, %s7411_s7 }
 0x8ac   :  { %v2122_v28 = vpop.permute.xlu0 %2121 }
 0x8ad   :  { %6292 = vmatprep.subr.bf16.mxu0 %v2122_v28 }
 0x8b0   :  { %v3038_v11 = vpop.permute.xlu0 %3037 }
 0x8b1   :  { %6568 = vmatprep.subr.msk.bf16.mxu1 %vm793_vm0, %v3038_v11  ;;  %v3058_v20 = vsel %vm793_vm0, %v3038_v11, 0 }
 0x8b2   :  { %6409 = vmatpush3.bf16.xpose.msra.mxu1 %v3058_v20 }
 0x8b4   :  { %v8370_v44 = vpop.permute.xlu0 %3041 }
 0x8b8   :  { %v3030_v47 = vpop.permute.xlu0 %3029 }
 0x8b9   :  { %6416 = vmatprep.mubr.msk.bf16.mxu1 %vm793_vm0, %v3030_v47 }
 0x8ba   :  { %2401 = vmax.xlane.f32.xlu1 %v2400_v3 }
 0x8be   :  { %2407 = vmax.xlane.f32.xlu1 %v2406_v54 }
 0x8c2   :  { %v6258_v46 = vpop.f32.mrb[40].mxu0  ;;  %2410 = vmax.xlane.f32.xlu1 %v2409_v2 }
 0x8c3   :  { %v1792_v57 = vpop.f32.mrb[41].mxu0 }
 0x8c4   :  { %v6259_v22 = vpop.f32.mrb[42].mxu0 }
 0x8c5   :  { %v1824_v29 = vpack.c.bf16 %v6259_v22, %v6258_v46  ;;  %v1795_v14 = vpop.f32.mrb[43].mxu0 }
 0x8c6   :  { %v1823_v62 = vpack.c.bf16 %v1795_v14, %v1792_v57  ;;  %2413 = vmax.xlane.f32.xlu1 %v2412_v13 }
 0x8c8   :  { %6268 = vmatprep.mubr.msk.bf16.mxu0 %vm793_vm0, %v1823_v62 }
 0x8c9   :  { %6269 = vmatmul.mubr.msk.bf16.vlgmr.msra.gmra.mrb[32].mxu0 %vm793_vm0, %v1824_v29  ;;  %v2082_v51 = vpop.xlane.xlu1 %2081 }
 0x8ca   :  { %6860 = vrcp.f32 %v2082_v51  ;;  %6293 = vmatpush3.bf16.msra.mxu0 %v2122_v28  ;;  %v6262_v42 = vpop.f32.mrb[44].mxu0  ;;  %2416 = vmax.xlane.f32.xlu1 %v2415_v53 }
 0x8cb   :  { %v1808_v30 = vpop.f32.mrb[45].mxu0  ;;  %6862 = vrcp.f32 %v2088_v38 }
 0x8cc   :  { %v6263_v34 = vpop.f32.mrb[46].mxu0  ;;  %6864 = vrcp.f32 %v8360_v36 }
 0x8cd   :  { %v1826_v16 = vpack.c.bf16 %v6263_v34, %v6262_v42  ;;  %v1811_v4 = vpop.f32.mrb[47].mxu0  ;;  %v2124_v33 = vpop.permute.xlu1 %2123 }
 0x8ce   :  { %v1825_v39 = vpack.c.bf16 %v1811_v4, %v1808_v30  ;;  %6294 = vmatprep.subr.bf16.mxu0 %v2124_v33  ;;  %2419 = vmax.xlane.f32.xlu1 %v2418_v0 }
 0x8cf   :  { %6295 = vmatpush3.bf16.msra.mxu0 %v2124_v33 }
 0x8d0   :  { %6272 = vmatprep.mubr.msk.bf16.mxu0 %vm793_vm0, %v1825_v39 }
 0x8d1   :  { %6273 = vmatmul.mubr.msk.bf16.gmra.mrb[36].mxu0 %vm793_vm0, %v1826_v16  ;;  %v2126_v43 = vpop.permute.xlu1 %2125  ;;  %v6632_v16 = vld [vmem:[#allocation11 + $0x30] sm:$0xff]  }
 0x8d2   :  { %6296 = vmatprep.subr.bf16.mxu0 %v2126_v43 }
 0x8d3   :  { %6297 = vmatpush3.bf16.msra.mxu0 %v2126_v43 }
 0x8d4   :  { %v6861_v10 = vpop.eup %6860 }
 0x8d5   :  { %v2110_v9 = vmul.f32 %v6861_v10, %v8324_v35  ;;  %v6863_v53 = vpop.eup %6862 }
 0x8d6   :  { %v6865_v30 = vpop.eup %6864  ;;  %v2112_v34 = vmul.f32 %v6863_v53, %v8302_v52 }
 0x8d7   :  { %v2117_v31 = vpack.c.bf16 %v2110_v9, %v2109_v1  ;;  %v2111_v38 = vmul.f32 %v6865_v30, %v8296_v19 }
 0x8d9   :  { %6300 = vmatprep.mubr.msk.bf16.mxu0 %vm883_vm1, %v2117_v31  ;;  %v2118_v36 = vpack.c.bf16 %v2112_v34, %v2111_v38 }
 0x8da   :  { %v8392_v28 = vpop.f32.mrb[72].mxu1 }
 0x8db   :  { %v8394_v11 = vpop.f32.mrb[73].mxu1  ;;  %v2692_v2 = vsel %vm883_vm1, %v8392_v28, -inf }
 0x8dc   :  { %v8396_v20 = vpop.f32.mrb[74].mxu1  ;;  %v2686_v47 = vsel %vm883_vm1, %v8394_v11, -inf }
 0x8dd   :  { %v8400_v3 = vpop.f32.mrb[75].mxu1  ;;  %2687 = vmax.xlane.f32.xlu1 %v2686_v47  ;;  %v2695_v22 = vsel %vm883_vm1, %v8396_v20, -inf  ;;  %v3064_v47 = vsel %vm793_vm0, %v8370_v44, 0 }
 0x8de   :  { %v2689_v8 = vsel %vm883_vm1, %v8400_v3, -inf }
 0x8e1   :  { %2690 = vmax.xlane.f32.xlu1 %v2689_v8 }
 0x8e3   :  { %v8404_v35 = vpop.f32.mrb[76].mxu1 }
 0x8e4   :  { %v8406_v54 = vpop.f32.mrb[77].mxu1  ;;  %v2704_v13 = vsel %vm883_vm1, %v8404_v35, -inf }
 0x8e5   :  { %v8410_v46 = vpop.f32.mrb[78].mxu1  ;;  %2693 = vmax.xlane.f32.xlu1 %v2692_v2  ;;  %v2698_v29 = vsel %vm883_vm1, %v8406_v54, -inf }
 0x8e6   :  { %v8412_v57 = vpop.f32.mrb[79].mxu1  ;;  %v2707_v62 = vsel %vm883_vm1, %v8410_v46, -inf }
 0x8e7   :  { %v2701_v14 = vsel %vm883_vm1, %v8412_v57, -inf }
 0x8e9   :  { %2696 = vmax.xlane.f32.xlu1 %v2695_v22 }
 0x8ed   :  { %2699 = vmax.xlane.f32.xlu1 %v2698_v29 }
 0x8f1   :  { %2702 = vmax.xlane.f32.xlu1 %v2701_v14 }
 0x8f5   :  { %2705 = vmax.xlane.f32.xlu1 %v2704_v13 }
 0x8f9   :  { %2708 = vmax.xlane.f32.xlu1 %v2707_v62 }
 0x902   :  { %v2100_v51 = vpop.xlane.xlu1 %2099 }
 0x903   :  { %6866 = vrcp.f32 %v2100_v51 }
 0x904   :  { %6868 = vrcp.f32 %v8364_v12  ;;  %v6633_v12 = vld [vmem:[#allocation11 + $0x38] sm:$0xff]  }
 0x905   :  { %6870 = vrcp.f32 %v8362_v40 }
 0x906   :  { %v2094_v42 = vpop.xlane.xlu1 %2093 }
 0x907   :  { %6872 = vrcp.f32 %v2094_v42 }
 0x90a   :  { %v2128_v4 = vpop.permute.xlu1 %2127  ;;  %2784 = vrot.lane.b32.xlu1 %v7841_v61, %s7411_s7 }
 0x90b   :  { %6298 = vmatprep.subr.bf16.mxu0 %v2128_v4 }
 0x90c   :  { %6299 = vmatpush3.bf16.msra.mxu0 %v2128_v4 }
 0x90d   :  { %6308 = vmatprep.subr.bf16.mxu0 %v6632_v16  ;;  %v6867_v33 = vpop.eup %6866 }
 0x90e   :  { %v3040_v0 = vpop.permute.xlu1 %3039  ;;  %v6869_v40 = vpop.eup %6868  ;;  %v2116_v19 = vmul.f32 %v6867_v33, %v8340_v45 }
 0x90f   :  { %6301 = vmatmul.mubr.msk.bf16.vlgmr.msra.gmra.mrb[48].mxu0 %vm883_vm1, %v2118_v36  ;;  %6569 = vmatprep.subr.msk.bf16.mxu1 %vm793_vm0, %v3040_v0  ;;  %v3061_v52 = vsel %vm793_vm0, %v3040_v0, 0  ;;  %v6871_v39 = vpop.eup %6870  ;;  %v2113_v56 = vmul.f32 %v6869_v40, %v8313_v24 }
 0x910   :  { %6309 = vmatpush3.bf16.msra.mxu0 %v6632_v16  ;;  %6411 = vmatpush3.bf16.xpose.msra.mxu1 %v3061_v52  ;;  %v2115_v1 = vmul.f32 %v6871_v39, %v8309_v21  ;;  %v3034_v21 = vpop.permute.xlu0 %3033 }
 0x911   :  { %v6873_v43 = vpop.eup %6872  ;;  %6570 = vmatprep.subr.msk.bf16.mxu1 %vm793_vm0, %v8370_v44  ;;  %6310 = vmatprep.subr.bf16.mxu0 %v6633_v12 }
 0x912   :  { %v2114_v10 = vmul.f32 %v6873_v43, %v8344_v23  ;;  %v2120_v31 = vpack.c.bf16 %v2116_v19, %v2115_v1  ;;  %v3044_v8 = vpop.permute.xlu1 %3043 }
 0x913   :  { %v3067_v24 = vsel %vm793_vm0, %v3044_v8, 0 }
 0x914   :  { %6311 = vmatpush3.bf16.msra.mxu0 %v6633_v12  ;;  %v2119_v9 = vpack.c.bf16 %v2114_v10, %v2113_v56  ;;  %v2405_v23 = vpop.xlane.xlu0 %2404 }
 0x915   :  { %6336 = vmatprep.subr.bf16.mxu0 %v7833_v41  ;;  %v2425_v13 = vsub.f32 %v8252_v18, %v2405_v23 }
 0x916   :  { %6304 = vmatprep.mubr.msk.bf16.mxu0 %vm883_vm1, %v2119_v9  ;;  %v3032_v45 = vpop.permute.xlu1 %3031 }
 0x917   :  { %6305 = vmatmul.mubr.msk.bf16.gmra.mrb[52].mxu0 %vm883_vm1, %v2120_v31  ;;  %v2434_v34 = vmul.f32 1.442695, %v2425_v13 }
 0x918   :  { %6413 = vmatpush3.bf16.xpose.msra.mxu1 %v3064_v47  ;;  %v3036_v2 = vpop.permute.xlu0 %3035 }
 0x919   :  { %6571 = vmatprep.subr.msk.bf16.mxu1 %vm793_vm0, %v3044_v8 }
 0x920   :  { %6415 = vmatpush3.bf16.xpose.msra.mxu1 %v3067_v24 }
 0x922   :  { %v2423_v53 = vpop.xlane.xlu0 %2422 }
 0x923   :  { %v2431_v16 = vsub.f32 %v8258_v50, %v2423_v53 }
 0x927   :  { %6417 = vmatmul.mubr.msk.bf16.vlgmr.msra.gmra.mrb[80].mxu1 %vm793_vm0, %v3032_v45 }
 0x928   :  { %6420 = vmatprep.mubr.msk.bf16.mxu1 %vm793_vm0, %v3034_v21 }
 0x92f   :  { %6421 = vmatmul.mubr.msk.bf16.gmra.mrb[84].mxu1 %vm793_vm0, %v3036_v2 }
 0x947   :  { %v2402_v22 = vpop.xlane.xlu1 %2401 }
 0x948   :  { %v2424_v44 = vsub.f32 %v8248_v6, %v2402_v22  ;;  %v2446_v6 = vmul.f32 1.442695, %v2431_v16 }
 0x94a   :  { %v2432_v62 = vmul.f32 1.442695, %v2424_v44 }
 0x94b   :  { %v2408_v29 = vpop.xlane.xlu1 %2407 }
 0x94c   :  { %v2426_v14 = vsub.f32 %v8246_v59, %v2408_v29 }
 0x94e   :  { %v2436_v51 = vmul.f32 1.442695, %v2426_v14 }
 0x94f   :  { %v2411_v42 = vpop.xlane.xlu1 %2410 }
 0x950   :  { %6874 = vpow2.f32 %v2436_v51  ;;  %v2427_v30 = vsub.f32 %v8250_v48, %v2411_v42 }
 0x951   :  { %6876 = vpow2.f32 %v2432_v62 }
 0x952   :  { %v2438_v4 = vmul.f32 1.442695, %v2427_v30 }
 0x953   :  { %v2414_v38 = vpop.xlane.xlu1 %2413 }
 0x954   :  { %6878 = vpow2.f32 %v2438_v4  ;;  %v2428_v12 = vsub.f32 %v8256_v25, %v2414_v38 }
 0x955   :  { %6880 = vpow2.f32 %v2434_v34 }
 0x956   :  { %6882 = vpow2.f32 %v2446_v6  ;;  %v2440_v39 = vmul.f32 1.442695, %v2428_v12 }
 0x957   :  { %v2417_v36 = vpop.xlane.xlu1 %2416 }
 0x958   :  { %v2429_v59 = vsub.f32 %v8260_v37, %v2417_v36 }
 0x95a   :  { %v8456_v18 = vpop.eup %6874  ;;  %v2442_v33 = vmul.f32 1.442695, %v2429_v59 }
 0x95b   :  { %v2420_v0 = vpop.xlane.xlu1 %2419  ;;  %v2454_v48 = vsel %vm883_vm1, %v8456_v18, 0.0  ;;  %v8461_v50 = vpop.eup %6876 }
 0x95c   :  { %v2430_v40 = vsub.f32 %v8254_v26, %v2420_v0  ;;  %2455 = vadd.xlane.f32.xlu0 %v2454_v48  ;;  %6884 = vpow2.f32 %v2442_v33  ;;  %v2448_v43 = vsel %vm883_vm1, %v8461_v50, 0.0 }
 0x95e   :  { %v8464_v52 = vpop.eup %6878  ;;  %v2444_v37 = vmul.f32 1.442695, %v2430_v40 }
 0x95f   :  { %v2457_v25 = vsel %vm883_vm1, %v8464_v52, 0.0  ;;  %v8470_v19 = vpop.eup %6880 }
 0x960   :  { %6886 = vpow2.f32 %v2444_v37  ;;  %2449 = vadd.xlane.f32.xlu0 %v2448_v43  ;;  %2458 = vadd.xlane.f32.xlu1 %v2457_v25  ;;  %v2451_v26 = vsel %vm883_vm1, %v8470_v19, 0.0  ;;  %v8474_v56 = vpop.eup %6882 }
 0x961   :  { %6888 = vpow2.f32 %v2440_v39  ;;  %v2469_v10 = vsel %vm883_vm1, %v8474_v56, 0.0 }
 0x964   :  { %2452 = vadd.xlane.f32.xlu1 %v2451_v26 }
 0x966   :  { %v8478_v1 = vpop.eup %6884 }
 0x967   :  { %v2463_v47 = vsel %vm883_vm1, %v8478_v1, 0.0 }
 0x968   :  { %2470 = vadd.xlane.f32.xlu1 %v2469_v10 }
 0x96a   :  { %v8480_v9 = vpop.eup %6886  ;;  %v2688_v31 = vpop.xlane.xlu1 %2687 }
 0x96b   :  { %v2466_v8 = vsel %vm883_vm1, %v8480_v9, 0.0  ;;  %v8486_v24 = vpop.eup %6888  ;;  %v2710_v23 = vsub.f32 %v8394_v11, %v2688_v31 }
 0x96c   :  { %2464 = vadd.xlane.f32.xlu1 %v2463_v47  ;;  %2467 = vadd.xlane.f32.xlu0 %v2466_v8  ;;  %v2460_v45 = vsel %vm883_vm1, %v8486_v24, 0.0  ;;  %v8550_v47 = vpop.permute.xlu0 %2782 }
 0x96d   :  { %v2718_v44 = vmul.f32 1.442695, %v2710_v23 }
 0x96e   :  { %v2691_v21 = vpop.xlane.xlu1 %2690 }
 0x96f   :  { %v2711_v29 = vsub.f32 %v8400_v3, %v2691_v21 }
 0x970   :  { %2461 = vadd.xlane.f32.xlu0 %v2460_v45 }
 0x971   :  { %v2720_v51 = vmul.f32 1.442695, %v2711_v29 }
 0x972   :  { %v2694_v2 = vpop.xlane.xlu1 %2693 }
 0x973   :  { %v2712_v22 = vsub.f32 %v8392_v28, %v2694_v2 }
 0x975   :  { %v2722_v14 = vmul.f32 1.442695, %v2712_v22 }
 0x976   :  { %v2697_v13 = vpop.xlane.xlu1 %2696 }
 0x977   :  { %6890 = vpow2.f32 %v2722_v14  ;;  %v2713_v62 = vsub.f32 %v8396_v20, %v2697_v13 }
 0x978   :  { %6892 = vpow2.f32 %v2718_v44 }
 0x979   :  { %v2724_v53 = vmul.f32 1.442695, %v2713_v62 }
 0x97a   :  { %v2700_v42 = vpop.xlane.xlu1 %2699 }
 0x97b   :  { %6894 = vpow2.f32 %v2724_v53  ;;  %v2714_v11 = vsub.f32 %v8406_v54, %v2700_v42 }
 0x97c   :  { %6896 = vpow2.f32 %v2720_v51 }
 0x97d   :  { %v2726_v38 = vmul.f32 1.442695, %v2714_v11 }
 0x97e   :  { %v2703_v30 = vpop.xlane.xlu1 %2702 }
 0x97f   :  { %v2715_v6 = vsub.f32 %v8412_v57, %v2703_v30 }
 0x981   :  { %v8494_v34 = vpop.eup %6890 }
 0x982   :  { %v2706_v28 = vpop.xlane.xlu1 %2705  ;;  %v2740_v3 = vsel %vm883_vm1, %v8494_v34, 0.0  ;;  %v8499_v16 = vpop.eup %6892 }
 0x983   :  { %v2716_v4 = vsub.f32 %v8404_v35, %v2706_v28  ;;  %2741 = vadd.xlane.f32.xlu0 %v2740_v3  ;;  %v2734_v12 = vsel %vm883_vm1, %v8499_v16, 0.0  ;;  %v2728_v35 = vmul.f32 1.442695, %v2715_v6 }
 0x985   :  { %v8502_v20 = vpop.eup %6894  ;;  %v2730_v36 = vmul.f32 1.442695, %v2716_v4 }
 0x986   :  { %v2709_v59 = vpop.xlane.xlu1 %2708  ;;  %v2743_v54 = vsel %vm883_vm1, %v8502_v20, 0.0  ;;  %v8509_v33 = vpop.eup %6896 }
 0x987   :  { %6898 = vpow2.f32 %v2730_v36  ;;  %v2717_v0 = vsub.f32 %v8410_v46, %v2709_v59  ;;  %2735 = vadd.xlane.f32.xlu0 %v2734_v12  ;;  %2744 = vadd.xlane.f32.xlu1 %v2743_v54  ;;  %v2737_v57 = vsel %vm883_vm1, %v8509_v33, 0.0 }
 0x988   :  { %6900 = vpow2.f32 %v2726_v38 }
 0x989   :  { %v2732_v48 = vmul.f32 1.442695, %v2717_v0 }
 0x98b   :  { %6902 = vpow2.f32 %v2732_v48  ;;  %2738 = vadd.xlane.f32.xlu1 %v2737_v57 }
 0x98c   :  { %6904 = vpow2.f32 %v2728_v35 }
 0x991   :  { %v8514_v40 = vpop.eup %6898 }
 0x992   :  { %v2752_v39 = vsel %vm883_vm1, %v8514_v40, 0.0  ;;  %v8518_v37 = vpop.eup %6900 }
 0x993   :  { %2753 = vadd.xlane.f32.xlu0 %v2752_v39  ;;  %v2746_v43 = vsel %vm883_vm1, %v8518_v37, 0.0 }
 0x995   :  { %v8520_v46 = vpop.eup %6902 }
 0x996   :  { %v2755_v25 = vsel %vm883_vm1, %v8520_v46, 0.0  ;;  %v8526_v26 = vpop.eup %6904 }
 0x997   :  { %2747 = vadd.xlane.f32.xlu0 %v2746_v43  ;;  %2756 = vadd.xlane.f32.xlu1 %v2755_v25  ;;  %v2749_v10 = vsel %vm883_vm1, %v8526_v26, 0.0 }
 0x99b   :  { %2750 = vadd.xlane.f32.xlu1 %v2749_v10 }
 0x9ac   :  { %2786 = vrot.lane.b32.xlu1 %v7849_v15, %s7411_s7 }
 0x9ad   :  { %2788 = vrot.lane.b32.xlu0 %v7853_v27, %s7411_s7 }
 0x9b0   :  { %3412 = vrot.lane.b32.xlu1 %v7831_v58, %s7412_s27 }
 0x9b1   :  { %3414 = vrot.lane.b32.xlu0 %v7839_v60, %s7412_s27 }
 0x9b4   :  { %3416 = vrot.lane.b32.xlu1 %v7847_v49, %s7412_s27 }
 0x9b5   :  { %3418 = vrot.lane.b32.xlu0 %v7851_v32, %s7412_s27 }
 0x9b8   :  { %3404 = vrot.lane.b32.xlu1 %v7837_v63, %s7412_s27 }
 0x9b9   :  { %3406 = vrot.lane.b32.xlu0 %v7835_v55, %s7412_s27  ;;  %v8554_v55 = vpop.permute.xlu1 %2784 }
 0x9bc   :  { %3408 = vrot.lane.b32.xlu1 %v7845_v17, %s7412_s27 }
 0x9bd   :  { %3410 = vrot.lane.b32.xlu0 %v7843_v5, %s7412_s27 }
 0x9e2   :  { %v6302_v58 = vpop.f32.mrb[48].mxu0 }
 0x9e3   :  { %v2179_v60 = vpop.f32.mrb[49].mxu0 }
 0x9e4   :  { %v6303_v31 = vpop.f32.mrb[50].mxu0 }
 0x9e5   :  { %v2211_v49 = vpack.c.bf16 %v6303_v31, %v6302_v58  ;;  %v2182_v8 = vpop.f32.mrb[51].mxu0 }
 0x9e6   :  { %v2210_v32 = vpack.c.bf16 %v2182_v8, %v2179_v60 }
 0x9e8   :  { %6312 = vmatprep.mubr.msk.bf16.mxu0 %vm793_vm0, %v2210_v32 }
 0x9e9   :  { %6313 = vmatmul.mubr.msk.bf16.vlgmr.msra.gmra.mrb[32].mxu0 %vm793_vm0, %v2211_v49  ;;  %v2456_v63 = vpop.xlane.xlu0 %2455 }
 0x9ea   :  { %6337 = vmatpush3.bf16.msra.mxu0 %v7833_v41  ;;  %v6306_v17 = vpop.f32.mrb[52].mxu0 }
 0x9eb   :  { %6338 = vmatprep.subr.bf16.mxu0 %v7841_v61  ;;  %v2195_v5 = vpop.f32.mrb[53].mxu0 }
 0x9ec   :  { %v6307_v21 = vpop.f32.mrb[54].mxu0 }
 0x9ed   :  { %v2213_v45 = vpack.c.bf16 %v6307_v21, %v6306_v17  ;;  %v2198_v23 = vpop.f32.mrb[55].mxu0  ;;  %v2450_v22 = vpop.xlane.xlu0 %2449 }
 0x9ee   :  { %v2212_v2 = vpack.c.bf16 %v2198_v23, %v2195_v5  ;;  %6339 = vmatpush3.bf16.msra.mxu0 %v7841_v61  ;;  %v2459_v44 = vpop.xlane.xlu1 %2458 }
 0x9ef   :  { %6340 = vmatprep.subr.bf16.mxu0 %v7849_v15  ;;  %6906 = vrcp.f32 %v2459_v44 }
 0x9f0   :  { %6316 = vmatprep.mubr.msk.bf16.mxu0 %vm793_vm0, %v2212_v2  ;;  %6908 = vrcp.f32 %v2450_v22 }
 0x9f1   :  { %6317 = vmatmul.mubr.msk.bf16.gmra.mrb[36].mxu0 %vm793_vm0, %v2213_v45  ;;  %6910 = vrcp.f32 %v2456_v63 }
 0x9f2   :  { %6341 = vmatpush3.bf16.msra.mxu0 %v7849_v15  ;;  %v2453_v29 = vpop.xlane.xlu1 %2452 }
 0x9f3   :  { %6912 = vrcp.f32 %v2453_v29  ;;  %6342 = vmatprep.subr.bf16.mxu0 %v7853_v27 }
 0x9f6   :  { %6343 = vmatpush3.bf16.msra.mxu0 %v7853_v27  ;;  %v2471_v14 = vpop.xlane.xlu1 %2470 }
 0x9f7   :  { %6368 = vmatprep.subr.bf16.mxu0 %v8550_v47 }
 0x9f9   :  { %v2468_v13 = vpop.xlane.xlu0 %2467  ;;  %v6907_v62 = vpop.eup %6906 }
 0x9fa   :  { %v2465_v51 = vpop.xlane.xlu1 %2464  ;;  %v8566_v53 = vpop.f32.mrb[80].mxu1  ;;  %6914 = vrcp.f32 %v2468_v13  ;;  %v2483_v38 = vmul.f32 %v6907_v62, %v8464_v52 }
 0x9fb   :  { %v6909_v42 = vpop.eup %6908  ;;  %v8568_v30 = vpop.f32.mrb[81].mxu1  ;;  %6916 = vrcp.f32 %v2465_v51  ;;  %v3140_v39 = vsel %vm883_vm1, %v8566_v53, -inf }
 0x9fc   :  { %v6911_v11 = vpop.eup %6910  ;;  %v8570_v28 = vpop.f32.mrb[82].mxu1  ;;  %v3134_v3 = vsel %vm883_vm1, %v8568_v30, -inf  ;;  %6918 = vrcp.f32 %v2471_v14  ;;  %v2480_v12 = vmul.f32 %v6909_v42, %v8461_v50 }
 0x9fd   :  { %v6913_v4 = vpop.eup %6912  ;;  %v8575_v6 = vpop.f32.mrb[83].mxu1  ;;  %3135 = vmax.xlane.f32.xlu1 %v3134_v3  ;;  %v2482_v0 = vmul.f32 %v6911_v11, %v8456_v18  ;;  %v3143_v35 = vsel %vm883_vm1, %v8570_v28, -inf }
 0x9fe   :  { %v2462_v36 = vpop.xlane.xlu0 %2461  ;;  %v3137_v59 = vsel %vm883_vm1, %v8575_v6, -inf  ;;  %v2481_v54 = vmul.f32 %v6913_v4, %v8470_v19 }
 0x9ff   :  { %6920 = vrcp.f32 %v2462_v36  ;;  %3138 = vmax.xlane.f32.xlu0 %v3137_v59  ;;  %v2489_v48 = vpack.c.bf16 %v2483_v38, %v2482_v0 }
 0xa00   :  { %v2488_v52 = vpack.c.bf16 %v2481_v54, %v2480_v12  ;;  %v7162_v54 = vld [vmem:[#allocation11 + $0x10] sm:$0xff]  }
 0xa01   :  { %3144 = vmax.xlane.f32.xlu1 %v3143_v35 }
 0xa02   :  { %6344 = vmatprep.mubr.msk.bf16.mxu0 %vm883_vm1, %v2488_v52  ;;  %v8585_v57 = vpop.f32.mrb[84].mxu1 }
 0xa03   :  { %6345 = vmatmul.mubr.msk.bf16.vlgmr.msra.gmra.mrb[56].mxu0 %vm883_vm1, %v2489_v48  ;;  %v8590_v50 = vpop.f32.mrb[85].mxu1  ;;  %3141 = vmax.xlane.f32.xlu0 %v3140_v39  ;;  %v3152_v32 = vsel %vm883_vm1, %v8585_v57, -inf }
 0xa04   :  { %6369 = vmatpush3.bf16.msra.mxu0 %v8550_v47  ;;  %v8593_v18 = vpop.f32.mrb[86].mxu1  ;;  %v6915_v19 = vpop.eup %6914  ;;  %v3146_v10 = vsel %vm883_vm1, %v8590_v50, -inf }
 0xa05   :  { %6370 = vmatprep.subr.bf16.mxu0 %v8554_v55  ;;  %v8596_v43 = vpop.f32.mrb[87].mxu1  ;;  %v6917_v25 = vpop.eup %6916  ;;  %v2486_v47 = vmul.f32 %v6915_v19, %v8480_v9  ;;  %v3155_v63 = vsel %vm883_vm1, %v8593_v18, -inf  ;;  %v7163_v19 = vld [vmem:[#allocation11 + $0x18] sm:$0xff]  }
 0xa06   :  { %v3149_v58 = vsel %vm883_vm1, %v8596_v43, -inf  ;;  %v6919_v60 = vpop.eup %6918  ;;  %v2485_v8 = vmul.f32 %v6917_v25, %v8478_v1 }
 0xa07   :  { %3147 = vmax.xlane.f32.xlu0 %v3146_v10  ;;  %3150 = vmax.xlane.f32.xlu1 %v3149_v58  ;;  %v2487_v17 = vmul.f32 %v6919_v60, %v8474_v56  ;;  %v8634_v58 = vld [vmem:[#allocation11] sm:$0xff]  }
 0xa08   :  { %6371 = vmatpush3.bf16.msra.mxu0 %v8554_v55 }
 0xa09   :  { %v6921_v31 = vpop.eup %6920  ;;  %v2491_v21 = vpack.c.bf16 %v2487_v17, %v2486_v47 }
 0xa0a   :  { %v2484_v49 = vmul.f32 %v6921_v31, %v8486_v24 }
 0xa0b   :  { %3153 = vmax.xlane.f32.xlu0 %v3152_v32  ;;  %3156 = vmax.xlane.f32.xlu1 %v3155_v63 }
 0xa0c   :  { %v2490_v5 = vpack.c.bf16 %v2485_v8, %v2484_v49 }
 0xa0e   :  { %6348 = vmatprep.mubr.msk.bf16.mxu0 %vm883_vm1, %v2490_v5 }
 0xa0f   :  { %6349 = vmatmul.mubr.msk.bf16.gmra.mrb[60].mxu0 %vm883_vm1, %v2491_v21 }
 0xa10   :  { %v2742_v9 = vpop.xlane.xlu0 %2741 }
 0xa14   :  { %v2736_v24 = vpop.xlane.xlu0 %2735  ;;  %v2745_v55 = vpop.xlane.xlu1 %2744 }
 0xa15   :  { %6922 = vrcp.f32 %v2736_v24 }
 0xa18   :  { %v2739_v1 = vpop.xlane.xlu1 %2738 }
 0xa19   :  { %6924 = vrcp.f32 %v2739_v1 }
 0xa1a   :  { %6926 = vrcp.f32 %v2745_v55 }
 0xa1b   :  { %6928 = vrcp.f32 %v2742_v9 }
 0xa1c   :  { %3228 = vrot.lane.b32.xlu1 %v7841_v61, %s7398_s1 }
 0xa1f   :  { %v6923_v23 = vpop.eup %6922 }
 0xa20   :  { %v2754_v45 = vpop.xlane.xlu0 %2753  ;;  %v2766_v44 = vmul.f32 %v6923_v23, %v8499_v16 }
 0xa21   :  { %3226 = vrot.lane.b32.xlu0 %v7833_v41, %s7398_s1 }
 0xa23   :  { %v6925_v56 = vpop.eup %6924 }
 0xa24   :  { %v2748_v2 = vpop.xlane.xlu0 %2747  ;;  %v2757_v22 = vpop.xlane.xlu1 %2756  ;;  %v2767_v29 = vmul.f32 %v6925_v56, %v8509_v33 }
 0xa25   :  { %6930 = vrcp.f32 %v2748_v2  ;;  %v6927_v62 = vpop.eup %6926 }
 0xa26   :  { %v2774_v14 = vpack.c.bf16 %v2767_v29, %v2766_v44  ;;  %v6929_v11 = vpop.eup %6928  ;;  %v2769_v3 = vmul.f32 %v6927_v62, %v8502_v20 }
 0xa27   :  { %v2768_v33 = vmul.f32 %v6929_v11, %v8494_v34 }
 0xa28   :  { %6376 = vmatprep.mubr.msk.bf16.mxu0 %vm883_vm1, %v2774_v14  ;;  %v2751_v13 = vpop.xlane.xlu1 %2750  ;;  %v2789_v51 = vpop.permute.xlu0 %2788 }
 0xa29   :  { %6932 = vrcp.f32 %v2751_v13  ;;  %v2775_v12 = vpack.c.bf16 %v2769_v3, %v2768_v33 }
 0xa2a   :  { %6934 = vrcp.f32 %v2757_v22 }
 0xa2b   :  { %6936 = vrcp.f32 %v2754_v45 }
 0xa2c   :  { %v2787_v42 = vpop.permute.xlu1 %2786  ;;  %v3415_v36 = vpop.permute.xlu0 %3414 }
 0xa2d   :  { %6372 = vmatprep.subr.bf16.mxu0 %v2787_v42  ;;  %v3436_v10 = vsel %vm793_vm0, %v3415_v36, 0 }
 0xa2e   :  { %6373 = vmatpush3.bf16.msra.mxu0 %v2787_v42 }
 0xa2f   :  { %6374 = vmatprep.subr.bf16.mxu0 %v2789_v51  ;;  %v6931_v4 = vpop.eup %6930 }
 0xa30   :  { %v3413_v16 = vpop.permute.xlu1 %3412  ;;  %v2770_v35 = vmul.f32 %v6931_v4, %v8518_v37  ;;  %v3419_v60 = vpop.permute.xlu0 %3418 }
 0xa31   :  { %v3433_v38 = vsel %vm793_vm0, %v3413_v16, 0  ;;  %6572 = vmatprep.subr.msk.bf16.mxu1 %vm793_vm0, %v3413_v16  ;;  %v3442_v31 = vsel %vm793_vm0, %v3419_v60, 0 }
 0xa32   :  { %6375 = vmatpush3.bf16.msra.mxu0 %v2789_v51  ;;  %6453 = vmatpush3.bf16.xpose.msra.mxu1 %v3433_v38 }
 0xa33   :  { %v6933_v59 = vpop.eup %6932  ;;  %6573 = vmatprep.subr.msk.bf16.mxu1 %vm793_vm0, %v3415_v36  ;;  %6384 = vmatprep.subr.bf16.mxu0 %v7162_v54 }
 0xa34   :  { %v6935_v0 = vpop.eup %6934  ;;  %v3417_v20 = vpop.permute.xlu1 %3416  ;;  %v2771_v52 = vmul.f32 %v6933_v59, %v8526_v26 }
 0xa35   :  { %6377 = vmatmul.mubr.msk.bf16.vlgmr.msra.gmra.mrb[64].mxu0 %vm883_vm1, %v2775_v12  ;;  %v6937_v34 = vpop.eup %6936  ;;  %v2773_v39 = vmul.f32 %v6935_v0, %v8520_v46  ;;  %v3439_v46 = vsel %vm793_vm0, %v3417_v20, 0 }
 0xa36   :  { %v2776_v48 = vpack.c.bf16 %v2771_v52, %v2770_v35  ;;  %6385 = vmatpush3.bf16.msra.mxu0 %v7162_v54  ;;  %v2772_v37 = vmul.f32 %v6937_v34, %v8514_v40  ;;  %v3407_v40 = vpop.permute.xlu0 %3406 }
 0xa37   :  { %6386 = vmatprep.subr.bf16.mxu0 %v7163_v19 }
 0xa38   :  { %6380 = vmatprep.mubr.msk.bf16.mxu0 %vm883_vm1, %v2776_v48  ;;  %v3405_v25 = vpop.permute.xlu1 %3404  ;;  %v2777_v26 = vpack.c.bf16 %v2773_v39, %v2772_v37 }
 0xa39   :  { %6460 = vmatprep.mubr.msk.bf16.mxu1 %vm793_vm0, %v3405_v25 }
 0xa3a   :  { %6455 = vmatpush3.bf16.xpose.msra.mxu1 %v3436_v10  ;;  %6387 = vmatpush3.bf16.msra.mxu0 %v7163_v19  ;;  %v3411_v49 = vpop.permute.xlu0 %3410 }
 0xa3b   :  { %6574 = vmatprep.subr.msk.bf16.mxu1 %vm793_vm0, %v3417_v20  ;;  %6396 = vmatprep.subr.bf16.mxu0 %v8634_v58 }
 0xa3c   :  { %v3409_v47 = vpop.permute.xlu1 %3408 }
 0xa3d   :  { %6381 = vmatmul.mubr.msk.bf16.gmra.mrb[68].mxu0 %vm883_vm1, %v2777_v26 }
 0xa42   :  { %6457 = vmatpush3.bf16.xpose.msra.mxu1 %v3439_v46 }
 0xa43   :  { %6575 = vmatprep.subr.msk.bf16.mxu1 %vm793_vm0, %v3419_v60 }
 0xa4a   :  { %6459 = vmatpush3.bf16.xpose.msra.mxu1 %v3442_v31 }
 0xa51   :  { %6461 = vmatmul.mubr.msk.bf16.vlgmr.msra.gmra.mrb[88].mxu1 %vm793_vm0, %v3407_v40 }
 0xa52   :  { %6464 = vmatprep.mubr.msk.bf16.mxu1 %vm793_vm0, %v3409_v47 }
 0xa59   :  { %6465 = vmatmul.mubr.msk.bf16.gmra.mrb[92].mxu1 %vm793_vm0, %v3411_v49 }
 0xa5a   :  { %4285 = vmatprep.mubr.bf16.mxu1 %v7410_v7 }
 0xa8a   :  { %v3136_v8 = vpop.xlane.xlu1 %3135 }
 0xa8b   :  { %v3158_v5 = vsub.f32 %v8568_v30, %v3136_v8 }
 0xa8c   :  { %v3139_v32 = vpop.xlane.xlu0 %3138 }
 0xa8d   :  { %v3159_v63 = vsub.f32 %v8575_v6, %v3139_v32  ;;  %v3166_v45 = vmul.f32 1.442695, %v3158_v5 }
 0xa8e   :  { %v3145_v17 = vpop.xlane.xlu1 %3144 }
 0xa8f   :  { %v3161_v21 = vsub.f32 %v8570_v28, %v3145_v17  ;;  %v3168_v9 = vmul.f32 1.442695, %v3159_v63 }
 0xa90   :  { %v3142_v24 = vpop.xlane.xlu0 %3141 }
 0xa91   :  { %v3172_v55 = vmul.f32 1.442695, %v3161_v21  ;;  %v3160_v1 = vsub.f32 %v8566_v53, %v3142_v24 }
 0xa93   :  { %6938 = vpow2.f32 %v3172_v55  ;;  %v3170_v23 = vmul.f32 1.442695, %v3160_v1 }
 0xa94   :  { %6940 = vpow2.f32 %v3168_v9  ;;  %v3148_v56 = vpop.xlane.xlu0 %3147  ;;  %v3151_v2 = vpop.xlane.xlu1 %3150 }
 0xa95   :  { %6942 = vpow2.f32 %v3170_v23  ;;  %v3162_v6 = vsub.f32 %v8590_v50, %v3148_v56  ;;  %v3163_v22 = vsub.f32 %v8596_v43, %v3151_v2 }
 0xa96   :  { %6944 = vpow2.f32 %v3166_v45  ;;  %v7165_v45 = vld [vmem:[#allocation11 + $0x8] sm:$0xff]  }
 0xa97   :  { %v3174_v14 = vmul.f32 1.442695, %v3162_v6  ;;  %v3176_v62 = vmul.f32 1.442695, %v3163_v22 }
 0xa98   :  { %v3154_v30 = vpop.xlane.xlu0 %3153  ;;  %v3157_v44 = vpop.xlane.xlu1 %3156 }
 0xa99   :  { %v3164_v28 = vsub.f32 %v8585_v57, %v3154_v30  ;;  %v3165_v29 = vsub.f32 %v8593_v18, %v3157_v44 }
 0xa9b   :  { %v3178_v53 = vmul.f32 1.442695, %v3164_v28  ;;  %v3180_v13 = vmul.f32 1.442695, %v3165_v29 }
 0xa9c   :  { %v3227_v6 = vpop.permute.xlu0 %3226 }
 0xa9d   :  { %v8653_v51 = vpop.eup %6938  ;;  %6946 = vpow2.f32 %v3178_v53 }
 0xa9e   :  { %v8655_v42 = vpop.eup %6940  ;;  %6948 = vpow2.f32 %v3180_v13  ;;  %v3191_v50 = vsel %vm883_vm1, %v8653_v51, 0.0 }
 0xa9f   :  { %v8659_v43 = vpop.eup %6942  ;;  %6950 = vpow2.f32 %v3174_v14  ;;  %3192 = vadd.xlane.f32.xlu1 %v3191_v50  ;;  %v3185_v11 = vsel %vm883_vm1, %v8655_v42, 0.0 }
 0xaa0   :  { %6952 = vpow2.f32 %v3176_v62  ;;  %v3188_v57 = vsel %vm883_vm1, %v8659_v43, 0.0  ;;  %v8663_v18 = vpop.eup %6944 }
 0xaa1   :  { %3189 = vadd.xlane.f32.xlu0 %v3188_v57  ;;  %v3182_v3 = vsel %vm883_vm1, %v8663_v18, 0.0 }
 0xaa3   :  { %3186 = vadd.xlane.f32.xlu1 %v3185_v11 }
 0xaa5   :  { %3183 = vadd.xlane.f32.xlu0 %v3182_v3 }
 0xaa7   :  { %v8669_v16 = vpop.eup %6946 }
 0xaa8   :  { %v8671_v4 = vpop.eup %6948  ;;  %v3200_v33 = vsel %vm883_vm1, %v8669_v16, 0.0 }
 0xaa9   :  { %v8675_v38 = vpop.eup %6950  ;;  %3201 = vadd.xlane.f32.xlu0 %v3200_v33  ;;  %v3203_v36 = vsel %vm883_vm1, %v8671_v4, 0.0 }
 0xaaa   :  { %v8679_v59 = vpop.eup %6952  ;;  %3204 = vadd.xlane.f32.xlu1 %v3203_v36  ;;  %v3194_v12 = vsel %vm883_vm1, %v8675_v38, 0.0 }
 0xaab   :  { %v3197_v54 = vsel %vm883_vm1, %v8679_v59, 0.0 }
 0xaad   :  { %3195 = vadd.xlane.f32.xlu0 %v3194_v12 }
 0xaae   :  { %3198 = vadd.xlane.f32.xlu1 %v3197_v54 }
 0xabc   :  { %v8685_v0 = vpop.f32.mrb[32].mxu0 }
 0xabd   :  { %v8687_v20 = vpop.f32.mrb[33].mxu0 }
 0xabe   :  { %v8689_v35 = vpop.f32.mrb[34].mxu0 }
 0xabf   :  { %3230 = vrot.lane.b32.xlu1 %v7849_v15, %s7398_s1  ;;  %v8693_v52 = vpop.f32.mrb[35].mxu0 }
 0xac3   :  { %3232 = vrot.lane.b32.xlu0 %v7853_v27, %s7398_s1  ;;  %s7413_s1 = smov [#allocation16]  }
 0xac4   :  { %v8697_v34 = vpop.f32.mrb[36].mxu0  ;;  %s5578_s15 = sshll.u32 %s7413_s1, 4  ;;  %s5579_s15 = int_to_ptr.vmem [resolvable:$true] %s5578_s15 }
 0xac5   :  { %v8699_v48 = vpop.f32.mrb[37].mxu0  ;;  %s7362_s17 = scalar_lea.vmem %s5579_s15, 2048  ;;  %p7367_p9 = scmp.lt.s32.totalorder %s5579_s15, %s5579_s15 }
 0xac6   :  { %v8701_v39 = vpop.f32.mrb[38].mxu0  ;;  %p7363_p8 = scmp.ne.s32.totalorder %s5579_s15, %s7362_s17  ;;  %p7368_p10 = scmp.lt.s32.totalorder %s7362_s17, %s7362_s17 }
 0xac7   :  { %v8703_v19 = vpop.f32.mrb[39].mxu0 }
 0xac8   :  { %p7369_p11 = por %p7368_p10, %p7367_p9 }
 0xaca   :  { %p7370_p12 = pnand %p7369_p11, %p7363_p8 }
 0xad6   :  { %v6346_v25 = vpop.f32.mrb[56].mxu0 }
 0xad7   :  { %v2538_v10 = vpop.f32.mrb[57].mxu0 }
 0xad8   :  { %v6347_v37 = vpop.f32.mrb[58].mxu0 }
 0xad9   :  { %v2570_v26 = vpack.c.bf16 %v6347_v37, %v6346_v25  ;;  %v2541_v46 = vpop.f32.mrb[59].mxu0 }
 0xada   :  { %v2569_v60 = vpack.c.bf16 %v2541_v46, %v2538_v10 }
 0xae2   :  { %v6350_v31 = vpop.f32.mrb[60].mxu0 }
 0xae3   :  { %v2554_v40 = vpop.f32.mrb[61].mxu0 }
 0xae4   :  { %v6351_v47 = vpop.f32.mrb[62].mxu0 }
 0xae5   :  { %v2572_v49 = vpack.c.bf16 %v6351_v47, %v6350_v31  ;;  %v2557_v8 = vpop.f32.mrb[63].mxu0 }
 0xae6   :  { %v2571_v32 = vpack.c.bf16 %v2557_v8, %v2554_v40 }
 0xb08   :  { %v6378_v63 = vpop.f32.mrb[64].mxu0 }
 0xb09   :  { %v2840_v17 = vpop.f32.mrb[65].mxu0 }
 0xb0a   :  { %v6379_v5 = vpop.f32.mrb[66].mxu0 }
 0xb0b   :  { %v2872_v21 = vpack.c.bf16 %v6379_v5, %v6378_v63  ;;  %v2843_v9 = vpop.f32.mrb[67].mxu0 }
 0xb0c   :  { %v2871_v24 = vpack.c.bf16 %v2843_v9, %v2840_v17 }
 0xb0e   :  { %6388 = vmatprep.mubr.msk.bf16.mxu0 %vm793_vm0, %v2871_v24 }
 0xb0f   :  { %6389 = vmatmul.mubr.msk.bf16.vlgmr.msra.gmra.mrb[72].mxu0 %vm793_vm0, %v2872_v21 }
 0xb10   :  { %6397 = vmatpush3.bf16.msra.mxu0 %v8634_v58  ;;  %v6382_v55 = vpop.f32.mrb[68].mxu0  ;;  %v3229_v58 = vpop.permute.xlu1 %3228 }
 0xb11   :  { %v2856_v1 = vpop.f32.mrb[69].mxu0  ;;  %6398 = vmatprep.subr.bf16.mxu0 %v7165_v45 }
 0xb12   :  { %v6383_v23 = vpop.f32.mrb[70].mxu0 }
 0xb13   :  { %v2874_v56 = vpack.c.bf16 %v6383_v23, %v6382_v55  ;;  %v2859_v2 = vpop.f32.mrb[71].mxu0 }
 0xb14   :  { %v2873_v22 = vpack.c.bf16 %v2859_v2, %v2856_v1  ;;  %6399 = vmatpush3.bf16.msra.mxu0 %v7165_v45 }
 0xb15   :  { %6424 = vmatprep.subr.bf16.mxu0 %v3227_v6 }
 0xb16   :  { %6392 = vmatprep.mubr.msk.bf16.mxu0 %vm793_vm0, %v2873_v22 }
 0xb17   :  { %6393 = vmatmul.mubr.msk.bf16.gmra.mrb[76].mxu0 %vm793_vm0, %v2874_v56  ;;  %v7166_v56 = vld [vmem:[#allocation11 + $0x20] sm:$0xff]  }
 0xb18   :  { %6400 = vmatprep.mubr.msk.bf16.mxu0 %vm793_vm0, %v2569_v60 }
 0xb1f   :  { %6401 = vmatmul.mubr.msk.bf16.vlgmr.msra.gmra.mrb[72].mxu0 %vm793_vm0, %v2570_v26 }
 0xb20   :  { %6425 = vmatpush3.bf16.msra.mxu0 %v3227_v6  ;;  %6404 = vmatprep.mubr.msk.bf16.mxu0 %vm793_vm0, %v2571_v32 }
 0xb21   :  { %6426 = vmatprep.subr.bf16.mxu0 %v3229_v58 }
 0xb24   :  { %6427 = vmatpush3.bf16.msra.mxu0 %v3229_v58  ;;  %v8713_v30 = vpop.f32.mrb[88].mxu1 }
 0xb25   :  { %v8715_v44 = vpop.f32.mrb[89].mxu1  ;;  %v3515_v57 = vsel %vm883_vm1, %v8713_v30, -inf }
 0xb26   :  { %v8717_v28 = vpop.f32.mrb[90].mxu1  ;;  %v3509_v29 = vsel %vm883_vm1, %v8715_v44, -inf }
 0xb27   :  { %6405 = vmatmul.mubr.msk.bf16.gmra.mrb[76].mxu0 %vm793_vm0, %v2572_v49  ;;  %v8722_v14 = vpop.f32.mrb[91].mxu1  ;;  %3510 = vmax.xlane.f32.xlu1 %v3509_v29  ;;  %v3518_v13 = vsel %vm883_vm1, %v8717_v28, -inf }
 0xb28   :  { %v3512_v53 = vsel %vm883_vm1, %v8722_v14, -inf }
 0xb29   :  { %3513 = vmax.xlane.f32.xlu0 %v3512_v53 }
 0xb2b   :  { %3519 = vmax.xlane.f32.xlu1 %v3518_v13 }
 0xb2c   :  { %v8728_v62 = vpop.f32.mrb[92].mxu1  ;;  %v3193_v50 = vpop.xlane.xlu1 %3192 }
 0xb2d   :  { %v8732_v11 = vpop.f32.mrb[93].mxu1  ;;  %3516 = vmax.xlane.f32.xlu0 %v3515_v57  ;;  %v3527_v37 = vsel %vm883_vm1, %v8728_v62, -inf }
 0xb2e   :  { %v3190_v3 = vpop.xlane.xlu0 %3189  ;;  %v8734_v33 = vpop.f32.mrb[94].mxu1  ;;  %v3521_v54 = vsel %vm883_vm1, %v8732_v11, -inf }
 0xb2f   :  { %v8736_v36 = vpop.f32.mrb[95].mxu1  ;;  %v3530_v26 = vsel %vm883_vm1, %v8734_v33, -inf }
 0xb30   :  { %v3187_v12 = vpop.xlane.xlu1 %3186  ;;  %v3524_v25 = vsel %vm883_vm1, %v8736_v36, -inf }
 0xb31   :  { %6954 = vrcp.f32 %v3187_v12  ;;  %3522 = vmax.xlane.f32.xlu0 %v3521_v54  ;;  %3525 = vmax.xlane.f32.xlu1 %v3524_v25 }
 0xb32   :  { %v3184_v10 = vpop.xlane.xlu0 %3183 }
 0xb33   :  { %6956 = vrcp.f32 %v3184_v10 }
 0xb34   :  { %6958 = vrcp.f32 %v3190_v3 }
 0xb35   :  { %3528 = vmax.xlane.f32.xlu0 %v3527_v37  ;;  %3531 = vmax.xlane.f32.xlu1 %v3530_v26  ;;  %6960 = vrcp.f32 %v3193_v50 }
 0xb36   :  { %v3202_v46 = vpop.xlane.xlu0 %3201 }
 0xb37   :  { %v3205_v60 = vpop.xlane.xlu1 %3204  ;;  %6962 = vrcp.f32 %v3202_v46 }
 0xb3a   :  { %v3196_v31 = vpop.xlane.xlu0 %3195 }
 0xb3b   :  { %v6955_v40 = vpop.eup %6954  ;;  %6964 = vrcp.f32 %v3196_v31  ;;  %v3199_v47 = vpop.xlane.xlu1 %3198 }
 0xb3c   :  { %6966 = vrcp.f32 %v3199_v47  ;;  %v3215_v32 = vmul.f32 %v6955_v40, %v8655_v42 }
 0xb3d   :  { %v6957_v49 = vpop.eup %6956  ;;  %6968 = vrcp.f32 %v3205_v60 }
 0xb3e   :  { %v3214_v8 = vmul.f32 %v6957_v49, %v8663_v18  ;;  %v6959_v63 = vpop.eup %6958  ;;  %v3233_v9 = vpop.permute.xlu0 %3232 }
 0xb3f   :  { %v3231_v17 = vpop.permute.xlu1 %3230  ;;  %v6961_v21 = vpop.eup %6960  ;;  %v3216_v24 = vmul.f32 %v6959_v63, %v8659_v43 }
 0xb40   :  { %6428 = vmatprep.subr.bf16.mxu0 %v3231_v17  ;;  %v3222_v5 = vpack.c.bf16 %v3215_v32, %v3214_v8  ;;  %v3217_v1 = vmul.f32 %v6961_v21, %v8653_v51  ;;  %v7167_v51 = vld [vmem:[#allocation11 + $0x28] sm:$0xff]  }
 0xb41   :  { %6429 = vmatpush3.bf16.msra.mxu0 %v3231_v17  ;;  %v6963_v55 = vpop.eup %6962 }
 0xb42   :  { %6430 = vmatprep.subr.bf16.mxu0 %v3233_v9  ;;  %6432 = vmatprep.mubr.msk.bf16.mxu0 %vm883_vm1, %v3222_v5  ;;  %v3223_v23 = vpack.c.bf16 %v3217_v1, %v3216_v24  ;;  %v3220_v22 = vmul.f32 %v6963_v55, %v8669_v16 }
 0xb45   :  { %v6965_v45 = vpop.eup %6964  ;;  %6431 = vmatpush3.bf16.msra.mxu0 %v3233_v9 }
 0xb46   :  { %v6967_v18 = vpop.eup %6966  ;;  %v3218_v42 = vmul.f32 %v6965_v45, %v8675_v38  ;;  %6440 = vmatprep.subr.bf16.mxu0 %v7166_v56 }
 0xb47   :  { %v6969_v2 = vpop.eup %6968  ;;  %v3219_v6 = vmul.f32 %v6967_v18, %v8679_v59  ;;  %v7168_v18 = vld [vmem:[#allocation2] sm:$0xff] }
 0xb48   :  { %6433 = vmatmul.mubr.msk.bf16.vlgmr.msra.gmra.mrb[80].mxu0 %vm883_vm1, %v3223_v23  ;;  %v3221_v58 = vmul.f32 %v6969_v2, %v8671_v4  ;;  %v3779_v23 = vadd.f32 %v7168_v18, %v8687_v20  ;;  %v7171_v20 = vld [vmem:[#allocation2 + $0x8] sm:$0xff] }
 0xb49   :  { %v3224_v43 = vpack.c.bf16 %v3219_v6, %v3218_v42  ;;  %6441 = vmatpush3.bf16.msra.mxu0 %v7166_v56  ;;  %v8810_v42 = vld [vmem:[#allocation5 + $0x2] ss:$0 sm:$0xff]  ;;  %v7169_v56 = vld [vmem:[#allocation2 + $0x10] sm:$0xff] }
 0xb4a   :  { %6442 = vmatprep.subr.bf16.mxu0 %v7167_v51  ;;  %v3225_v38 = vpack.c.bf16 %v3221_v58, %v3220_v22  ;;  %v3781_v2 = vadd.f32 %v7169_v56, %v8685_v0  ;;  %v8814_v6 = vadd.f32 %v8810_v42, %v3779_v23  ;;  %v3780_v22 = vadd.f32 %v7171_v20, %v8693_v52  ;;  %v7172_v0 = vld [vmem:[#allocation2 + $0x20] sm:$0xff] }
 0xb4b   :  { %6436 = vmatprep.mubr.msk.bf16.mxu0 %vm883_vm1, %v3224_v43  ;;  %3601 = vrot.lane.b32.xlu0 %v7833_v41, %s7412_s27  ;;  %v3783_v58 = vadd.f32 %v7172_v0, %v8699_v48  ;;  %v7175_v48 = vld [vmem:[#allocation2 + $0x38] sm:$0xff] }
 0xb4c   :  { %9900 = vst [vmem:[#allocation23_spill] sm:$0xff] %v8814_v6 }
 0xb4d   :  { %6443 = vmatpush3.bf16.msra.mxu0 %v7167_v51  ;;  %v8829_v51 = vadd.f32 %v8810_v42, %v3780_v22 }
 0xb4f   :  { %9903 = vst [vmem:[#allocation26_spill] sm:$0xff] %v8829_v51 }
 0xb50   :  { %6437 = vmatmul.mubr.msk.bf16.gmra.mrb[84].mxu0 %vm883_vm1, %v3225_v38  ;;  %v7173_v38 = vld [vmem:[#allocation2 + $0x30] sm:$0xff] }
 0xbb4   :  { %v3511_v59 = vpop.xlane.xlu1 %3510 }
 0xbb5   :  { %v3533_v16 = vsub.f32 %v8715_v44, %v3511_v59  ;;  %v3785_v59 = vadd.f32 %v7173_v38, %v8697_v34 }
 0xbb6   :  { %v3514_v29 = vpop.xlane.xlu0 %3513 }
 0xbb7   :  { %v3534_v53 = vsub.f32 %v8722_v14, %v3514_v29  ;;  %v3541_v54 = vmul.f32 1.442695, %v3533_v16  ;;  %v7174_v29 = vld [vmem:[#allocation2 + $0x28] sm:$0xff]  ;;  %v8839_v52 = vadd.f32 %v8810_v42, %v3785_v59 }
 0xbb8   :  { %v3520_v13 = vpop.xlane.xlu1 %3519 }
 0xbb9   :  { %v3536_v4 = vsub.f32 %v8717_v28, %v3520_v13  ;;  %v3543_v50 = vmul.f32 1.442695, %v3534_v53  ;;  %v3784_v53 = vadd.f32 %v7174_v29, %v8703_v19  ;;  %9905 = vst [vmem:[#allocation28_spill] sm:$0xff] %v8839_v52  ;;  %v3786_v13 = vadd.f32 %v7175_v48, %v8701_v39 }
 0xbba   :  { %v3517_v57 = vpop.xlane.xlu0 %3516 }
 0xbbb   :  { %v3547_v3 = vmul.f32 1.442695, %v3536_v4  ;;  %v3535_v12 = vsub.f32 %v8713_v30, %v3517_v57  ;;  %v8843_v16 = vadd.f32 %v8810_v42, %v3784_v53  ;;  %v8848_v34 = vadd.f32 %v8810_v42, %v3786_v13 }
 0xbbd   :  { %6970 = vpow2.f32 %v3547_v3  ;;  %v3545_v41 = vmul.f32 1.442695, %v3535_v12  ;;  %9906 = vst [vmem:[#allocation29_spill] sm:$0xff] %v8843_v16  ;;  %9907 = vst [vmem:[#allocation30_spill] sm:$0xff] %v8848_v34 }
 0xbbe   :  { %6972 = vpow2.f32 %v3543_v50  ;;  %v3523_v25 = vpop.xlane.xlu0 %3522  ;;  %v3526_v10 = vpop.xlane.xlu1 %3525 }
 0xbbf   :  { %6974 = vpow2.f32 %v3545_v41  ;;  %v3537_v14 = vsub.f32 %v8732_v11, %v3523_v25 }
 0xbc0   :  { %6976 = vpow2.f32 %v3541_v54 }
 0xbc1   :  { %v3549_v28 = vmul.f32 1.442695, %v3537_v14 }
 0xbc2   :  { %v3529_v37 = vpop.xlane.xlu0 %3528  ;;  %v3532_v26 = vpop.xlane.xlu1 %3531 }
 0xbc3   :  { %v3539_v44 = vsub.f32 %v8728_v62, %v3529_v37  ;;  %v3540_v60 = vsub.f32 %v8734_v33, %v3532_v26  ;;  %v3538_v62 = vsub.f32 %v8736_v36, %v3526_v10 }
 0xbc5   :  { %v3553_v46 = vmul.f32 1.442695, %v3539_v44  ;;  %v3555_v49 = vmul.f32 1.442695, %v3540_v60  ;;  %v3551_v63 = vmul.f32 1.442695, %v3538_v62 }
 0xbc6   :  { %v8767_v31 = vpop.permute.xlu0 %3601 }
 0xbc7   :  { %v8769_v30 = vpop.eup %6970  ;;  %6978 = vpow2.f32 %v3553_v46  ;;  %6468 = vmatprep.subr.bf16.mxu0 %v8767_v31 }
 0xbc8   :  { %v8772_v40 = vpop.eup %6972  ;;  %v3566_v11 = vsel %vm883_vm1, %v8769_v30, 0.0  ;;  %6980 = vpow2.f32 %v3549_v28 }
 0xbc9   :  { %v8776_v47 = vpop.eup %6974  ;;  %3567 = vadd.xlane.f32.xlu1 %v3566_v11  ;;  %v3560_v32 = vsel %vm883_vm1, %v8772_v40, 0.0  ;;  %6982 = vpow2.f32 %v3555_v49 }
 0xbca   :  { %v3563_v33 = vsel %vm883_vm1, %v8776_v47, 0.0  ;;  %v8781_v8 = vpop.eup %6976  ;;  %6984 = vpow2.f32 %v3551_v63 }
 0xbcb   :  { %3564 = vadd.xlane.f32.xlu0 %v3563_v33  ;;  %v3557_v17 = vsel %vm883_vm1, %v8781_v8, 0.0 }
 0xbcd   :  { %3561 = vadd.xlane.f32.xlu1 %v3560_v32 }
 0xbcf   :  { %3558 = vadd.xlane.f32.xlu0 %v3557_v17 }
 0xbd1   :  { %v8787_v5 = vpop.eup %6978 }
 0xbd2   :  { %v3575_v36 = vsel %vm883_vm1, %v8787_v5, 0.0  ;;  %v8791_v21 = vpop.eup %6980 }
 0xbd3   :  { %3576 = vadd.xlane.f32.xlu1 %v3575_v36  ;;  %v3569_v9 = vsel %vm883_vm1, %v8791_v21, 0.0  ;;  %v8795_v24 = vpop.eup %6982 }
 0xbd4   :  { %v3578_v55 = vsel %vm883_vm1, %v8795_v24, 0.0  ;;  %v8799_v1 = vpop.eup %6984 }
 0xbd5   :  { %v3572_v45 = vsel %vm883_vm1, %v8799_v1, 0.0 }
 0xbd7   :  { %3570 = vadd.xlane.f32.xlu1 %v3569_v9 }
 0xbdb   :  { %3579 = vadd.xlane.f32.xlu1 %v3578_v55 }
 0xbdf   :  { %3573 = vadd.xlane.f32.xlu1 %v3572_v45 }
 0xbe5   :  { %3605 = vrot.lane.b32.xlu0 %v7849_v15, %s7412_s27  ;;  %v8818_v15 = vadd.f32 %v8810_v42, %v3781_v2 }
 0xbe7   :  { %9901 = vst [vmem:[#allocation24_spill] sm:$0xff] %v8818_v15 }
 0xbe9   :  { %3607 = vrot.lane.b32.xlu0 %v7853_v27, %s7412_s27  ;;  %v7170_v27 = vld [vmem:[#allocation2 + $0x18] sm:$0xff] }
 0xbea   :  { %v3782_v43 = vadd.f32 %v7170_v27, %v8689_v35  ;;  %v8833_v35 = vadd.f32 %v8810_v42, %v3783_v58  ;;  %v7177_v58 = vld [vmem:[#allocation11 + $0x38] sm:$0xff]  }
 0xbec   :  { %9904 = vst [vmem:[#allocation27_spill] sm:$0xff] %v8833_v35 }
 0xbf0   :  { %3603 = vrot.lane.b32.xlu1 %v7841_v61, %s7412_s27  ;;  %v8823_v61 = vadd.f32 %v8810_v42, %v3782_v43  ;;  %v7176_v43 = vld [vmem:[#allocation11 + $0x30] sm:$0xff]  }
 0xbf2   :  { %9902 = vst [vmem:[#allocation25_spill] sm:$0xff] %v8823_v61 }
 0xc08   :  { %3815 = vadd.xlane.f32.xlu0 %v8814_v6 }
 0xc0c   :  { %3819 = vadd.xlane.f32.xlu0 %v8818_v15 }
 0xc10   :  { %3821 = vadd.xlane.f32.xlu0 %v8823_v61 }
 0xc14   :  { %3823 = vadd.xlane.f32.xlu0 %v8833_v35  ;;  %3817 = vadd.xlane.f32.xlu1 %v8829_v51 }
 0xc18   :  { %3827 = vadd.xlane.f32.xlu0 %v8839_v52  ;;  %3825 = vadd.xlane.f32.xlu1 %v8843_v16 }
 0xc1b   :  { %v6434_v19 = vpop.f32.mrb[80].mxu0 }
 0xc1c   :  { %v3284_v4 = vpop.f32.mrb[81].mxu0  ;;  %3829 = vadd.xlane.f32.xlu1 %v8848_v34 }
 0xc1d   :  { %v6435_v50 = vpop.f32.mrb[82].mxu0 }
 0xc1e   :  { %v3316_v57 = vpack.c.bf16 %v6435_v50, %v6434_v19  ;;  %v3287_v3 = vpop.f32.mrb[83].mxu0 }
 0xc1f   :  { %v3315_v12 = vpack.c.bf16 %v3287_v3, %v3284_v4 }
 0xc21   :  { %6444 = vmatprep.mubr.msk.bf16.mxu0 %vm793_vm0, %v3315_v12 }
 0xc22   :  { %6445 = vmatmul.mubr.msk.bf16.vlgmr.msra.gmra.mrb[72].mxu0 %vm793_vm0, %v3316_v57 }
 0xc23   :  { %6469 = vmatpush3.bf16.msra.mxu0 %v8767_v31  ;;  %v6438_v39 = vpop.f32.mrb[84].mxu0 }
 0xc24   :  { %v3300_v54 = vpop.f32.mrb[85].mxu0 }
 0xc25   :  { %v6439_v41 = vpop.f32.mrb[86].mxu0 }
 0xc26   :  { %v3318_v25 = vpack.c.bf16 %v6439_v41, %v6438_v39  ;;  %v3303_v10 = vpop.f32.mrb[87].mxu0  ;;  %v7178_v39 = vld [vmem:[#allocation2 + $0x40] sm:$0xff] }
 0xc27   :  { %v3317_v14 = vpack.c.bf16 %v3303_v10, %v3300_v54 }
 0xc29   :  { %6448 = vmatprep.mubr.msk.bf16.mxu0 %vm793_vm0, %v3317_v14  ;;  %v7179_v14 = vld [vmem:[#allocation2 + $0x50] sm:$0xff] }
 0xc2a   :  { %6449 = vmatmul.mubr.msk.bf16.gmra.mrb[76].mxu0 %vm793_vm0, %v3318_v25 }
 0xc56   :  { %v3568_v37 = vpop.xlane.xlu1 %3567 }
 0xc58   :  { %v3565_v26 = vpop.xlane.xlu0 %3564 }
 0xc5a   :  { %v3562_v44 = vpop.xlane.xlu1 %3561 }
 0xc5b   :  { %6986 = vrcp.f32 %v3562_v44  ;;  %v7180_v44 = vld [vmem:[#allocation2 + $0x48] sm:$0xff] }
 0xc5c   :  { %v3559_v28 = vpop.xlane.xlu0 %3558 }
 0xc5d   :  { %6988 = vrcp.f32 %v3559_v28 }
 0xc5e   :  { %6990 = vrcp.f32 %v3565_v26 }
 0xc5f   :  { %6992 = vrcp.f32 %v3568_v37 }
 0xc60   :  { %v3577_v46 = vpop.xlane.xlu1 %3576  ;;  %v3606_v17 = vpop.permute.xlu0 %3605 }
 0xc64   :  { %v3571_v60 = vpop.xlane.xlu1 %3570  ;;  %v3608_v45 = vpop.permute.xlu0 %3607 }
 0xc65   :  { %v6987_v11 = vpop.eup %6986  ;;  %6994 = vrcp.f32 %v3571_v60 }
 0xc66   :  { %v3590_v33 = vmul.f32 %v6987_v11, %v8772_v40 }
 0xc67   :  { %v6989_v31 = vpop.eup %6988 }
 0xc68   :  { %v3580_v62 = vpop.xlane.xlu1 %3579  ;;  %v3589_v49 = vmul.f32 %v6989_v31, %v8781_v8  ;;  %v6991_v9 = vpop.eup %6990 }
 0xc69   :  { %v6993_v55 = vpop.eup %6992  ;;  %v3591_v18 = vmul.f32 %v6991_v9, %v8776_v47 }
 0xc6a   :  { %v3597_v32 = vpack.c.bf16 %v3590_v33, %v3589_v49  ;;  %v3592_v56 = vmul.f32 %v6993_v55, %v8769_v30 }
 0xc6c   :  { %6476 = vmatprep.mubr.msk.bf16.mxu0 %vm883_vm1, %v3597_v32  ;;  %v3574_v63 = vpop.xlane.xlu1 %3573  ;;  %v3598_v27 = vpack.c.bf16 %v3592_v56, %v3591_v18 }
 0xc6d   :  { %6996 = vrcp.f32 %v3574_v63  ;;  %v7182_v63 = vld [vmem:[#allocation2 + $0x60] sm:$0xff] }
 0xc6e   :  { %6998 = vrcp.f32 %v3580_v62 }
 0xc6f   :  { %7000 = vrcp.f32 %v3577_v46  ;;  %v6995_v8 = vpop.eup %6994  ;;  %v7181_v46 = vld [vmem:[#allocation2 + $0x58] sm:$0xff] }
 0xc70   :  { %v3604_v36 = vpop.permute.xlu1 %3603  ;;  %v3593_v2 = vmul.f32 %v6995_v8, %v8791_v21 }
 0xc71   :  { %6470 = vmatprep.subr.bf16.mxu0 %v3604_v36 }
 0xc72   :  { %6471 = vmatpush3.bf16.msra.mxu0 %v3604_v36 }
 0xc73   :  { %6472 = vmatprep.subr.bf16.mxu0 %v3606_v17 }
 0xc76   :  { %6473 = vmatpush3.bf16.msra.mxu0 %v3606_v17 }
 0xc77   :  { %v6997_v40 = vpop.eup %6996  ;;  %6474 = vmatprep.subr.bf16.mxu0 %v3608_v45 }
 0xc78   :  { %v3594_v23 = vmul.f32 %v6997_v40, %v8799_v1  ;;  %v6999_v20 = vpop.eup %6998 }
 0xc79   :  { %v7001_v0 = vpop.eup %7000  ;;  %v3596_v47 = vmul.f32 %v6999_v20, %v8795_v24 }
 0xc7a   :  { %6475 = vmatpush3.bf16.msra.mxu0 %v3608_v45  ;;  %v3599_v22 = vpack.c.bf16 %v3594_v23, %v3593_v2  ;;  %v3595_v30 = vmul.f32 %v7001_v0, %v8787_v5  ;;  %v7183_v45 = vld [vmem:[#allocation2 + $0x70] sm:$0xff]  ;;  %v7184_v23 = vld [vmem:[#allocation2 + $0x68] sm:$0xff] }
 0xc7b   :  { %6484 = vmatprep.subr.bf16.mxu0 %v7176_v43 }
 0xc7c   :  { %v3600_v1 = vpack.c.bf16 %v3596_v47, %v3595_v30 }
 0xc7d   :  { %6477 = vmatmul.mubr.msk.bf16.vlgmr.msra.gmra.mrb[88].mxu0 %vm883_vm1, %v3598_v27  ;;  %v7185_v27 = vld [vmem:[#allocation2 + $0x78] sm:$0xff] }
 0xc7e   :  { %6480 = vmatprep.mubr.msk.bf16.mxu0 %vm883_vm1, %v3599_v22  ;;  %6485 = vmatpush3.bf16.msra.mxu0 %v7176_v43 }
 0xc7f   :  { %6486 = vmatprep.subr.bf16.mxu0 %v7177_v58 }
 0xc82   :  { %6487 = vmatpush3.bf16.msra.mxu0 %v7177_v58 }
 0xc85   :  { %6481 = vmatmul.mubr.msk.bf16.gmra.mrb[92].mxu0 %vm883_vm1, %v3600_v1 }
 0xc95   :  { %v3816_v57 = vpop.xlane.xlu0 %3815 }
 0xc96   :  { %v3847_v8 = vmul.f32 0.0078125, %v3816_v57 }
 0xc98   :  { %v8897_v0 = vsub.f32 %v8814_v6, %v3847_v8  ;;  %v6657_v8 = vld [vmem:[#allocation13 + $0x6c] ss:$16 sps:$4 sm:$0xff]  }
 0xc99   :  { %v3820_v25 = vpop.xlane.xlu0 %3819 }
 0xc9a   :  { %v3849_v47 = vmul.f32 0.0078125, %v3820_v25  ;;  %v6639_v25 = vld [vmem:[#allocation13 + $0xc] ss:$16 sps:$4 sm:$0xff]  }
 0xc9b   :  { %4366 = vmatprep.subr.bf16.mxu0 %v6639_v25 }
 0xc9d   :  { %v3822_v49 = vpop.xlane.xlu0 %3821 }
 0xc9e   :  { %v3850_v1 = vmul.f32 0.0078125, %v3822_v49  ;;  %v6640_v49 = vld [vmem:[#allocation13 + $0x20] ss:$16 sps:$4 sm:$0xff]  }
 0xca1   :  { %v3818_v9 = vpop.xlane.xlu1 %3817  ;;  %v3824_v22 = vpop.xlane.xlu0 %3823 }
 0xca2   :  { %v3848_v2 = vmul.f32 0.0078125, %v3818_v9  ;;  %v6649_v9 = vld [vmem:[#allocation13 + $0x48] ss:$16 sps:$4 sm:$0xff]  }
 0xca5   :  { %v3826_v30 = vpop.xlane.xlu1 %3825 }
 0xd50   :  { %v6478_v21 = vpop.f32.mrb[88].mxu0 }
 0xd51   :  { %v3659_v38 = vpop.f32.mrb[89].mxu0 }
 0xd52   :  { %v6479_v59 = vpop.f32.mrb[90].mxu0 }
 0xd53   :  { %v3691_v29 = vpack.c.bf16 %v6479_v59, %v6478_v21  ;;  %v3662_v53 = vpop.f32.mrb[91].mxu0  ;;  %v8904_v21 = vsub.f32 %v8829_v51, %v3848_v2  ;;  %v8911_v59 = vsub.f32 %v8818_v15, %v3849_v47  ;;  %v6658_v2 = vld [vmem:[#allocation13 + $0x80] ss:$16 sps:$4 sm:$0xff]  }
 0xd54   :  { %v3690_v48 = vpack.c.bf16 %v3662_v53, %v3659_v38  ;;  %v3879_v53 = vmul.f32 %v8897_v0, %v8897_v0  ;;  %v6664_v47 = vld [vmem:[#allocation13 + $0xa0] ss:$16 sps:$4 sm:$0xff]  }
 0xd56   :  { %6488 = vmatprep.mubr.msk.bf16.mxu0 %vm793_vm0, %v3690_v48  ;;  %v3828_v48 = vpop.xlane.xlu0 %3827 }
 0xd57   :  { %6489 = vmatmul.mubr.msk.bf16.vlgmr.msra.gmra.mrb[72].mxu0 %vm793_vm0, %v3691_v29  ;;  %v3851_v29 = vmul.f32 0.0078125, %v3824_v22  ;;  %v6669_v22 = vld [vmem:[#allocation13 + $0xac] ss:$16 sps:$4 sm:$0xff]  }
 0xd58   :  { %v6482_v13 = vpop.f32.mrb[92].mxu0 }
 0xd59   :  { %v3675_v24 = vpop.f32.mrb[93].mxu0 }
 0xd5a   :  { %v6483_v19 = vpop.f32.mrb[94].mxu0 }
 0xd5b   :  { %v3693_v4 = vpack.c.bf16 %v6483_v19, %v6482_v13  ;;  %v3678_v50 = vpop.f32.mrb[95].mxu0  ;;  %v8917_v13 = vsub.f32 %v8823_v61, %v3850_v1  ;;  %v3830_v19 = vpop.xlane.xlu1 %3829  ;;  %v6672_v1 = vld [vmem:[#allocation13 + $0xc4] ss:$16 sps:$4 sm:$0xff]  }
 0xd5c   :  { %v3692_v5 = vpack.c.bf16 %v3678_v50, %v3675_v24  ;;  %v3852_v24 = vmul.f32 0.0078125, %v3826_v30  ;;  %v3853_v50 = vmul.f32 0.0078125, %v3828_v48  ;;  %v6667_v30 = vld [vmem:[#allocation13 + $0xa8] ss:$16 sps:$4 sm:$0xff]  }
 0xd5d   :  { %v6673_v48 = vld [vmem:[#allocation13 + $0xc8] ss:$16 sps:$4 sm:$0xff]  }
 0xd5e   :  { %6492 = vmatprep.mubr.msk.bf16.mxu0 %vm793_vm0, %v3692_v5  ;;  %v3881_v5 = vmul.f32 %v8911_v59, %v8911_v59  ;;  %v8927_v57 = vsub.f32 %v8843_v16, %v3852_v24  ;;  %v6678_v24 = vld [vmem:[#allocation13 + $0xe4] ss:$16 sps:$4 sm:$0xff]  }
 0xd5f   :  { %6493 = vmatmul.mubr.msk.bf16.gmra.mrb[76].mxu0 %vm793_vm0, %v3693_v4  ;;  %v8922_v4 = vsub.f32 %v8833_v35, %v3851_v29  ;;  %v6675_v29 = vld [vmem:[#allocation13 + $0xcc] ss:$16 sps:$4 sm:$0xff]  }
 0xd60   :  { %4398 = vmatprep.mubr.bf16.mxu0 %v7410_v7 }
 0xe2a   :  { %v6490_v3 = vpop.f32.mrb[72].mxu0 }
 0xe2b   :  { %v3740_v12 = vpop.f32.mrb[73].mxu0  ;;  %v3789_v37 = vadd.f32 %v7179_v14, %v6490_v3  ;;  %v3854_v3 = vmul.f32 0.0078125, %v3830_v19  ;;  %v3884_v14 = vmul.f32 %v8927_v57, %v8927_v57  ;;  %v6681_v19 = vld [vmem:[#allocation13 + $0xec] ss:$16 sps:$4 sm:$0xff]  }
 0xe2c   :  { %v3787_v54 = vadd.f32 %v7178_v39, %v3740_v12  ;;  %v6491_v41 = vpop.f32.mrb[74].mxu0  ;;  %v3882_v12 = vmul.f32 %v8917_v13, %v8917_v13  ;;  %v8932_v39 = vsub.f32 %v8839_v52, %v3853_v50  ;;  %v6679_v50 = vld [vmem:[#allocation13 + $0xe8] ss:$16 sps:$4 sm:$0xff]  }
 0xe2d   :  { %v3743_v10 = vpop.f32.mrb[75].mxu0  ;;  %v3790_v60 = vadd.f32 %v7181_v46, %v6491_v41  ;;  %v8881_v31 = vadd.f32 %v8810_v42, %v3789_v37  ;;  %v6636_v41 = vld [vmem:[#allocation13 + $0x4] ss:$16 sps:$4 sm:$0xff]   ;;  %v6634_v37 = vld [vmem:[#allocation13] ss:$16 sps:$4 sm:$0xff]  }
 0xe2e   :  { %v8874_v26 = vadd.f32 %v8810_v42, %v3787_v54  ;;  %v3788_v28 = vadd.f32 %v7180_v44, %v3743_v10  ;;  %v3883_v54 = vmul.f32 %v8922_v4, %v8922_v4  ;;  %v8937_v10 = vsub.f32 %v8848_v34, %v3854_v3  ;;  %v6637_v44 = vld [vmem:[#allocation13 + $0x8] ss:$16 sps:$4 sm:$0xff]   ;;  %4253 = vmatprep.subr.bf16.mxu1 %v6636_v41  ;;  %v6642_v46 = vld [vmem:[#allocation13 + $0x24] ss:$16 sps:$4 sm:$0xff]  }
 0xe2f   :  { %9910 = vst [vmem:[#allocation33_spill] sm:$0xff] %v8881_v31  ;;  %v8885_v32 = vadd.f32 %v8810_v42, %v3790_v60  ;;  %4254 = vmatpush1.bf16.msra.mxu1 %v6634_v37  ;;  %4367 = vmatpush1.bf16.msra.mxu0 %v6637_v44  ;;  %v6645_v60 = vld [vmem:[#allocation13 + $0x2c] ss:$16 sps:$4 sm:$0xff]  }
 0xe30   :  { %9908 = vst [vmem:[#allocation31_spill] sm:$0xff] %v8874_v26  ;;  %v8877_v11 = vadd.f32 %v8810_v42, %v3788_v28  ;;  %3831 = vadd.xlane.f32.xlu0 %v8874_v26  ;;  %v3885_v28 = vmul.f32 %v8932_v39, %v8932_v39  ;;  %4255 = vmatprep.subr.bf16.mxu1 %v6642_v46 }
 0xe31   :  { %9911 = vst [vmem:[#allocation34_spill] sm:$0xff] %v8885_v32  ;;  %4368 = vmatprep.subr.bf16.mxu0 %v6645_v60 }
 0xe32   :  { %9909 = vst [vmem:[#allocation32_spill] sm:$0xff] %v8877_v11  ;;  %3833 = vadd.xlane.f32.xlu1 %v8877_v11  ;;  %v6494_v62 = vpop.f32.mrb[76].mxu0 }
 0xe33   :  { %v3756_v33 = vpop.f32.mrb[77].mxu0  ;;  %v3793_v40 = vadd.f32 %v7183_v45, %v6494_v62  ;;  %v3886_v62 = vmul.f32 %v8937_v10, %v8937_v10  ;;  %4256 = vmatpush1.bf16.msra.mxu1 %v6640_v49  ;;  %v6652_v45 = vld [vmem:[#allocation13 + $0x60] ss:$16 sps:$4 sm:$0xff]  }
 0xe34   :  { %v3791_v17 = vadd.f32 %v7182_v63, %v3756_v33  ;;  %3835 = vadd.xlane.f32.xlu0 %v8881_v31  ;;  %v6495_v36 = vpop.f32.mrb[78].mxu0  ;;  %v6643_v33 = vld [vmem:[#allocation13 + $0x28] ss:$16 sps:$4 sm:$0xff]   ;;  %v6648_v63 = vld [vmem:[#allocation13 + $0x44] ss:$16 sps:$4 sm:$0xff]  }
 0xe35   :  { %v3759_v55 = vpop.f32.mrb[79].mxu0  ;;  %v3794_v43 = vadd.f32 %v7185_v27, %v6495_v36  ;;  %v8900_v58 = vadd.f32 %v8810_v42, %v3793_v40  ;;  %4369 = vmatpush1.bf16.msra.mxu0 %v6643_v33  ;;  %v6646_v36 = vld [vmem:[#allocation13 + $0x40] ss:$16 sps:$4 sm:$0xff]   ;;  %4257 = vmatprep.subr.bf16.mxu1 %v6648_v63  ;;  %v6655_v40 = vld [vmem:[#allocation13 + $0x68] ss:$16 sps:$4 sm:$0xff]  }
 0xe36   :  { %v8889_v18 = vadd.f32 %v8810_v42, %v3791_v17  ;;  %v3792_v56 = vadd.f32 %v7184_v23, %v3759_v55  ;;  %3837 = vadd.xlane.f32.xlu1 %v8885_v32  ;;  %v6651_v17 = vld [vmem:[#allocation13 + $0x4c] ss:$16 sps:$4 sm:$0xff]   ;;  %v6654_v55 = vld [vmem:[#allocation13 + $0x64] ss:$16 sps:$4 sm:$0xff]   ;;  %v6661_v27 = vld [vmem:[#allocation13 + $0x88] ss:$16 sps:$4 sm:$0xff]  }
 0xe37   :  { %9914 = vst [vmem:[#allocation37_spill] sm:$0xff] %v8900_v58  ;;  %v8907_v38 = vadd.f32 %v8810_v42, %v3794_v43  ;;  %4370 = vmatprep.subr.bf16.mxu0 %v6651_v17  ;;  %4258 = vmatpush1.bf16.msra.mxu1 %v6646_v36  ;;  %v6660_v23 = vld [vmem:[#allocation13 + $0x84] ss:$16 sps:$4 sm:$0xff]  }
 0xe38   :  { %9912 = vst [vmem:[#allocation35_spill] sm:$0xff] %v8889_v18  ;;  %v8893_v20 = vadd.f32 %v8810_v42, %v3792_v56  ;;  %3839 = vadd.xlane.f32.xlu0 %v8889_v18  ;;  %v3880_v42 = vmul.f32 %v8904_v21, %v8904_v21  ;;  %4259 = vmatprep.subr.bf16.mxu1 %v6654_v55  ;;  %v6663_v56 = vld [vmem:[#allocation13 + $0x8c] ss:$16 sps:$4 sm:$0xff]   ;;  %v6666_v43 = vld [vmem:[#allocation13 + $0xa4] ss:$16 sps:$4 sm:$0xff]  }
 0xe39   :  { %9915 = vst [vmem:[#allocation38_spill] sm:$0xff] %v8907_v38  ;;  %4371 = vmatpush1.bf16.msra.mxu0 %v6649_v9 }
 0xe3a   :  { %9913 = vst [vmem:[#allocation36_spill] sm:$0xff] %v8893_v20  ;;  %3841 = vadd.xlane.f32.xlu1 %v8893_v20  ;;  %4372 = vmatprep.subr.bf16.mxu0 %v6657_v8 }
 0xe3b   :  { %4260 = vmatpush1.bf16.msra.mxu1 %v6652_v45 }
 0xe3c   :  { %3843 = vadd.xlane.f32.xlu0 %v8900_v58  ;;  %4261 = vmatprep.subr.bf16.mxu1 %v6660_v23 }
 0xe3d   :  { %4373 = vmatpush1.bf16.msra.mxu0 %v6655_v40 }
 0xe3e   :  { %3845 = vadd.xlane.f32.xlu1 %v8907_v38  ;;  %4374 = vmatprep.subr.bf16.mxu0 %v6663_v56 }
 0xe3f   :  { %4262 = vmatpush1.bf16.msra.mxu1 %v6658_v2 }
 0xe40   :  { %3895 = vadd.xlane.f32.xlu0 %v3879_v53  ;;  %4263 = vmatprep.subr.bf16.mxu1 %v6666_v43  ;;  %v6670_v53 = vld [vmem:[#allocation13 + $0xc0] ss:$16 sps:$4 sm:$0xff]  }
 0xe41   :  { %4375 = vmatpush1.bf16.msra.mxu0 %v6661_v27 }
 0xe42   :  { %3897 = vadd.xlane.f32.xlu1 %v3880_v42  ;;  %4376 = vmatprep.subr.bf16.mxu0 %v6669_v22  ;;  %v6676_v42 = vld [vmem:[#allocation13 + $0xe0] ss:$16 sps:$4 sm:$0xff]  }
 0xe43   :  { %4264 = vmatpush1.bf16.msra.mxu1 %v6664_v47 }
 0xe44   :  { %3899 = vadd.xlane.f32.xlu0 %v3881_v5  ;;  %4265 = vmatprep.subr.bf16.mxu1 %v6672_v1 }
 0xe45   :  { %4377 = vmatpush1.bf16.msra.mxu0 %v6667_v30 }
 0xe46   :  { %3901 = vadd.xlane.f32.xlu1 %v3882_v12  ;;  %4378 = vmatprep.subr.bf16.mxu0 %v6675_v29 }
 0xe47   :  { %4266 = vmatpush1.bf16.msra.mxu1 %v6670_v53 }
 0xe48   :  { %3903 = vadd.xlane.f32.xlu0 %v3883_v54  ;;  %4267 = vmatprep.subr.bf16.mxu1 %v6678_v24 }
 0xe49   :  { %4379 = vmatpush1.bf16.msra.mxu0 %v6673_v48 }
 0xe4a   :  { %3905 = vadd.xlane.f32.xlu1 %v3884_v14  ;;  %4380 = vmatprep.subr.bf16.mxu0 %v6681_v19 }
 0xe4b   :  { %4268 = vmatpush1.bf16.msra.mxu1 %v6676_v42 }
 0xe4c   :  { %3907 = vadd.xlane.f32.xlu0 %v3885_v28 }
 0xe4d   :  { %4381 = vmatpush1.bf16.msra.mxu0 %v6679_v50 }
 0xe4e   :  { %3909 = vadd.xlane.f32.xlu1 %v3886_v62 }
 0xebd   :  { %v3832_v5 = vpop.xlane.xlu0 %3831 }
 0xebe   :  { %v3855_v3 = vmul.f32 0.0078125, %v3832_v5 }
 0xebf   :  { %v3834_v12 = vpop.xlane.xlu1 %3833 }
 0xec0   :  { %v8946_v54 = vsub.f32 %v8874_v26, %v3855_v3  ;;  %v3856_v41 = vmul.f32 0.0078125, %v3834_v12 }
 0xec1   :  { %v3836_v25 = vpop.xlane.xlu0 %3835 }
 0xec2   :  { %v8949_v14 = vsub.f32 %v8877_v11, %v3856_v41  ;;  %v3857_v37 = vmul.f32 0.0078125, %v3836_v25  ;;  %v3887_v44 = vmul.f32 %v8946_v54, %v8946_v54 }
 0xec3   :  { %v3838_v28 = vpop.xlane.xlu1 %3837 }
 0xec4   :  { %v8954_v46 = vsub.f32 %v8881_v31, %v3857_v37  ;;  %v3858_v60 = vmul.f32 0.0078125, %v3838_v28  ;;  %3911 = vadd.xlane.f32.xlu0 %v3887_v44  ;;  %v3888_v62 = vmul.f32 %v8949_v14, %v8949_v14 }
 0xec5   :  { %v3840_v49 = vpop.xlane.xlu0 %3839 }
 0xec6   :  { %v8959_v33 = vsub.f32 %v8885_v32, %v3858_v60  ;;  %v3859_v63 = vmul.f32 0.0078125, %v3840_v49  ;;  %3913 = vadd.xlane.f32.xlu1 %v3888_v62  ;;  %v3889_v17 = vmul.f32 %v8954_v46, %v8954_v46 }
 0xec7   :  { %v3842_v36 = vpop.xlane.xlu1 %3841 }
 0xec8   :  { %v8964_v9 = vsub.f32 %v8889_v18, %v3859_v63  ;;  %v3860_v55 = vmul.f32 0.0078125, %v3842_v36  ;;  %3915 = vadd.xlane.f32.xlu0 %v3889_v17  ;;  %v3890_v8 = vmul.f32 %v8959_v33, %v8959_v33 }
 0xec9   :  { %v3844_v45 = vpop.xlane.xlu0 %3843 }
 0xeca   :  { %v8969_v40 = vsub.f32 %v8893_v20, %v3860_v55  ;;  %v3861_v23 = vmul.f32 0.0078125, %v3844_v45  ;;  %3917 = vadd.xlane.f32.xlu1 %v3890_v8  ;;  %v3891_v56 = vmul.f32 %v8964_v9, %v8964_v9  ;;  %v8985_v55 = vld [vmem:[#allocation5 + $0x3] ss:$0 sm:$0xff] }
 0xecb   :  { %v3846_v2 = vpop.xlane.xlu1 %3845 }
 0xecc   :  { %v8974_v27 = vsub.f32 %v8900_v58, %v3861_v23  ;;  %v3862_v43 = vmul.f32 0.0078125, %v3846_v2  ;;  %3919 = vadd.xlane.f32.xlu0 %v3891_v56  ;;  %v3892_v22 = vmul.f32 %v8969_v40, %v8969_v40 }
 0xecd   :  { %v3896_v47 = vpop.xlane.xlu0 %3895 }
 0xece   :  { %v8979_v30 = vsub.f32 %v8907_v38, %v3862_v43  ;;  %v3927_v1 = vmul.f32 0.0078125, %v3896_v47  ;;  %3921 = vadd.xlane.f32.xlu1 %v3892_v22  ;;  %v3893_v29 = vmul.f32 %v8974_v27, %v8974_v27 }
 0xecf   :  { %v3898_v53 = vpop.xlane.xlu1 %3897 }
 0xed0   :  { %v3943_v48 = vadd.f32 1e-05, %v3927_v1  ;;  %v3928_v24 = vmul.f32 0.0078125, %v3898_v53  ;;  %3923 = vadd.xlane.f32.xlu0 %v3893_v29  ;;  %v3894_v42 = vmul.f32 %v8979_v30, %v8979_v30  ;;  %v8990_v1 = vld [vmem:[#allocation5 + $0x4] ss:$0 sm:$0xff] }
 0xed1   :  { %v3900_v19 = vpop.xlane.xlu0 %3899 }
 0xed2   :  { %7002 = vrsqrt.f32 %v3943_v48  ;;  %v3944_v50 = vadd.f32 1e-05, %v3928_v24  ;;  %v3929_v5 = vmul.f32 0.0078125, %v3900_v19  ;;  %3925 = vadd.xlane.f32.xlu1 %v3894_v42 }
 0xed3   :  { %v3902_v3 = vpop.xlane.xlu1 %3901 }
 0xed4   :  { %7004 = vrsqrt.f32 %v3944_v50  ;;  %v3945_v12 = vadd.f32 1e-05, %v3929_v5  ;;  %v3930_v41 = vmul.f32 0.0078125, %v3902_v3 }
 0xed5   :  { %v3904_v25 = vpop.xlane.xlu0 %3903 }
 0xed6   :  { %7006 = vrsqrt.f32 %v3945_v12  ;;  %v3946_v37 = vadd.f32 1e-05, %v3930_v41  ;;  %v3931_v44 = vmul.f32 0.0078125, %v3904_v25 }
 0xed7   :  { %v3906_v28 = vpop.xlane.xlu1 %3905 }
 0xed8   :  { %7008 = vrsqrt.f32 %v3946_v37  ;;  %v3932_v60 = vmul.f32 0.0078125, %v3906_v28  ;;  %v3947_v62 = vadd.f32 1e-05, %v3931_v44 }
 0xed9   :  { %v3908_v63 = vpop.xlane.xlu0 %3907 }
 0xeda   :  { %v3948_v49 = vadd.f32 1e-05, %v3932_v60  ;;  %v3933_v56 = vmul.f32 0.0078125, %v3908_v63 }
 0xedb   :  { %v3910_v17 = vpop.xlane.xlu1 %3909 }
 0xedc   :  { %v7003_v36 = vpop.eup %7002  ;;  %7010 = vrsqrt.f32 %v3948_v49  ;;  %v3934_v8 = vmul.f32 0.0078125, %v3910_v17  ;;  %v3949_v48 = vadd.f32 1e-05, %v3933_v56  ;;  %v6683_v56 = vld [vmem:[#allocation14 + $0xc0] sm:$0xff]  }
 0xedd   :  { %v3975_v45 = vmul.f32 %v7003_v36, %v8897_v0  ;;  %7012 = vrsqrt.f32 %v3947_v62  ;;  %6048 = vmatprep.subr.bf16.mxu0 %v6683_v56  ;;  %v6700_v56 = vld [vmem:[#allocation14 + $0x20] sm:$0xff]  }
 0xede   :  { %v7005_v23 = vpop.eup %7004  ;;  %v3950_v47 = vadd.f32 1e-05, %v3934_v8 }
 0xedf   :  { %v3995_v2 = vmul.f32 %v8985_v55, %v3975_v45  ;;  %v3976_v43 = vmul.f32 %v7005_v23, %v8904_v21 }
 0xee0   :  { %v7007_v22 = vpop.eup %7006  ;;  %7014 = vrsqrt.f32 %v3950_v47  ;;  %v6687_v47 = vld [vmem:[#allocation14 + $0xc8] sm:$0xff]  }
 0xee1   :  { %v3996_v29 = vmul.f32 %v8985_v55, %v3976_v43  ;;  %v4015_v24 = vadd.f32 %v8990_v1, %v3995_v2  ;;  %v3977_v0 = vmul.f32 %v7007_v22, %v8911_v59  ;;  %7016 = vrsqrt.f32 %v3949_v48  ;;  %v6684_v2 = vld [vmem:[#allocation14] sm:$0xff]   ;;  %v6686_v22 = vld [vmem:[#allocation14 + $0x48] sm:$0xff]   ;;  %v6690_v48 = vld [vmem:[#allocation14 + $0x50] sm:$0xff]  }
 0xee2   :  { %v7009_v53 = vpop.eup %7008  ;;  %v6685_v43 = vld [vmem:[#allocation14 + $0x80] sm:$0xff]  }
 0xee3   :  { %v4016_v42 = vadd.f32 %v8990_v1, %v3996_v29  ;;  %v3978_v19 = vmul.f32 %v7009_v53, %v8917_v13  ;;  %v3997_v3 = vmul.f32 %v8985_v55, %v3977_v0  ;;  %v6688_v29 = vld [vmem:[#allocation14 + $0x8] sm:$0xff]   ;;  %v6692_v0 = vld [vmem:[#allocation14 + $0x10] sm:$0xff]  }
 0xee4   :  { %v6689_v53 = vld [vmem:[#allocation14 + $0x88] sm:$0xff]  }
 0xee5   :  { %v4031_v50 = vpack.c.bf16 %v4016_v42, %v4015_v24  ;;  %v3998_v21 = vmul.f32 %v8985_v55, %v3978_v19  ;;  %v4017_v13 = vadd.f32 %v8990_v1, %v3997_v3  ;;  %v6691_v24 = vld [vmem:[#allocation14 + $0xd0] sm:$0xff]  }
 0xee6   :  { %v7011_v5 = vpop.eup %7010  ;;  %v6693_v19 = vld [vmem:[#allocation14 + $0x90] sm:$0xff]  }
 0xee7   :  { %4286 = vmatmul.mubr.bf16.vlgmr.msra.gmra.mrb[96].mxu1 %v4031_v50  ;;  %4399 = vmatmul.mubr.bf16.vlgmr.msra.gmra.mrb[96].mxu0 %v4031_v50  ;;  %v7013_v12 = vpop.eup %7012  ;;  %v4018_v41 = vadd.f32 %v8990_v1, %v3998_v21  ;;  %v3980_v59 = vmul.f32 %v7011_v5, %v8927_v57 }
 0xee8   :  { %4295 = vmatprep.mubr.bf16.mxu1 %v7410_v7  ;;  %4408 = vmatprep.mubr.bf16.mxu0 %v7410_v7  ;;  %v3979_v25 = vmul.f32 %v7013_v12, %v8922_v4  ;;  %v6694_v12 = vld [vmem:[#allocation14 + $0x58] sm:$0xff]  }
 0xee9   :  { %v4032_v37 = vpack.c.bf16 %v4018_v41, %v4017_v13  ;;  %v4000_v44 = vmul.f32 %v8985_v55, %v3980_v59  ;;  %6049 = vmatpush3.bf16.msra.mxu0 %v6685_v43  ;;  %v6695_v41 = vld [vmem:[#allocation14 + $0xd8] sm:$0xff]  }
 0xeea   :  { %v7015_v28 = vpop.eup %7014  ;;  %v3999_v60 = vmul.f32 %v8985_v55, %v3979_v25  ;;  %6050 = vmatprep.subr.bf16.mxu0 %v6687_v47  ;;  %v6696_v13 = vld [vmem:[#allocation14 + $0x18] sm:$0xff]  }
 0xeeb   :  { %v7017_v62 = vpop.eup %7016  ;;  %v4020_v49 = vadd.f32 %v8990_v1, %v4000_v44  ;;  %v3982_v57 = vmul.f32 %v7015_v28, %v8937_v10  ;;  %v6697_v25 = vld [vmem:[#allocation14 + $0x98] sm:$0xff]  }
 0xeec   :  { %v4019_v63 = vadd.f32 %v8990_v1, %v3999_v60  ;;  %v3981_v4 = vmul.f32 %v7017_v62, %v8932_v39  ;;  %v6682_v39 = vld [vmem:[#allocation14 + $0x40] sm:$0xff]  }
 0xeed   :  { %v4002_v36 = vmul.f32 %v8985_v55, %v3982_v57  ;;  %5984 = vmatprep.subr.bf16.mxu1 %v6682_v39  ;;  %6051 = vmatpush3.bf16.msra.mxu0 %v6689_v53 }
 0xeee   :  { %v4033_v17 = vpack.c.bf16 %v4020_v49, %v4019_v63  ;;  %v4001_v8 = vmul.f32 %v8985_v55, %v3981_v4  ;;  %5985 = vmatpush3.bf16.msra.mxu1 %v6684_v2  ;;  %6052 = vmatprep.subr.bf16.mxu0 %v6691_v24  ;;  %v6698_v4 = vld [vmem:[#allocation14 + $0x60] sm:$0xff]   ;;  %v6703_v24 = vld [vmem:[#allocation14 + $0xe8] sm:$0xff]  }
 0xeef   :  { %4296 = vmatmul.mubr.bf16.gmra.mrb[100].mxu1 %v4032_v37  ;;  %4409 = vmatmul.mubr.bf16.gmra.mrb[100].mxu0 %v4032_v37  ;;  %v4022_v45 = vadd.f32 %v8990_v1, %v4002_v36  ;;  %v6701_v2 = vld [vmem:[#allocation14 + $0xa0] sm:$0xff]  }
 0xef0   :  { %4305 = vmatprep.mubr.bf16.mxu1 %v7410_v7  ;;  %4418 = vmatprep.mubr.bf16.mxu0 %v7410_v7  ;;  %v4021_v23 = vadd.f32 %v8990_v1, %v4001_v8 }
 0xef1   :  { %5986 = vmatprep.subr.bf16.mxu1 %v6686_v22  ;;  %6053 = vmatpush3.bf16.msra.mxu0 %v6693_v19  ;;  %v6704_v19 = vld [vmem:[#allocation14 + $0x28] sm:$0xff]  }
 0xef2   :  { %v4034_v10 = vpack.c.bf16 %v4022_v45, %v4021_v23  ;;  %5987 = vmatpush3.bf16.msra.mxu1 %v6688_v29  ;;  %6054 = vmatprep.subr.bf16.mxu0 %v6695_v41 }
 0xef3   :  { %5988 = vmatprep.subr.bf16.mxu1 %v6690_v48  ;;  %v6702_v48 = vld [vmem:[#allocation14 + $0x68] sm:$0xff]  }
 0xef5   :  { %6055 = vmatpush3.bf16.msra.mxu0 %v6697_v25  ;;  %v6706_v25 = vld [vmem:[#allocation14 + $0x70] sm:$0xff]  }
 0xef6   :  { %5989 = vmatpush3.bf16.msra.mxu1 %v6692_v0 }
 0xef7   :  { %4306 = vmatmul.mubr.bf16.gmra.mrb[104].mxu1 %v4033_v17  ;;  %4419 = vmatmul.mubr.bf16.gmra.mrb[104].mxu0 %v4033_v17  ;;  %v6699_v17 = vld [vmem:[#allocation14 + $0xe0] sm:$0xff]  }
 0xef8   :  { %4315 = vmatprep.mubr.bf16.mxu1 %v7410_v7  ;;  %4428 = vmatprep.mubr.bf16.mxu0 %v7410_v7 }
 0xef9   :  { %5990 = vmatprep.subr.bf16.mxu1 %v6694_v12  ;;  %6056 = vmatprep.subr.bf16.mxu0 %v6699_v17 }
 0xefa   :  { %5991 = vmatpush3.bf16.msra.mxu1 %v6696_v13  ;;  %6057 = vmatpush3.bf16.msra.mxu0 %v6701_v2 }
 0xefb   :  { %5992 = vmatprep.subr.bf16.mxu1 %v6698_v4  ;;  %6058 = vmatprep.subr.bf16.mxu0 %v6703_v24 }
 0xefe   :  { %5993 = vmatpush3.bf16.msra.mxu1 %v6700_v56 }
 0xeff   :  { %4316 = vmatmul.mubr.bf16.gmra.mrb[108].mxu1 %v4034_v10  ;;  %4429 = vmatmul.mubr.bf16.gmra.mrb[108].mxu0 %v4034_v10 }
 0xf00   :  { %4325 = vmatprep.mubr.bf16.mxu1 %v7410_v7  ;;  %4438 = vmatprep.mubr.bf16.mxu0 %v7410_v7 }
 0xf01   :  { %5994 = vmatprep.subr.bf16.mxu1 %v6702_v48 }
 0xf02   :  { %5995 = vmatpush3.bf16.msra.mxu1 %v6704_v19 }
 0xf03   :  { %5996 = vmatprep.subr.bf16.mxu1 %v6706_v25 }
 0xf51   :  { %v3912_v42 = vpop.xlane.xlu0 %3911 }
 0xf52   :  { %v3935_v50 = vmul.f32 0.0078125, %v3912_v42 }
 0xf53   :  { %v3914_v21 = vpop.xlane.xlu1 %3913 }
 0xf54   :  { %v3951_v5 = vadd.f32 1e-05, %v3935_v50  ;;  %v3936_v3 = vmul.f32 0.0078125, %v3914_v21  ;;  %v6705_v50 = vld [vmem:[#allocation14 + $0xa8] sm:$0xff]  }
 0xf55   :  { %v3916_v59 = vpop.xlane.xlu0 %3915  ;;  %6059 = vmatpush3.bf16.msra.mxu0 %v6705_v50 }
 0xf56   :  { %7018 = vrsqrt.f32 %v3951_v5  ;;  %v3952_v37 = vadd.f32 1e-05, %v3936_v3  ;;  %v3937_v44 = vmul.f32 0.0078125, %v3916_v59 }
 0xf57   :  { %v3918_v28 = vpop.xlane.xlu1 %3917 }
 0xf58   :  { %7020 = vrsqrt.f32 %v3952_v37  ;;  %v3953_v60 = vadd.f32 1e-05, %v3937_v44  ;;  %v3938_v62 = vmul.f32 0.0078125, %v3918_v28  ;;  %v6707_v37 = vld [vmem:[#allocation14 + $0xf0] sm:$0xff]  }
 0xf59   :  { %v3920_v49 = vpop.xlane.xlu0 %3919  ;;  %6060 = vmatprep.subr.bf16.mxu0 %v6707_v37 }
 0xf5a   :  { %7022 = vrsqrt.f32 %v3953_v60  ;;  %v3954_v57 = vadd.f32 1e-05, %v3938_v62  ;;  %v3939_v63 = vmul.f32 0.0078125, %v3920_v49 }
 0xf5b   :  { %v3922_v36 = vpop.xlane.xlu1 %3921 }
 0xf5c   :  { %7024 = vrsqrt.f32 %v3954_v57  ;;  %v3940_v8 = vmul.f32 0.0078125, %v3922_v36  ;;  %v3955_v45 = vadd.f32 1e-05, %v3939_v63  ;;  %v6708_v57 = vld [vmem:[#allocation14 + $0x30] sm:$0xff]   ;;  %v6710_v36 = vld [vmem:[#allocation14 + $0x78] sm:$0xff]  }
 0xf5d   :  { %v3924_v10 = vpop.xlane.xlu0 %3923  ;;  %v6709_v63 = vld [vmem:[#allocation14 + $0xb0] sm:$0xff]   ;;  %5997 = vmatpush3.bf16.msra.mxu1 %v6708_v57 }
 0xf5e   :  { %v3956_v23 = vadd.f32 1e-05, %v3940_v8  ;;  %v3941_v53 = vmul.f32 0.0078125, %v3924_v10  ;;  %6061 = vmatpush3.bf16.msra.mxu0 %v6709_v63  ;;  %v6711_v8 = vld [vmem:[#allocation14 + $0xf8] sm:$0xff]   ;;  %5998 = vmatprep.subr.bf16.mxu1 %v6710_v36 }
 0xf5f   :  { %v3926_v39 = vpop.xlane.xlu1 %3925  ;;  %v6712_v10 = vld [vmem:[#allocation14 + $0x38] sm:$0xff]   ;;  %6062 = vmatprep.subr.bf16.mxu0 %v6711_v8 }
 0xf60   :  { %v7019_v43 = vpop.eup %7018  ;;  %7026 = vrsqrt.f32 %v3956_v23  ;;  %v3942_v22 = vmul.f32 0.0078125, %v3926_v39  ;;  %v3957_v12 = vadd.f32 1e-05, %v3941_v53  ;;  %v6713_v39 = vld [vmem:[#allocation14 + $0xb8] sm:$0xff]  }
 0xf61   :  { %v3983_v47 = vmul.f32 %v7019_v43, %v8946_v54  ;;  %7028 = vrsqrt.f32 %v3955_v45  ;;  %5999 = vmatpush3.bf16.msra.mxu1 %v6712_v10 }
 0xf62   :  { %v7021_v29 = vpop.eup %7020  ;;  %v3958_v5 = vadd.f32 1e-05, %v3942_v22  ;;  %6063 = vmatpush3.bf16.msra.mxu0 %v6713_v39 }
 0xf63   :  { %v3984_v42 = vmul.f32 %v7021_v29, %v8949_v14  ;;  %v4003_v0 = vmul.f32 %v8985_v55, %v3983_v47 }
 0xf64   :  { %v7023_v21 = vpop.eup %7022  ;;  %7030 = vrsqrt.f32 %v3958_v5 }
 0xf65   :  { %v4004_v3 = vmul.f32 %v8985_v55, %v3984_v42  ;;  %v4023_v41 = vadd.f32 %v8990_v1, %v4003_v0  ;;  %v3985_v14 = vmul.f32 %v7023_v21, %v8954_v46  ;;  %7032 = vrsqrt.f32 %v3957_v12  ;;  %v4071_v21 = vld [vmem:[#allocation7] sm:$0xf] }
 0xf66   :  { %v7025_v54 = vpop.eup %7024  ;;  %v4073_v0 = vlaneseq }
 0xf67   :  { %v4024_v59 = vadd.f32 %v8990_v1, %v4004_v3  ;;  %v3986_v13 = vmul.f32 %v7025_v54, %v8959_v33  ;;  %v4005_v62 = vmul.f32 %v8985_v55, %v3985_v14 }
 0xf69   :  { %v4035_v44 = vpack.c.bf16 %v4024_v59, %v4023_v41  ;;  %v4006_v28 = vmul.f32 %v8985_v55, %v3986_v13  ;;  %v4025_v4 = vadd.f32 %v8990_v1, %v4005_v62 }
 0xf6a   :  { %v7027_v60 = vpop.eup %7026 }
 0xf6b   :  { %4326 = vmatmul.mubr.bf16.gmra.mrb[112].mxu1 %v4035_v44  ;;  %4439 = vmatmul.mubr.bf16.gmra.mrb[112].mxu0 %v4035_v44  ;;  %v7029_v49 = vpop.eup %7028  ;;  %v4026_v46 = vadd.f32 %v8990_v1, %v4006_v28  ;;  %v3988_v33 = vmul.f32 %v7027_v60, %v8969_v40 }
 0xf6c   :  { %4335 = vmatprep.mubr.bf16.mxu1 %v7410_v7  ;;  %4448 = vmatprep.mubr.bf16.mxu0 %v7410_v7  ;;  %v3987_v17 = vmul.f32 %v7029_v49, %v8964_v9 }
 0xf6d   :  { %v4036_v45 = vpack.c.bf16 %v4026_v46, %v4025_v4  ;;  %v4008_v23 = vmul.f32 %v8985_v55, %v3988_v33 }
 0xf6e   :  { %v7031_v56 = vpop.eup %7030  ;;  %v4007_v40 = vmul.f32 %v8985_v55, %v3987_v17 }
 0xf6f   :  { %v7033_v2 = vpop.eup %7032  ;;  %v4028_v9 = vadd.f32 %v8990_v1, %v4008_v23  ;;  %v3990_v43 = vmul.f32 %v7031_v56, %v8979_v30 }
 0xf70   :  { %v4027_v22 = vadd.f32 %v8990_v1, %v4007_v40  ;;  %v3989_v47 = vmul.f32 %v7033_v2, %v8974_v27  ;;  %v4074_v27 = vshrl.u32 %v4073_v0, 7 }
 0xf71   :  { %v4010_v53 = vmul.f32 %v8985_v55, %v3990_v43 }
 0xf72   :  { %v4037_v29 = vpack.c.bf16 %v4028_v9, %v4027_v22  ;;  %v4009_v48 = vmul.f32 %v8985_v55, %v3989_v47  ;;  %v4075_v19 = vsub.s32 0, %v4074_v27  ;;  %v4083_v50 = vsub.s32 2, %v4074_v27 }
 0xf73   :  { %4336 = vmatmul.mubr.bf16.gmra.mrb[116].mxu1 %v4036_v45  ;;  %4449 = vmatmul.mubr.bf16.gmra.mrb[116].mxu0 %v4036_v45  ;;  %v4030_v24 = vadd.f32 %v8990_v1, %v4010_v53  ;;  %v4079_v5 = vsub.s32 1, %v4074_v27  ;;  %v4087_v3 = vsub.s32 3, %v4074_v27 }
 0xf74   :  { %4345 = vmatprep.mubr.bf16.mxu1 %v7410_v7  ;;  %4458 = vmatprep.mubr.bf16.mxu0 %v7410_v7  ;;  %v4029_v30 = vadd.f32 %v8990_v1, %v4009_v48  ;;  %v9051_v54 = vrot.slane %v4071_v21, %v4075_v19  ;;  %v9053_v55 = vrot.slane %v4071_v21, %v4083_v50 }
 0xf75   :  { %v9055_v12 = vrot.slane %v4071_v21, %v4079_v5 }
 0xf76   :  { %v4038_v42 = vpack.c.bf16 %v4030_v24, %v4029_v30  ;;  %9916 = vst [vmem:[#allocation39_spill] sm:$0xff] %v9051_v54  ;;  %9917 = vst [vmem:[#allocation40_spill] sm:$0xff] %v9053_v55 }
 0xf77   :  { %9918 = vst [vmem:[#allocation41_spill] sm:$0xff] %v9055_v12 }
 0xf7b   :  { %4346 = vmatmul.mubr.bf16.gmra.mrb[120].mxu1 %v4037_v29  ;;  %4459 = vmatmul.mubr.bf16.gmra.mrb[120].mxu0 %v4037_v29 }
 0xf7c   :  { %4355 = vmatprep.mubr.bf16.mxu1 %v7410_v7  ;;  %4468 = vmatprep.mubr.bf16.mxu0 %v7410_v7  ;;  %v9057_v7 = vrot.slane %v4071_v21, %v4087_v3 }
 0xf7e   :  { %9919 = vst [vmem:[#allocation42_spill] sm:$0xff] %v9057_v7 }
 0xf83   :  { %4356 = vmatmul.mubr.bf16.gmra.mrb[124].mxu1 %v4038_v42  ;;  %4469 = vmatmul.mubr.bf16.gmra.mrb[124].mxu0 %v4038_v42 }
 0xfba   :  { %v4287_v41 = vpop.f32.mrb[96].mxu1  ;;  %v4400_v1 = vpop.f32.mrb[96].mxu0 }
 0xfbb   :  { %v4288_v59 = vadd.f32 %v4287_v41, %v9051_v54  ;;  %v4401_v14 = vadd.f32 %v4400_v1, %v9053_v55  ;;  %v4289_v13 = vpop.f32.mrb[97].mxu1  ;;  %v4402_v25 = vpop.f32.mrb[97].mxu0 }
 0xfbc   :  { %v9062_v37 = vadd.f32 %v4289_v13, %v9055_v12  ;;  %v9065_v44 = vadd.f32 %v4402_v25, %v9057_v7  ;;  %v4291_v28 = vpop.f32.mrb[98].mxu1  ;;  %v4404_v60 = vpop.f32.mrb[98].mxu0 }
 0xfbd   :  { %v9067_v62 = vmul.f32 0.5, %v4288_v59  ;;  %v4543_v49 = vmul.f32 %v4288_v59, %v4288_v59  ;;  %v9069_v46 = vmul.f32 0.5, %v4401_v14  ;;  %v4545_v33 = vmul.f32 %v4401_v14, %v4401_v14  ;;  %v4293_v57 = vpop.f32.mrb[99].mxu1  ;;  %v4406_v63 = vpop.f32.mrb[99].mxu0 }
 0xfbe   :  { %v4544_v4 = vmul.f32 %v9062_v37, %v9062_v37  ;;  %v4546_v17 = vmul.f32 %v9065_v44, %v9065_v44  ;;  %v4292_v36 = vadd.f32 %v4291_v28, %v9051_v54  ;;  %v4405_v8 = vadd.f32 %v4404_v60, %v9053_v55 }
 0xfbf   :  { %v4607_v45 = vmul.f32 %v4543_v49, %v4288_v59  ;;  %v4609_v23 = vmul.f32 %v4545_v33, %v4401_v14  ;;  %v9078_v10 = vadd.f32 %v4293_v57, %v9055_v12  ;;  %v9081_v39 = vadd.f32 %v4406_v63, %v9057_v7 }
 0xfc0   :  { %v4608_v56 = vmul.f32 %v4544_v4, %v9062_v37  ;;  %v4610_v40 = vmul.f32 %v4546_v17, %v9065_v44  ;;  %v9085_v2 = vmul.f32 0.5, %v4292_v36  ;;  %v4547_v9 = vmul.f32 %v4292_v36, %v4292_v36 }
 0xfc1   :  { %v4671_v43 = vmul.f32 0.044715, %v4607_v45  ;;  %v4673_v22 = vmul.f32 0.044715, %v4609_v23  ;;  %v9087_v47 = vmul.f32 0.5, %v4405_v8  ;;  %v4549_v29 = vmul.f32 %v4405_v8, %v4405_v8 }
 0xfc2   :  { %v4672_v53 = vmul.f32 0.044715, %v4608_v56  ;;  %v4674_v48 = vmul.f32 0.044715, %v4610_v40  ;;  %v4611_v24 = vmul.f32 %v4547_v9, %v4292_v36  ;;  %v4548_v30 = vmul.f32 %v9078_v10, %v9078_v10  ;;  %v4297_v42 = vpop.f32.mrb[100].mxu1  ;;  %v4410_v0 = vpop.f32.mrb[100].mxu0 }
 0xfc3   :  { %v4735_v27 = vadd.f32 %v4671_v43, %v4288_v59  ;;  %v4737_v19 = vadd.f32 %v4673_v22, %v4401_v14  ;;  %v4613_v50 = vmul.f32 %v4549_v29, %v4405_v8  ;;  %v4550_v21 = vmul.f32 %v9081_v39, %v9081_v39  ;;  %v4299_v5 = vpop.f32.mrb[101].mxu1  ;;  %v4412_v3 = vpop.f32.mrb[101].mxu0 }
 0xfc4   :  { %v4736_v41 = vadd.f32 %v4672_v53, %v9062_v37  ;;  %v4738_v1 = vadd.f32 %v4674_v48, %v9065_v44  ;;  %v4675_v13 = vmul.f32 0.044715, %v4611_v24  ;;  %v4612_v25 = vmul.f32 %v4548_v30, %v9078_v10  ;;  %v4301_v28 = vpop.f32.mrb[102].mxu1  ;;  %v4414_v60 = vpop.f32.mrb[102].mxu0 }
 0xfc5   :  { %v4799_v49 = vmul.f32 0.7978846, %v4735_v27  ;;  %v4801_v33 = vmul.f32 0.7978846, %v4737_v19  ;;  %v4677_v57 = vmul.f32 0.044715, %v4613_v50  ;;  %v4614_v59 = vmul.f32 %v4550_v21, %v9081_v39 }
 0xfc6   :  { %v4800_v14 = vmul.f32 0.7978846, %v4736_v41  ;;  %v4802_v63 = vmul.f32 0.7978846, %v4738_v1  ;;  %v4739_v4 = vadd.f32 %v4675_v13, %v4292_v36  ;;  %v4676_v17 = vmul.f32 0.044715, %v4612_v25 }
 0xfc7   :  { %7034 = vtanh.f32 %v4799_v49  ;;  %v4741_v45 = vadd.f32 %v4677_v57, %v4405_v8  ;;  %v4678_v23 = vmul.f32 0.044715, %v4614_v59  ;;  %v9098_v56 = vadd.f32 %v4297_v42, %v9051_v54  ;;  %v4303_v40 = vpop.f32.mrb[103].mxu1  ;;  %v4416_v9 = vpop.f32.mrb[103].mxu0 }
 0xfc8   :  { %7036 = vtanh.f32 %v4801_v33  ;;  %v4803_v43 = vmul.f32 0.7978846, %v4739_v4  ;;  %v4740_v22 = vadd.f32 %v4676_v17, %v9078_v10  ;;  %v9102_v29 = vadd.f32 %v4410_v0, %v9053_v55 }
 0xfc9   :  { %7038 = vtanh.f32 %v4800_v14  ;;  %v4805_v53 = vmul.f32 0.7978846, %v4741_v45  ;;  %v4742_v36 = vadd.f32 %v4678_v23, %v9081_v39  ;;  %v4551_v8 = vmul.f32 %v9098_v56, %v9098_v56 }
 0xfca   :  { %7040 = vtanh.f32 %v4802_v63  ;;  %v4804_v48 = vmul.f32 0.7978846, %v4740_v22  ;;  %v4553_v24 = vmul.f32 %v9102_v29, %v9102_v29  ;;  %v9110_v30 = vadd.f32 %v4299_v5, %v9055_v12  ;;  %v9112_v42 = vpop.f32.mrb[104].mxu1  ;;  %v9114_v27 = vpop.f32.mrb[104].mxu0 }
 0xfcb   :  { %7042 = vtanh.f32 %v4803_v43  ;;  %v4806_v0 = vmul.f32 0.7978846, %v4742_v36  ;;  %v4615_v19 = vmul.f32 %v4551_v8, %v9098_v56  ;;  %v9118_v50 = vadd.f32 %v4412_v3, %v9057_v7  ;;  %v9120_v21 = vpop.f32.mrb[105].mxu1  ;;  %v9122_v41 = vpop.f32.mrb[105].mxu0 }
 0xfcc   :  { %7044 = vtanh.f32 %v4805_v53  ;;  %v4617_v1 = vmul.f32 %v4553_v24, %v9102_v29  ;;  %v4552_v5 = vmul.f32 %v9110_v30, %v9110_v30  ;;  %v9128_v13 = vadd.f32 %v4301_v28, %v9051_v54  ;;  %v9130_v25 = vpop.f32.mrb[106].mxu1  ;;  %v9132_v49 = vpop.f32.mrb[106].mxu0 }
 0xfcd   :  { %7046 = vtanh.f32 %v4804_v48  ;;  %v4679_v3 = vmul.f32 0.044715, %v4615_v19  ;;  %v4554_v33 = vmul.f32 %v9118_v50, %v9118_v50  ;;  %v9137_v57 = vadd.f32 %v4414_v60, %v9053_v55  ;;  %v9139_v59 = vpop.f32.mrb[107].mxu1  ;;  %v9141_v14 = vpop.f32.mrb[107].mxu0 }
 0xfce   :  { %7048 = vtanh.f32 %v4806_v0  ;;  %v4681_v63 = vmul.f32 0.044715, %v4617_v1  ;;  %v4616_v28 = vmul.f32 %v4552_v5, %v9110_v30  ;;  %v4555_v4 = vmul.f32 %v9128_v13, %v9128_v13 }
 0xfcf   :  { %v4743_v17 = vadd.f32 %v4679_v3, %v9098_v56  ;;  %v4618_v45 = vmul.f32 %v4554_v33, %v9118_v50  ;;  %v4557_v23 = vmul.f32 %v9137_v57, %v9137_v57  ;;  %v9151_v60 = vadd.f32 %v4303_v40, %v9055_v12 }
 0xfd0   :  { %v4745_v43 = vadd.f32 %v4681_v63, %v9102_v29  ;;  %v4680_v22 = vmul.f32 0.044715, %v4616_v28  ;;  %v4619_v53 = vmul.f32 %v4555_v4, %v9128_v13  ;;  %v9156_v36 = vadd.f32 %v4416_v9, %v9057_v7 }
 0xfd1   :  { %v7035_v8 = vpop.eup %7034  ;;  %v4807_v48 = vmul.f32 0.7978846, %v4743_v17  ;;  %v4682_v24 = vmul.f32 0.044715, %v4618_v45  ;;  %v4621_v0 = vmul.f32 %v4557_v23, %v9137_v57  ;;  %v4556_v19 = vmul.f32 %v9151_v60, %v9151_v60 }
 0xfd2   :  { %v7037_v1 = vpop.eup %7036  ;;  %v4927_v5 = vadd.f32 1.0, %v7035_v8  ;;  %v4809_v40 = vmul.f32 0.7978846, %v4745_v43  ;;  %v4744_v3 = vadd.f32 %v4680_v22, %v9110_v30  ;;  %v4683_v33 = vmul.f32 0.044715, %v4619_v53  ;;  %v9162_v63 = vpop.f32.mrb[108].mxu1 }
 0xfd3   :  { %v9164_v28 = vpop.eup %7038  ;;  %v4929_v9 = vadd.f32 1.0, %v7037_v1  ;;  %7050 = vtanh.f32 %v4807_v48  ;;  %v4746_v4 = vadd.f32 %v4682_v24, %v9118_v50  ;;  %v4685_v17 = vmul.f32 0.044715, %v4621_v0  ;;  %v9167_v45 = vpop.f32.mrb[108].mxu0 }
 0xfd4   :  { %v9169_v23 = vpop.f32.mrb[109].mxu1  ;;  %v9171_v38 = vpop.eup %7040  ;;  %v9174_v43 = vmul.f32 %v4927_v5, %v9067_v62  ;;  %7052 = vtanh.f32 %v4809_v40  ;;  %v4808_v22 = vmul.f32 0.7978846, %v4744_v3  ;;  %v4747_v53 = vadd.f32 %v4683_v33, %v9128_v13 }
 0xfd5   :  { %v9177_v8 = vpop.f32.mrb[109].mxu0  ;;  %v9179_v1 = vpop.f32.mrb[110].mxu1  ;;  %v9182_v24 = vmul.f32 %v4929_v9, %v9069_v46  ;;  %v4810_v0 = vmul.f32 0.7978846, %v4746_v4  ;;  %v4749_v58 = vadd.f32 %v4685_v17, %v9137_v57  ;;  %v4620_v20 = vmul.f32 %v4556_v19, %v9151_v60 }
 0xfd6   :  { %v7043_v48 = vpop.eup %7042  ;;  %v9186_v18 = vpop.f32.mrb[110].mxu0  ;;  %7054 = vtanh.f32 %v4808_v22  ;;  %v4811_v3 = vmul.f32 0.7978846, %v4747_v53  ;;  %v4558_v33 = vmul.f32 %v9156_v36, %v9156_v36  ;;  %v9204_v53 = vadd.f32 %v9112_v42, %v9051_v54 }
 0xfd7   :  { %v9188_v62 = vpop.f32.mrb[111].mxu1  ;;  %v7045_v5 = vpop.eup %7044  ;;  %v4931_v40 = vadd.f32 1.0, %v7043_v48  ;;  %7056 = vtanh.f32 %v4810_v0  ;;  %v4813_v4 = vmul.f32 0.7978846, %v4749_v58  ;;  %v4684_v17 = vmul.f32 0.044715, %v4620_v20 }
 0xfd8   :  { %v9192_v32 = vpop.f32.mrb[111].mxu0  ;;  %v9194_v46 = vpop.eup %7046  ;;  %v4933_v9 = vadd.f32 1.0, %v7045_v5  ;;  %7058 = vtanh.f32 %v4811_v3  ;;  %v4622_v22 = vmul.f32 %v4558_v33, %v9156_v36  ;;  %v9212_v20 = vadd.f32 %v9114_v27, %v9053_v55 }
 0xfd9   :  { %v9196_v19 = vpop.eup %7048  ;;  %v9199_v31 = vmul.f32 %v4931_v40, %v9085_v2  ;;  %7060 = vtanh.f32 %v4813_v4  ;;  %v4748_v0 = vadd.f32 %v4684_v17, %v9151_v60  ;;  %v4559_v2 = vmul.f32 %v9204_v53, %v9204_v53 }
 0xfda   :  { %v9207_v48 = vmul.f32 %v4933_v9, %v9087_v47  ;;  %v4686_v58 = vmul.f32 0.044715, %v4622_v22  ;;  %v9218_v5 = vadd.f32 %v9120_v21, %v9055_v12  ;;  %v9222_v42 = vadd.f32 %v9122_v41, %v9057_v7 }
 0xfdb   :  { %v4812_v47 = vmul.f32 0.7978846, %v4748_v0  ;;  %v4561_v40 = vmul.f32 %v9212_v20, %v9212_v20  ;;  %v9228_v27 = vadd.f32 %v9130_v25, %v9051_v54  ;;  %v9232_v3 = vadd.f32 %v9132_v49, %v9053_v55 }
 0xfdc   :  { %v4750_v33 = vadd.f32 %v4686_v58, %v9156_v36  ;;  %v4623_v21 = vmul.f32 %v4559_v2, %v9204_v53  ;;  %v4560_v41 = vmul.f32 %v9218_v5, %v9218_v5  ;;  %v4562_v9 = vmul.f32 %v9222_v42, %v9222_v42 }
 0xfdd   :  { %v9240_v4 = vpop.eup %7050  ;;  %7062 = vtanh.f32 %v4812_v47  ;;  %v4625_v25 = vmul.f32 %v4561_v40, %v9212_v20  ;;  %v4563_v17 = vmul.f32 %v9228_v27, %v9228_v27  ;;  %v4565_v49 = vmul.f32 %v9232_v3, %v9232_v3 }
 0xfde   :  { %v9247_v22 = vpop.eup %7052  ;;  %v4814_v0 = vmul.f32 0.7978846, %v4750_v33  ;;  %v4687_v58 = vmul.f32 0.044715, %v4623_v21  ;;  %v4624_v2 = vmul.f32 %v4560_v41, %v9218_v5  ;;  %v4626_v11 = vmul.f32 %v4562_v9, %v9222_v42 }
 0xfdf   :  { %v4689_v26 = vmul.f32 0.044715, %v4625_v25  ;;  %v4627_v34 = vmul.f32 %v4563_v17, %v9228_v27  ;;  %v4629_v47 = vmul.f32 %v4565_v49, %v9232_v3  ;;  %v9255_v40 = vadd.f32 %v9139_v59, %v9055_v12 }
 0xfe0   :  { %v9257_v52 = vpop.eup %7054  ;;  %7064 = vtanh.f32 %v4814_v0  ;;  %v4751_v16 = vadd.f32 %v4687_v58, %v9204_v53  ;;  %v4688_v33 = vmul.f32 0.044715, %v4624_v2  ;;  %v4690_v21 = vmul.f32 0.044715, %v4626_v11 }
 0xfe1   :  { %v9260_v35 = vpop.eup %7056  ;;  %v4753_v41 = vadd.f32 %v4689_v26, %v9212_v20  ;;  %v4691_v9 = vmul.f32 0.044715, %v4627_v34  ;;  %v4693_v25 = vmul.f32 0.044715, %v4629_v47  ;;  %v4564_v17 = vmul.f32 %v9255_v40, %v9255_v40 }
 0xfe2   :  { %v9265_v49 = vpop.eup %7058  ;;  %v4815_v59 = vmul.f32 0.7978846, %v4751_v16  ;;  %v4752_v61 = vadd.f32 %v4688_v33, %v9218_v5  ;;  %v4754_v0 = vadd.f32 %v4690_v21, %v9222_v42  ;;  %v9271_v58 = vadd.f32 %v9141_v14, %v9057_v7 }
 0xfe3   :  { %v9273_v11 = vpop.eup %7060  ;;  %v4817_v2 = vmul.f32 0.7978846, %v4753_v41  ;;  %v4755_v34 = vadd.f32 %v4691_v9, %v9228_v27  ;;  %v4757_v26 = vadd.f32 %v4693_v25, %v9232_v3  ;;  %v4628_v47 = vmul.f32 %v4564_v17, %v9255_v40 }
 0xfe4   :  { %7066 = vtanh.f32 %v4815_v59  ;;  %v4816_v15 = vmul.f32 0.7978846, %v4752_v61  ;;  %v4818_v16 = vmul.f32 0.7978846, %v4754_v0  ;;  %v4566_v33 = vmul.f32 %v9271_v58, %v9271_v58 }
 0xfe5   :  { %7068 = vtanh.f32 %v4817_v2  ;;  %v4819_v21 = vmul.f32 0.7978846, %v4755_v34  ;;  %v4821_v51 = vmul.f32 0.7978846, %v4757_v26  ;;  %v4692_v14 = vmul.f32 0.044715, %v4628_v47 }
 0xfe6   :  { %7070 = vtanh.f32 %v4816_v15  ;;  %v4630_v6 = vmul.f32 %v4566_v33, %v9271_v58  ;;  %v9283_v41 = vadd.f32 %v9162_v63, %v9051_v54  ;;  %v9287_v9 = vadd.f32 %v9167_v45, %v9053_v55 }
 0xfe7   :  { %v9289_v61 = vpop.eup %7062  ;;  %7072 = vtanh.f32 %v4818_v16  ;;  %v4756_v25 = vadd.f32 %v4692_v14, %v9255_v40  ;;  %v9294_v17 = vadd.f32 %v9169_v23, %v9055_v12  ;;  %v9298_v15 = vadd.f32 %v9177_v8, %v9057_v7 }
 0xfe8   :  { %9920 = vst [vmem:[#allocation43_spill] sm:$0xff] %v9283_v41  ;;  %9921 = vst [vmem:[#allocation44_spill] sm:$0xff] %v9287_v9  ;;  %7074 = vtanh.f32 %v4819_v21  ;;  %v4694_v63 = vmul.f32 0.044715, %v4630_v6  ;;  %v4567_v59 = vmul.f32 %v9283_v41, %v9283_v41  ;;  %v4569_v45 = vmul.f32 %v9287_v9, %v9287_v9 }
 0xfe9   :  { %7076 = vtanh.f32 %v4821_v51  ;;  %v4820_v0 = vmul.f32 0.7978846, %v4756_v25  ;;  %v4568_v2 = vmul.f32 %v9294_v17, %v9294_v17  ;;  %v4570_v23 = vmul.f32 %v9298_v15, %v9298_v15 }
 0xfea   :  { %v9308_v34 = vpop.eup %7064  ;;  %v4758_v8 = vadd.f32 %v4694_v63, %v9271_v58  ;;  %v4631_v6 = vmul.f32 %v4567_v59, %v9283_v41  ;;  %v4633_v26 = vmul.f32 %v4569_v45, %v9287_v9  ;;  %v9315_v47 = vadd.f32 %v9179_v1, %v9051_v54 }
 0xfeb   :  { %7078 = vtanh.f32 %v4820_v0  ;;  %v4632_v51 = vmul.f32 %v4568_v2, %v9294_v17  ;;  %v4634_v16 = vmul.f32 %v4570_v23, %v9298_v15  ;;  %v9321_v33 = vadd.f32 %v9186_v18, %v9053_v55 }
 0xfec   :  { %9922 = vst [vmem:[#allocation45_spill] sm:$0xff] %v9315_v47  ;;  %v4822_v21 = vmul.f32 0.7978846, %v4758_v8  ;;  %v4695_v14 = vmul.f32 0.044715, %v4631_v6  ;;  %v4571_v63 = vmul.f32 %v9315_v47, %v9315_v47  ;;  %v9329_v0 = vadd.f32 %v9188_v62, %v9055_v12 }
 0xfed   :  { %v4697_v25 = vmul.f32 0.044715, %v4633_v26  ;;  %v4696_v59 = vmul.f32 0.044715, %v4632_v51  ;;  %v4698_v45 = vmul.f32 0.044715, %v4634_v16  ;;  %v4573_v1 = vmul.f32 %v9321_v33, %v9321_v33 }
 0xfee   :  { %v9331_v2 = vpop.eup %7066  ;;  %7080 = vtanh.f32 %v4822_v21  ;;  %v4759_v18 = vadd.f32 %v4695_v14, %v9283_v41  ;;  %v4635_v8 = vmul.f32 %v4571_v63, %v9315_v47  ;;  %v4572_v62 = vmul.f32 %v9329_v0, %v9329_v0 }
 0xfef   :  { %v4761_v23 = vadd.f32 %v4697_v25, %v9287_v9  ;;  %v9336_v6 = vpop.eup %7068  ;;  %v4760_v26 = vadd.f32 %v4696_v59, %v9294_v17  ;;  %v4762_v51 = vadd.f32 %v4698_v45, %v9298_v15  ;;  %v4637_v16 = vmul.f32 %v4573_v1, %v9321_v33 }
 0xff0   :  { %v9343_v12 = vpop.eup %7070  ;;  %v4823_v21 = vmul.f32 0.7978846, %v4759_v18  ;;  %v4699_v14 = vmul.f32 0.044715, %v4635_v8  ;;  %v9347_v25 = vadd.f32 %v9192_v32, %v9057_v7  ;;  %v4636_v45 = vmul.f32 %v4572_v62, %v9329_v0 }
 0xff1   :  { %v4825_v55 = vmul.f32 0.7978846, %v4761_v23  ;;  %v9349_v63 = vpop.eup %7072  ;;  %v4824_v54 = vmul.f32 0.7978846, %v4760_v26  ;;  %v4826_v59 = vmul.f32 0.7978846, %v4762_v51 }
 0xff2   :  { %v4701_v9 = vmul.f32 0.044715, %v4637_v16  ;;  %v9352_v1 = vpop.eup %7074  ;;  %7082 = vtanh.f32 %v4823_v21  ;;  %v4763_v41 = vadd.f32 %v4699_v14, %v9315_v47  ;;  %v4574_v18 = vmul.f32 %v9347_v25, %v9347_v25 }
 0xff3   :  { %v4480_v23 = vmul.f32 0.5, %v9062_v37  ;;  %v9358_v8 = vpop.eup %7076  ;;  %7084 = vtanh.f32 %v4825_v55  ;;  %v4700_v26 = vmul.f32 0.044715, %v4636_v45  ;;  %v4484_v51 = vmul.f32 0.5, %v9078_v10 }
 0xff4   :  { %v4765_v32 = vadd.f32 %v4701_v9, %v9321_v33  ;;  %7086 = vtanh.f32 %v4824_v54  ;;  %v4827_v16 = vmul.f32 0.7978846, %v4763_v41  ;;  %v4638_v62 = vmul.f32 %v4574_v18, %v9347_v25 }
 0xff5   :  { %v4928_v21 = vadd.f32 1.0, %v9164_v28  ;;  %v9364_v14 = vpop.eup %7078  ;;  %7088 = vtanh.f32 %v4826_v59  ;;  %v4764_v37 = vadd.f32 %v4700_v26, %v9329_v0  ;;  %v4932_v47 = vadd.f32 1.0, %v9194_v46 }
 0xff6   :  { %v4829_v7 = vmul.f32 0.7978846, %v4765_v32  ;;  %7090 = vtanh.f32 %v4827_v16  ;;  %v4702_v55 = vmul.f32 0.044715, %v4638_v62  ;;  %v4482_v45 = vmul.f32 0.5, %v9065_v44 }
 0xff7   :  { %v4992_v9 = vmul.f32 %v4928_v21, %v4480_v23  ;;  %v4828_v54 = vmul.f32 0.7978846, %v4764_v37  ;;  %v4996_v10 = vmul.f32 %v4932_v47, %v4484_v51  ;;  %v4486_v41 = vmul.f32 0.5, %v9081_v39 }
 0xff8   :  { %7092 = vtanh.f32 %v4829_v7  ;;  %v7081_v18 = vpop.eup %7080  ;;  %v4766_v28 = vadd.f32 %v4702_v55, %v9347_v25  ;;  %v4930_v59 = vadd.f32 1.0, %v9171_v38  ;;  %v4934_v32 = vadd.f32 1.0, %v9196_v19 }
 0xff9   :  { %v5055_v46 = vpack.c.bf16 %v9199_v31, %v9174_v43  ;;  %7094 = vtanh.f32 %v4828_v54  ;;  %v5056_v26 = vpack.c.bf16 %v4996_v10, %v4992_v9  ;;  %v5057_v44 = vpack.c.bf16 %v9207_v48, %v9182_v24 }
 0xffa   :  { %v4488_v7 = vmul.f32 0.5, %v9110_v30  ;;  %v4830_v47 = vmul.f32 0.7978846, %v4766_v28  ;;  %v4994_v23 = vmul.f32 %v4930_v59, %v4482_v45  ;;  %v4998_v39 = vmul.f32 %v4934_v32, %v4486_v41 }
 0xffb   :  { %v4492_v51 = vmul.f32 0.5, %v9151_v60  ;;  %5379 = vmatprep.mubr.bf16.mxu1 %v5056_v26  ;;  %v4936_v38 = vadd.f32 1.0, %v9257_v52  ;;  %v4940_v19 = vadd.f32 1.0, %v9289_v61  ;;  %v4490_v16 = vmul.f32 0.5, %v9118_v50 }
 0xffc   :  { %v4494_v31 = vmul.f32 0.5, %v9156_v36  ;;  %v9383_v43 = vpop.eup %7082  ;;  %7096 = vtanh.f32 %v4830_v47  ;;  %v5058_v24 = vpack.c.bf16 %v4998_v39, %v4994_v23  ;;  %5380 = vmatmul.mubr.bf16.vlgmr.msra.gmra.mrb[128].mxu1 %v5055_v46  ;;  %v4938_v30 = vadd.f32 1.0, %v9260_v35 }
 0xffd   :  { %v4942_v48 = vadd.f32 1.0, %v9308_v34  ;;  %v9387_v62 = vpop.eup %7084  ;;  %v5000_v60 = vmul.f32 %v4936_v38, %v4488_v7  ;;  %v5004_v21 = vmul.f32 %v4940_v19, %v4492_v51  ;;  %v4487_v52 = vmul.f32 0.5, %v9098_v56 }
 0xffe   :  { %v4491_v61 = vmul.f32 0.5, %v9128_v13  ;;  %v7087_v50 = vpop.eup %7086  ;;  %5476 = vmatprep.mubr.bf16.mxu0 %v5058_v24  ;;  %v5002_v36 = vmul.f32 %v4938_v30, %v4490_v16  ;;  %v4935_v55 = vadd.f32 1.0, %v9240_v4  ;;  %v4939_v9 = vadd.f32 1.0, %v9265_v49 }
 0xfff   :  { %v5006_v37 = vmul.f32 %v4942_v48, %v4494_v31  ;;  %v7089_v45 = vpop.eup %7088  ;;  %5477 = vmatmul.mubr.bf16.vlgmr.msra.gmra.mrb[128].mxu0 %v5057_v44  ;;  %v5060_v35 = vpack.c.bf16 %v5004_v21, %v5000_v60  ;;  %v4489_v34 = vmul.f32 0.5, %v9102_v29  ;;  %v4493_v54 = vmul.f32 0.5, %v9137_v57 }
0x1000   :  { %v4937_v10 = vadd.f32 1.0, %v9247_v22  ;;  %v7091_v56 = vpop.eup %7090  ;;  %v4999_v13 = vmul.f32 %v4935_v55, %v4487_v52  ;;  %v5003_v28 = vmul.f32 %v4939_v9, %v4491_v61  ;;  %v4941_v59 = vadd.f32 1.0, %v9273_v11  ;;  %v9923_v9 = vld [vmem:[#allocation43_spill] sm:$0xff] }
0x1001   :  { %v5062_v41 = vpack.c.bf16 %v5006_v37, %v5002_v36  ;;  %5387 = vmatprep.mubr.bf16.mxu1 %v5060_v35  ;;  %v4496_v49 = vmul.f32 0.5, %v9218_v5  ;;  %v4500_v46 = vmul.f32 0.5, %v9255_v40  ;;  %v4944_v29 = vadd.f32 1.0, %v9343_v12 }
0x1002   :  { %v9397_v32 = vpop.eup %7092  ;;  %v5001_v4 = vmul.f32 %v4937_v10, %v4489_v34  ;;  %v5059_v57 = vpack.c.bf16 %v5003_v28, %v4999_v13  ;;  %v5005_v26 = vmul.f32 %v4941_v59, %v4493_v54  ;;  %v4948_v22 = vadd.f32 1.0, %v9364_v14  ;;  %v9924_v34 = vld [vmem:[#allocation45_spill] sm:$0xff]  ;;  %v9925_v13 = vld [vmem:[#allocation44_spill] sm:$0xff] }
0x1003   :  { %5484 = vmatprep.mubr.bf16.mxu0 %v5062_v41  ;;  %v4498_v44 = vmul.f32 0.5, %v9222_v42  ;;  %v7095_v7 = vpop.eup %7094  ;;  %v5008_v47 = vmul.f32 %v4944_v29, %v4496_v49  ;;  %v4502_v11 = vmul.f32 0.5, %v9271_v58  ;;  %v4946_v23 = vadd.f32 1.0, %v9349_v63 }
0x1004   :  { %v4950_v39 = vadd.f32 1.0, %v7081_v18  ;;  %5388 = vmatmul.mubr.bf16.gmra.mrb[132].mxu1 %v5059_v57  ;;  %v5061_v5 = vpack.c.bf16 %v5005_v26, %v5001_v4  ;;  %v5012_v51 = vmul.f32 %v4948_v22, %v4500_v46  ;;  %v4495_v40 = vmul.f32 0.5, %v9204_v53  ;;  %v9926_v22 = vld [vmem:[#allocation39_spill] sm:$0xff] }
0x1005   :  { %v4499_v12 = vmul.f32 0.5, %v9228_v27  ;;  %v5010_v38 = vmul.f32 %v4946_v23, %v4498_v44  ;;  %v4943_v14 = vadd.f32 1.0, %v9331_v2  ;;  %v4947_v42 = vadd.f32 1.0, %v9352_v1  ;;  %v9929_v23 = vld [vmem:[#allocation42_spill] sm:$0xff] }
0x1006   :  { %v5014_v19 = vmul.f32 %v4950_v39, %v4502_v11  ;;  %v7097_v16 = vpop.eup %7096  ;;  %v5064_v31 = vpack.c.bf16 %v5012_v51, %v5008_v47  ;;  %v4497_v58 = vmul.f32 0.5, %v9212_v20  ;;  %v4501_v63 = vmul.f32 0.5, %v9232_v3 }
0x1007   :  { %v4945_v18 = vadd.f32 1.0, %v9336_v6  ;;  %5485 = vmatmul.mubr.bf16.gmra.mrb[132].mxu0 %v5061_v5  ;;  %v5007_v30 = vmul.f32 %v4943_v14, %v4495_v40  ;;  %v5011_v53 = vmul.f32 %v4947_v42, %v4499_v12  ;;  %v4949_v27 = vadd.f32 1.0, %v9358_v8 }
0x1008   :  { %v5066_v24 = vpack.c.bf16 %v5014_v19, %v5010_v38  ;;  %5395 = vmatprep.mubr.bf16.mxu1 %v5064_v31  ;;  %v4504_v2 = vmul.f32 0.5, %v9294_v17  ;;  %v4508_v1 = vmul.f32 0.5, %v9329_v0  ;;  %v4952_v60 = vadd.f32 1.0, %v7087_v50 }
0x1009   :  { %v5009_v48 = vmul.f32 %v4945_v18, %v4497_v58  ;;  %v5063_v21 = vpack.c.bf16 %v5011_v53, %v5007_v30  ;;  %v5013_v20 = vmul.f32 %v4949_v27, %v4501_v63  ;;  %v4956_v52 = vadd.f32 1.0, %v7095_v7 }
0x100a   :  { %5492 = vmatprep.mubr.bf16.mxu0 %v5066_v24  ;;  %v4506_v3 = vmul.f32 0.5, %v9298_v15  ;;  %v5016_v6 = vmul.f32 %v4952_v60, %v4504_v2  ;;  %v4510_v61 = vmul.f32 0.5, %v9347_v25  ;;  %v4954_v36 = vadd.f32 1.0, %v7089_v45 }
0x100b   :  { %v4958_v37 = vadd.f32 1.0, %v7097_v16  ;;  %v5065_v55 = vpack.c.bf16 %v5013_v20, %v5009_v48  ;;  %v5020_v8 = vmul.f32 %v4956_v52, %v4508_v1  ;;  %v4503_v35 = vmul.f32 0.5, %v9923_v9 }
0x100c   :  { %v4507_v17 = vmul.f32 0.5, %v9924_v34  ;;  %5396 = vmatmul.mubr.bf16.gmra.mrb[136].mxu1 %v5063_v21  ;;  %v5018_v0 = vmul.f32 %v4954_v36, %v4506_v3  ;;  %v4951_v54 = vadd.f32 1.0, %v9383_v43  ;;  %v4955_v10 = vadd.f32 1.0, %v7091_v56 }
0x100d   :  { %v5022_v50 = vmul.f32 %v4958_v37, %v4510_v61  ;;  %v5068_v41 = vpack.c.bf16 %v5020_v8, %v5016_v6  ;;  %v4505_v15 = vmul.f32 0.5, %v9925_v13  ;;  %v4509_v28 = vmul.f32 0.5, %v9321_v33 }
0x100e   :  { %v4953_v25 = vadd.f32 1.0, %v9387_v62  ;;  %v5015_v59 = vmul.f32 %v4951_v54, %v4503_v35  ;;  %v5019_v4 = vmul.f32 %v4955_v10, %v4507_v17  ;;  %v4957_v49 = vadd.f32 1.0, %v9397_v32  ;;  %v9927_v62 = vld [vmem:[#allocation40_spill] sm:$0xff]  ;;  %v9928_v32 = vld [vmem:[#allocation41_spill] sm:$0xff] }
0x100f   :  { %v5070_v45 = vpack.c.bf16 %v5022_v50, %v5018_v0  ;;  %5493 = vmatmul.mubr.bf16.gmra.mrb[136].mxu0 %v5065_v55  ;;  %5403 = vmatprep.mubr.bf16.mxu1 %v5068_v41 }
0x1010   :  { %v5067_v46 = vpack.c.bf16 %v5019_v4, %v5015_v59  ;;  %v5017_v29 = vmul.f32 %v4953_v25, %v4505_v15  ;;  %v5021_v57 = vmul.f32 %v4957_v49, %v4509_v28 }
0x1011   :  { %5500 = vmatprep.mubr.bf16.mxu0 %v5070_v45 }
0x1012   :  { %v5069_v43 = vpack.c.bf16 %v5021_v57, %v5017_v29 }
0x1014   :  { %5404 = vmatmul.mubr.bf16.gmra.mrb[140].mxu1 %v5067_v46 }
0x1017   :  { %5501 = vmatmul.mubr.bf16.gmra.mrb[140].mxu0 %v5069_v43 }
0x103e   :  { %v4327_v56 = vpop.f32.mrb[112].mxu1  ;;  %v4440_v26 = vpop.f32.mrb[112].mxu0 }
0x103f   :  { %v9426_v33 = vadd.f32 %v4327_v56, %v9926_v22  ;;  %v9429_v44 = vadd.f32 %v4440_v26, %v9927_v62  ;;  %v4329_v7 = vpop.f32.mrb[113].mxu1  ;;  %v4442_v47 = vpop.f32.mrb[113].mxu0 }
0x1040   :  { %v9432_v11 = vadd.f32 %v4329_v7, %v9928_v32  ;;  %v9435_v39 = vadd.f32 %v4442_v47, %v9929_v23  ;;  %v4331_v5 = vpop.f32.mrb[114].mxu1  ;;  %v4444_v51 = vpop.f32.mrb[114].mxu0 }
0x1041   :  { %v4575_v40 = vmul.f32 %v9426_v33, %v9426_v33  ;;  %v4577_v12 = vmul.f32 %v9429_v44, %v9429_v44  ;;  %v9442_v38 = vadd.f32 %v4331_v5, %v9926_v22  ;;  %v9445_v19 = vadd.f32 %v4444_v51, %v9927_v62  ;;  %v4333_v14 = vpop.f32.mrb[115].mxu1  ;;  %v4446_v42 = vpop.f32.mrb[115].mxu0 }
0x1042   :  { %v4576_v16 = vmul.f32 %v9432_v11, %v9432_v11  ;;  %v4578_v31 = vmul.f32 %v9435_v39, %v9435_v39  ;;  %v9452_v58 = vadd.f32 %v4333_v14, %v9928_v32  ;;  %v9455_v63 = vadd.f32 %v4446_v42, %v9929_v23 }
0x1043   :  { %v4639_v18 = vmul.f32 %v4575_v40, %v9426_v33  ;;  %v4641_v24 = vmul.f32 %v4577_v12, %v9429_v44  ;;  %v4579_v30 = vmul.f32 %v9442_v38, %v9442_v38  ;;  %v4581_v53 = vmul.f32 %v9445_v19, %v9445_v19 }
0x1044   :  { %v4640_v27 = vmul.f32 %v4576_v16, %v9432_v11  ;;  %v4642_v48 = vmul.f32 %v4578_v31, %v9435_v39  ;;  %v4580_v2 = vmul.f32 %v9452_v58, %v9452_v58  ;;  %v4582_v1 = vmul.f32 %v9455_v63, %v9455_v63 }
0x1045   :  { %v4703_v60 = vmul.f32 0.044715, %v4639_v18  ;;  %v4705_v21 = vmul.f32 0.044715, %v4641_v24  ;;  %v4643_v20 = vmul.f32 %v4579_v30, %v9442_v38  ;;  %v4645_v52 = vmul.f32 %v4581_v53, %v9445_v19 }
0x1046   :  { %v4704_v3 = vmul.f32 0.044715, %v4640_v27  ;;  %v4706_v6 = vmul.f32 0.044715, %v4642_v48  ;;  %v4644_v61 = vmul.f32 %v4580_v2, %v9452_v58  ;;  %v4646_v36 = vmul.f32 %v4582_v1, %v9455_v63  ;;  %v4337_v37 = vpop.f32.mrb[116].mxu1  ;;  %v4450_v55 = vpop.f32.mrb[116].mxu0 }
0x1047   :  { %v4767_v8 = vadd.f32 %v4703_v60, %v9426_v33  ;;  %v4769_v9 = vadd.f32 %v4705_v21, %v9429_v44  ;;  %v4707_v35 = vmul.f32 0.044715, %v4643_v20  ;;  %v4709_v34 = vmul.f32 0.044715, %v4645_v52  ;;  %v4339_v17 = vpop.f32.mrb[117].mxu1  ;;  %v4452_v0 = vpop.f32.mrb[117].mxu0 }
0x1048   :  { %v4768_v50 = vadd.f32 %v4704_v3, %v9432_v11  ;;  %v4770_v54 = vadd.f32 %v4706_v6, %v9435_v39  ;;  %v4708_v10 = vmul.f32 0.044715, %v4644_v61  ;;  %v4710_v41 = vmul.f32 0.044715, %v4646_v36  ;;  %v4341_v13 = vpop.f32.mrb[118].mxu1  ;;  %v4454_v15 = vpop.f32.mrb[118].mxu0 }
0x1049   :  { %v4831_v28 = vmul.f32 0.7978846, %v4767_v8  ;;  %v4833_v25 = vmul.f32 0.7978846, %v4769_v9  ;;  %v4771_v45 = vadd.f32 %v4707_v35, %v9442_v38  ;;  %v4773_v59 = vadd.f32 %v4709_v34, %v9445_v19  ;;  %v4343_v4 = vpop.f32.mrb[119].mxu1  ;;  %v4456_v49 = vpop.f32.mrb[119].mxu0 }
0x104a   :  { %v4832_v46 = vmul.f32 0.7978846, %v4768_v50  ;;  %v4834_v29 = vmul.f32 0.7978846, %v4770_v54  ;;  %v4772_v57 = vadd.f32 %v4708_v10, %v9452_v58  ;;  %v4774_v43 = vadd.f32 %v4710_v41, %v9455_v63 }
0x104b   :  { %7098 = vtanh.f32 %v4831_v28  ;;  %v4835_v56 = vmul.f32 0.7978846, %v4771_v45  ;;  %v4837_v26 = vmul.f32 0.7978846, %v4773_v59  ;;  %v9482_v7 = vadd.f32 %v4337_v37, %v9926_v22 }
0x104c   :  { %7100 = vtanh.f32 %v4833_v25  ;;  %v4836_v47 = vmul.f32 0.7978846, %v4772_v57  ;;  %v4838_v5 = vmul.f32 0.7978846, %v4774_v43  ;;  %v9485_v51 = vadd.f32 %v4450_v55, %v9927_v62 }
0x104d   :  { %7102 = vtanh.f32 %v4832_v46  ;;  %v4583_v40 = vmul.f32 %v9482_v7, %v9482_v7  ;;  %v9490_v12 = vadd.f32 %v4339_v17, %v9928_v32  ;;  %v9493_v14 = vadd.f32 %v4452_v0, %v9929_v23 }
0x104e   :  { %7104 = vtanh.f32 %v4834_v29  ;;  %v4585_v42 = vmul.f32 %v9485_v51, %v9485_v51  ;;  %v9498_v16 = vadd.f32 %v4341_v13, %v9926_v22  ;;  %v9501_v31 = vadd.f32 %v4454_v15, %v9927_v62  ;;  %v4347_v18 = vpop.f32.mrb[120].mxu1  ;;  %v4460_v24 = vpop.f32.mrb[120].mxu0 }
0x104f   :  { %7106 = vtanh.f32 %v4835_v56  ;;  %v4647_v30 = vmul.f32 %v4583_v40, %v9482_v7  ;;  %v4584_v53 = vmul.f32 %v9490_v12, %v9490_v12  ;;  %v4586_v27 = vmul.f32 %v9493_v14, %v9493_v14  ;;  %v4349_v48 = vpop.f32.mrb[121].mxu1  ;;  %v4462_v2 = vpop.f32.mrb[121].mxu0 }
0x1050   :  { %7108 = vtanh.f32 %v4837_v26  ;;  %v4649_v1 = vmul.f32 %v4585_v42, %v9485_v51  ;;  %v4587_v60 = vmul.f32 %v9498_v16, %v9498_v16  ;;  %v4589_v21 = vmul.f32 %v9501_v31, %v9501_v31  ;;  %v9513_v20 = vpop.f32.mrb[122].mxu1  ;;  %v9515_v52 = vpop.f32.mrb[122].mxu0 }
0x1051   :  { %7110 = vtanh.f32 %v4836_v47  ;;  %v4711_v3 = vmul.f32 0.044715, %v4647_v30  ;;  %v4648_v6 = vmul.f32 %v4584_v53, %v9490_v12  ;;  %v4650_v61 = vmul.f32 %v4586_v27, %v9493_v14  ;;  %v9519_v36 = vpop.f32.mrb[123].mxu1  ;;  %v9521_v37 = vpop.f32.mrb[123].mxu0 }
0x1052   :  { %7112 = vtanh.f32 %v4838_v5  ;;  %v4713_v55 = vmul.f32 0.044715, %v4649_v1  ;;  %v4651_v8 = vmul.f32 %v4587_v60, %v9498_v16  ;;  %v4653_v9 = vmul.f32 %v4589_v21, %v9501_v31 }
0x1053   :  { %v4775_v35 = vadd.f32 %v4711_v3, %v9482_v7  ;;  %v4712_v34 = vmul.f32 0.044715, %v4648_v6  ;;  %v4714_v17 = vmul.f32 0.044715, %v4650_v61  ;;  %v9527_v0 = vadd.f32 %v4343_v4, %v9928_v32 }
0x1054   :  { %v4777_v50 = vadd.f32 %v4713_v55, %v9485_v51  ;;  %v4715_v54 = vmul.f32 0.044715, %v4651_v8  ;;  %v4717_v10 = vmul.f32 0.044715, %v4653_v9  ;;  %v9531_v41 = vadd.f32 %v4456_v49, %v9929_v23 }
0x1055   :  { %v9533_v13 = vpop.eup %7098  ;;  %v4839_v15 = vmul.f32 0.7978846, %v4775_v35  ;;  %v4776_v28 = vadd.f32 %v4712_v34, %v9490_v12  ;;  %v4778_v25 = vadd.f32 %v4714_v17, %v9493_v14  ;;  %v4588_v45 = vmul.f32 %v9527_v0, %v9527_v0 }
0x1056   :  { %v9539_v59 = vpop.eup %7100  ;;  %v4841_v4 = vmul.f32 0.7978846, %v4777_v50  ;;  %v4779_v46 = vadd.f32 %v4715_v54, %v9498_v16  ;;  %v4781_v29 = vadd.f32 %v4717_v10, %v9501_v31  ;;  %v4590_v49 = vmul.f32 %v9531_v41, %v9531_v41  ;;  %v9545_v57 = vpop.f32.mrb[124].mxu1 }
0x1057   :  { %v9547_v43 = vpop.f32.mrb[124].mxu0  ;;  %v9549_v56 = vpop.eup %7102  ;;  %7114 = vtanh.f32 %v4839_v15  ;;  %v4840_v26 = vmul.f32 0.7978846, %v4776_v28  ;;  %v4842_v47 = vmul.f32 0.7978846, %v4778_v25  ;;  %v4652_v5 = vmul.f32 %v4588_v45, %v9527_v0 }
0x1058   :  { %v9552_v40 = vpop.f32.mrb[125].mxu1  ;;  %v9554_v42 = vpop.f32.mrb[125].mxu0  ;;  %7116 = vtanh.f32 %v4841_v4  ;;  %v4843_v53 = vmul.f32 0.7978846, %v4779_v46  ;;  %v4845_v27 = vmul.f32 0.7978846, %v4781_v29  ;;  %v4654_v1 = vmul.f32 %v4590_v49, %v9531_v41 }
0x1059   :  { %v9556_v30 = vpop.eup %7104  ;;  %v9559_v60 = vpop.f32.mrb[126].mxu1  ;;  %7118 = vtanh.f32 %v4840_v26  ;;  %v4716_v6 = vmul.f32 0.044715, %v4652_v5  ;;  %v9566_v61 = vadd.f32 %v4347_v18, %v9926_v22  ;;  %v9569_v55 = vadd.f32 %v4460_v24, %v9927_v62 }
0x105a   :  { %v9561_v21 = vpop.f32.mrb[126].mxu0  ;;  %v9563_v3 = vpop.eup %7106  ;;  %7120 = vtanh.f32 %v4842_v47  ;;  %v4718_v34 = vmul.f32 0.044715, %v4654_v1  ;;  %v9578_v17 = vadd.f32 %v4349_v48, %v9928_v32  ;;  %v9581_v50 = vadd.f32 %v4462_v2, %v9929_v23 }
0x105b   :  { %9930 = vst [vmem:[#allocation43_spill] sm:$0xff] %v9569_v55  ;;  %v9571_v8 = vpop.f32.mrb[127].mxu1  ;;  %v9573_v9 = vpop.f32.mrb[127].mxu0  ;;  %7122 = vtanh.f32 %v4843_v53  ;;  %v4780_v18 = vadd.f32 %v4716_v6, %v9527_v0  ;;  %v4591_v24 = vmul.f32 %v9566_v61, %v9566_v61  ;;  %v4593_v10 = vmul.f32 %v9569_v55, %v9569_v55 }
0x105c   :  { %v9575_v35 = vpop.eup %7108  ;;  %7124 = vtanh.f32 %v4845_v27  ;;  %v4782_v48 = vadd.f32 %v4718_v34, %v9531_v41  ;;  %v4592_v2 = vmul.f32 %v9578_v17, %v9578_v17  ;;  %v4594_v28 = vmul.f32 %v9581_v50, %v9581_v50 }
0x105d   :  { %v9583_v54 = vpop.eup %7110  ;;  %v4844_v25 = vmul.f32 0.7978846, %v4780_v18  ;;  %v4655_v45 = vmul.f32 %v4591_v24, %v9566_v61  ;;  %v4657_v4 = vmul.f32 %v4593_v10, %v9569_v55  ;;  %v9601_v46 = vadd.f32 %v9513_v20, %v9926_v22 }
0x105e   :  { %v9590_v15 = vpop.eup %7112  ;;  %v4846_v29 = vmul.f32 0.7978846, %v4782_v48  ;;  %v4656_v49 = vmul.f32 %v4592_v2, %v9578_v17  ;;  %v4658_v26 = vmul.f32 %v4594_v28, %v9581_v50  ;;  %v9607_v47 = vadd.f32 %v9515_v52, %v9927_v62 }
0x105f   :  { %9931 = vst [vmem:[#allocation45_spill] sm:$0xff] %v9601_v46  ;;  %7126 = vtanh.f32 %v4844_v25  ;;  %v4719_v5 = vmul.f32 0.044715, %v4655_v45  ;;  %v4721_v53 = vmul.f32 0.044715, %v4657_v4  ;;  %v4595_v27 = vmul.f32 %v9601_v46, %v9601_v46 }
0x1060   :  { %7128 = vtanh.f32 %v4846_v29  ;;  %v4720_v1 = vmul.f32 0.044715, %v4656_v49  ;;  %v4722_v6 = vmul.f32 0.044715, %v4658_v26  ;;  %v4597_v20 = vmul.f32 %v9607_v47, %v9607_v47 }
0x1061   :  { %v9613_v34 = vpop.eup %7114  ;;  %v4783_v18 = vadd.f32 %v4719_v5, %v9566_v61  ;;  %v4785_v24 = vadd.f32 %v4721_v53, %v9569_v55  ;;  %v4659_v52 = vmul.f32 %v4595_v27, %v9601_v46  ;;  %v9620_v10 = vadd.f32 %v9519_v36, %v9928_v32 }
0x1062   :  { %v9622_v48 = vpop.eup %7116  ;;  %v4784_v2 = vadd.f32 %v4720_v1, %v9578_v17  ;;  %v4786_v28 = vadd.f32 %v4722_v6, %v9581_v50  ;;  %v4661_v25 = vmul.f32 %v4597_v20, %v9607_v47  ;;  %v9629_v45 = vadd.f32 %v9521_v37, %v9929_v23 }
0x1063   :  { %v9631_v4 = vpop.eup %7118  ;;  %v4847_v29 = vmul.f32 0.7978846, %v4783_v18  ;;  %v4849_v49 = vmul.f32 0.7978846, %v4785_v24  ;;  %v4723_v26 = vmul.f32 0.044715, %v4659_v52  ;;  %v4596_v36 = vmul.f32 %v9620_v10, %v9620_v10 }
0x1064   :  { %v9635_v5 = vpop.eup %7120  ;;  %v4848_v53 = vmul.f32 0.7978846, %v4784_v2  ;;  %v4850_v27 = vmul.f32 0.7978846, %v4786_v28  ;;  %v4725_v1 = vmul.f32 0.044715, %v4661_v25  ;;  %v4598_v6 = vmul.f32 %v9629_v45, %v9629_v45 }
0x1065   :  { %v9639_v20 = vpop.eup %7122  ;;  %7130 = vtanh.f32 %v4847_v29  ;;  %v4787_v37 = vadd.f32 %v4723_v26, %v9601_v46  ;;  %v4660_v18 = vmul.f32 %v4596_v36, %v9620_v10  ;;  %v9645_v24 = vadd.f32 %v9545_v57, %v9926_v22 }
0x1066   :  { %v9647_v52 = vpop.eup %7124  ;;  %7132 = vtanh.f32 %v4849_v49  ;;  %v4789_v2 = vadd.f32 %v4725_v1, %v9607_v47  ;;  %v4662_v28 = vmul.f32 %v4598_v6, %v9629_v45  ;;  %v9653_v25 = vadd.f32 %v9547_v43, %v9927_v62 }
0x1067   :  { %9932 = vst [vmem:[#allocation44_spill] sm:$0xff] %v9645_v24  ;;  %7134 = vtanh.f32 %v4848_v53  ;;  %v4851_v29 = vmul.f32 0.7978846, %v4787_v37  ;;  %v4724_v26 = vmul.f32 0.044715, %v4660_v18  ;;  %v4599_v36 = vmul.f32 %v9645_v24, %v9645_v24 }
0x1068   :  { %9933 = vst [vmem:[#allocation39_spill] sm:$0xff] %v9653_v25  ;;  %7136 = vtanh.f32 %v4850_v27  ;;  %v4853_v57 = vmul.f32 0.7978846, %v4789_v2  ;;  %v4726_v55 = vmul.f32 0.044715, %v4662_v28  ;;  %v4601_v49 = vmul.f32 %v9653_v25, %v9653_v25 }
0x1069   :  { %v9659_v46 = vpop.eup %7126  ;;  %7138 = vtanh.f32 %v4851_v29  ;;  %v4788_v1 = vadd.f32 %v4724_v26, %v9620_v10  ;;  %v4663_v43 = vmul.f32 %v4599_v36, %v9645_v24  ;;  %v9665_v53 = vadd.f32 %v9552_v40, %v9928_v32 }
0x106a   :  { %v9667_v6 = vpop.eup %7128  ;;  %7140 = vtanh.f32 %v4853_v57  ;;  %v4790_v27 = vadd.f32 %v4726_v55, %v9629_v45  ;;  %v4665_v37 = vmul.f32 %v4601_v49, %v9653_v25  ;;  %v9673_v18 = vadd.f32 %v9554_v42, %v9929_v23 }
0x106b   :  { %9934 = vst [vmem:[#allocation40_spill] sm:$0xff] %v9665_v53  ;;  %v4852_v2 = vmul.f32 0.7978846, %v4788_v1  ;;  %v4727_v28 = vmul.f32 0.044715, %v4663_v43  ;;  %v4600_v29 = vmul.f32 %v9665_v53, %v9665_v53  ;;  %v9679_v40 = vadd.f32 %v9559_v60, %v9926_v22 }
0x106c   :  { %9935 = vst [vmem:[#allocation41_spill] sm:$0xff] %v9673_v18  ;;  %v4854_v26 = vmul.f32 0.7978846, %v4790_v27  ;;  %v4729_v36 = vmul.f32 0.044715, %v4665_v37  ;;  %v4602_v55 = vmul.f32 %v9673_v18, %v9673_v18  ;;  %v9685_v57 = vadd.f32 %v9561_v21, %v9927_v62 }
0x106d   :  { %9936 = vst [vmem:[#allocation42_spill] sm:$0xff] %v9679_v40  ;;  %7142 = vtanh.f32 %v4852_v2  ;;  %v4791_v42 = vadd.f32 %v4727_v28, %v9645_v24  ;;  %v4664_v49 = vmul.f32 %v4600_v29, %v9665_v53  ;;  %v4603_v1 = vmul.f32 %v9679_v40, %v9679_v40 }
0x106e   :  { %9937 = vst [vmem:[#allocation46_spill] sm:$0xff] %v9685_v57  ;;  %7144 = vtanh.f32 %v4854_v26  ;;  %v4793_v22 = vadd.f32 %v4729_v36, %v9653_v25  ;;  %v4666_v60 = vmul.f32 %v4602_v55, %v9673_v18  ;;  %v4605_v43 = vmul.f32 %v9685_v57, %v9685_v57 }
0x106f   :  { %v9695_v27 = vpop.eup %7130  ;;  %v4855_v62 = vmul.f32 0.7978846, %v4791_v42  ;;  %v4728_v21 = vmul.f32 0.044715, %v4664_v49  ;;  %v4667_v37 = vmul.f32 %v4603_v1, %v9679_v40  ;;  %v9700_v2 = vadd.f32 %v9571_v8, %v9928_v32 }
0x1070   :  { %v9702_v28 = vpop.eup %7132  ;;  %v4857_v29 = vmul.f32 0.7978846, %v4793_v22  ;;  %v4730_v26 = vmul.f32 0.044715, %v4666_v60  ;;  %v4669_v36 = vmul.f32 %v4605_v43, %v9685_v57  ;;  %v9707_v55 = vadd.f32 %v9573_v9, %v9929_v23 }
0x1071   :  { %v9709_v25 = vpop.eup %7134  ;;  %7146 = vtanh.f32 %v4855_v62  ;;  %v4792_v42 = vadd.f32 %v4728_v21, %v9665_v53  ;;  %v4731_v49 = vmul.f32 0.044715, %v4667_v37  ;;  %v4604_v32 = vmul.f32 %v9700_v2, %v9700_v2 }
0x1072   :  { %v9714_v8 = vpop.eup %7136  ;;  %7148 = vtanh.f32 %v4857_v29  ;;  %v4794_v1 = vadd.f32 %v4730_v26, %v9673_v18  ;;  %v4733_v22 = vmul.f32 0.044715, %v4669_v36  ;;  %v4606_v60 = vmul.f32 %v9707_v55, %v9707_v55 }
0x1073   :  { %v9719_v23 = vpop.eup %7138  ;;  %v4856_v9 = vmul.f32 0.7978846, %v4792_v42  ;;  %v4795_v43 = vadd.f32 %v4731_v49, %v9679_v40  ;;  %v4668_v62 = vmul.f32 %v4604_v32, %v9700_v2  ;;  %v4512_v21 = vmul.f32 0.5, %v9432_v11 }
0x1074   :  { %v9724_v37 = vpop.eup %7140  ;;  %v4858_v24 = vmul.f32 0.7978846, %v4794_v1  ;;  %v4797_v29 = vadd.f32 %v4733_v22, %v9685_v57  ;;  %v4670_v26 = vmul.f32 %v4606_v60, %v9707_v55  ;;  %v4516_v36 = vmul.f32 0.5, %v9452_v58 }
0x1075   :  { %7150 = vtanh.f32 %v4856_v9  ;;  %v4859_v18 = vmul.f32 0.7978846, %v4795_v43  ;;  %v4732_v53 = vmul.f32 0.044715, %v4668_v62  ;;  %v4960_v42 = vadd.f32 1.0, %v9549_v56 }
0x1076   :  { %7152 = vtanh.f32 %v4858_v24  ;;  %v4861_v49 = vmul.f32 0.7978846, %v4797_v29  ;;  %v4734_v40 = vmul.f32 0.044715, %v4670_v26  ;;  %v4964_v32 = vadd.f32 1.0, %v9583_v54 }
0x1077   :  { %v9731_v11 = vpop.eup %7142  ;;  %7154 = vtanh.f32 %v4859_v18  ;;  %v4796_v1 = vadd.f32 %v4732_v53, %v9700_v2  ;;  %v5024_v22 = vmul.f32 %v4960_v42, %v4512_v21  ;;  %v4514_v60 = vmul.f32 0.5, %v9435_v39 }
0x1078   :  { %v9735_v57 = vpop.eup %7144  ;;  %7156 = vtanh.f32 %v4861_v49  ;;  %v4798_v58 = vadd.f32 %v4734_v40, %v9707_v55  ;;  %v5028_v9 = vmul.f32 %v4964_v32, %v4516_v36  ;;  %v4518_v56 = vmul.f32 0.5, %v9455_v63 }
0x1079   :  { %v4860_v24 = vmul.f32 0.7978846, %v4796_v1  ;;  %v4962_v43 = vadd.f32 1.0, %v9556_v30  ;;  %v4966_v54 = vadd.f32 1.0, %v9590_v15  ;;  %v4511_v18 = vmul.f32 0.5, %v9426_v33 }
0x107a   :  { %v4862_v62 = vmul.f32 0.7978846, %v4798_v58  ;;  %v5072_v53 = vpack.c.bf16 %v5028_v9, %v5024_v22  ;;  %v4515_v21 = vmul.f32 0.5, %v9442_v38  ;;  %v4959_v39 = vadd.f32 1.0, %v9533_v13 }
0x107b   :  { %v9744_v29 = vpop.eup %7146  ;;  %7158 = vtanh.f32 %v4860_v24  ;;  %v5026_v40 = vmul.f32 %v4962_v43, %v4514_v60  ;;  %v5030_v26 = vmul.f32 %v4966_v54, %v4518_v56  ;;  %v4963_v63 = vadd.f32 1.0, %v9563_v3 }
0x107c   :  { %v9747_v36 = vpop.eup %7148  ;;  %7160 = vtanh.f32 %v4862_v62  ;;  %5411 = vmatprep.mubr.bf16.mxu1 %v5072_v53  ;;  %v5023_v30 = vmul.f32 %v4959_v39, %v4511_v18  ;;  %v4513_v33 = vmul.f32 0.5, %v9429_v44  ;;  %v4517_v15 = vmul.f32 0.5, %v9445_v19 }
0x107d   :  { %v5074_v42 = vpack.c.bf16 %v5030_v26, %v5026_v40  ;;  %v5027_v38 = vmul.f32 %v4963_v63, %v4515_v21  ;;  %v4961_v13 = vadd.f32 1.0, %v9539_v59  ;;  %v4965_v49 = vadd.f32 1.0, %v9575_v35 }
0x107e   :  { %v4520_v32 = vmul.f32 0.5, %v9490_v12  ;;  %v4524_v1 = vmul.f32 0.5, %v9527_v0  ;;  %v4968_v3 = vadd.f32 1.0, %v9631_v4  ;;  %v4972_v22 = vadd.f32 1.0, %v9659_v46 }
0x107f   :  { %v9757_v60 = vpop.eup %7150  ;;  %5508 = vmatprep.mubr.bf16.mxu0 %v5074_v42  ;;  %v5071_v44 = vpack.c.bf16 %v5027_v38, %v5023_v30  ;;  %v5025_v58 = vmul.f32 %v4961_v13, %v4513_v33  ;;  %v5029_v19 = vmul.f32 %v4965_v49, %v4517_v15  ;;  %v4522_v9 = vmul.f32 0.5, %v9493_v14 }
0x1080   :  { %v9760_v56 = vpop.eup %7152  ;;  %v5032_v59 = vmul.f32 %v4968_v3, %v4520_v32  ;;  %v5036_v35 = vmul.f32 %v4972_v22, %v4524_v1  ;;  %v4526_v12 = vmul.f32 0.5, %v9531_v41  ;;  %v4970_v0 = vadd.f32 1.0, %v9635_v5 }
0x1081   :  { %v9764_v24 = vpop.eup %7154  ;;  %5412 = vmatmul.mubr.bf16.gmra.mrb[144].mxu1 %v5071_v44  ;;  %v5073_v46 = vpack.c.bf16 %v5029_v19, %v5025_v58  ;;  %v4974_v4 = vadd.f32 1.0, %v9667_v6  ;;  %v4519_v43 = vmul.f32 0.5, %v9482_v7  ;;  %v4523_v54 = vmul.f32 0.5, %v9498_v16  ;;  %v9939_v58 = vld [vmem:[#allocation43_spill] sm:$0xff] }
0x1082   :  { %v9769_v18 = vpop.eup %7156  ;;  %v5076_v14 = vpack.c.bf16 %v5036_v35, %v5032_v59  ;;  %v5034_v62 = vmul.f32 %v4970_v0, %v4522_v9  ;;  %v4967_v53 = vadd.f32 1.0, %v9613_v34  ;;  %v4971_v41 = vadd.f32 1.0, %v9639_v20 }
0x1083   :  { %5509 = vmatmul.mubr.bf16.gmra.mrb[144].mxu0 %v5073_v46  ;;  %v5038_v5 = vmul.f32 %v4974_v4, %v4526_v12  ;;  %v4521_v21 = vmul.f32 0.5, %v9485_v51  ;;  %v4525_v39 = vmul.f32 0.5, %v9501_v31  ;;  %v4969_v6 = vadd.f32 1.0, %v9622_v48  ;;  %v9940_v12 = vld [vmem:[#allocation40_spill] sm:$0xff] }
0x1084   :  { %5419 = vmatprep.mubr.bf16.mxu1 %v5076_v14  ;;  %v5031_v7 = vmul.f32 %v4967_v53, %v4519_v43  ;;  %v5035_v40 = vmul.f32 %v4971_v41, %v4523_v54  ;;  %v4973_v16 = vadd.f32 1.0, %v9647_v52  ;;  %v4528_v26 = vmul.f32 0.5, %v9578_v17  ;;  %v9941_v43 = vld [vmem:[#allocation41_spill] sm:$0xff] }
0x1085   :  { %v7159_v63 = vpop.eup %7158  ;;  %v5078_v30 = vpack.c.bf16 %v5038_v5, %v5034_v62  ;;  %v5033_v34 = vmul.f32 %v4969_v6, %v4521_v21  ;;  %v4532_v20 = vmul.f32 0.5, %v9620_v10  ;;  %v4976_v33 = vadd.f32 1.0, %v9709_v25  ;;  %v9938_v25 = vld [vmem:[#allocation45_spill] sm:$0xff]  ;;  %v9942_v5 = vld [vmem:[#allocation44_spill] sm:$0xff] }
0x1086   :  { %v7161_v15 = vpop.eup %7160  ;;  %v5075_v51 = vpack.c.bf16 %v5035_v40, %v5031_v7  ;;  %v5037_v42 = vmul.f32 %v4973_v16, %v4525_v39  ;;  %v4980_v31 = vadd.f32 1.0, %v9731_v11  ;;  %v4530_v48 = vmul.f32 0.5, %v9581_v50  ;;  %v9943_v39 = vld [vmem:[#allocation42_spill] sm:$0xff] }
0x1087   :  { %5516 = vmatprep.mubr.bf16.mxu0 %v5078_v30  ;;  %v5040_v38 = vmul.f32 %v4976_v33, %v4528_v26  ;;  %v4534_v52 = vmul.f32 0.5, %v9629_v45  ;;  %v4978_v17 = vadd.f32 1.0, %v9714_v8  ;;  %v4982_v13 = vadd.f32 1.0, %v9735_v57  ;;  %v9944_v26 = vld [vmem:[#allocation39_spill] sm:$0xff] }
0x1088   :  { %v5077_v49 = vpack.c.bf16 %v5037_v42, %v5033_v34  ;;  %v5044_v32 = vmul.f32 %v4980_v31, %v4532_v20  ;;  %v4527_v10 = vmul.f32 0.5, %v9566_v61  ;;  %v4531_v1 = vmul.f32 0.5, %v9938_v25 }
0x1089   :  { %5420 = vmatmul.mubr.bf16.gmra.mrb[148].mxu1 %v5075_v51  ;;  %v5042_v3 = vmul.f32 %v4978_v17, %v4530_v48  ;;  %v5046_v22 = vmul.f32 %v4982_v13, %v4534_v52  ;;  %v4975_v11 = vadd.f32 1.0, %v9695_v27  ;;  %v4979_v50 = vadd.f32 1.0, %v9719_v23  ;;  %v9807_v48 = vld [vmem:[#allocation5 + $0x5] ss:$0 sm:$0xff] }
0x108a   :  { %v5080_v44 = vpack.c.bf16 %v5044_v32, %v5040_v38  ;;  %v4529_v45 = vmul.f32 0.5, %v9939_v58  ;;  %v4533_v8 = vmul.f32 0.5, %v9607_v47  ;;  %v4977_v57 = vadd.f32 1.0, %v9702_v28 }
0x108b   :  { %5517 = vmatmul.mubr.bf16.gmra.mrb[148].mxu0 %v5077_v49  ;;  %v5082_v19 = vpack.c.bf16 %v5046_v22, %v5042_v3  ;;  %v5039_v9 = vmul.f32 %v4975_v11, %v4527_v10  ;;  %v5043_v61 = vmul.f32 %v4979_v50, %v4531_v1  ;;  %v4981_v59 = vadd.f32 1.0, %v9724_v37 }
0x108c   :  { %5427 = vmatprep.mubr.bf16.mxu1 %v5080_v44  ;;  %v5041_v35 = vmul.f32 %v4977_v57, %v4529_v45  ;;  %v4536_v0 = vmul.f32 0.5, %v9940_v12  ;;  %v4540_v27 = vmul.f32 0.5, %v9700_v2  ;;  %v4984_v23 = vadd.f32 1.0, %v9757_v60  ;;  %v9946_v44 = vld [vmem:[#allocation23_spill] sm:$0xff] }
0x108d   :  { %5524 = vmatprep.mubr.bf16.mxu0 %v5082_v19  ;;  %v5079_v46 = vpack.c.bf16 %v5043_v61, %v5039_v9  ;;  %v5045_v4 = vmul.f32 %v4981_v59, %v4533_v8  ;;  %v4988_v47 = vadd.f32 1.0, %v7159_v63  ;;  %v4538_v28 = vmul.f32 0.5, %v9941_v43  ;;  %v9947_v9 = vld [vmem:[#allocation26_spill] sm:$0xff] }
0x108e   :  { %v5048_v54 = vmul.f32 %v4984_v23, %v4536_v0  ;;  %v4542_v14 = vmul.f32 0.5, %v9707_v55  ;;  %v4986_v62 = vadd.f32 1.0, %v9760_v56  ;;  %v4990_v37 = vadd.f32 1.0, %v7161_v15  ;;  %v9945_v55 = vld [vmem:[#allocation46_spill] sm:$0xff] }
0x108f   :  { %v5081_v53 = vpack.c.bf16 %v5045_v4, %v5041_v35  ;;  %v5052_v41 = vmul.f32 %v4988_v47, %v4540_v27  ;;  %v4535_v21 = vmul.f32 0.5, %v9942_v5  ;;  %v4539_v2 = vmul.f32 0.5, %v9943_v39 }
0x1090   :  { %v5050_v6 = vmul.f32 %v4986_v62, %v4538_v28  ;;  %v5054_v60 = vmul.f32 %v4990_v37, %v4542_v14  ;;  %v4983_v7 = vadd.f32 1.0, %v9744_v29  ;;  %v4987_v40 = vadd.f32 1.0, %v9764_v24  ;;  %v9948_v14 = vld [vmem:[#allocation24_spill] sm:$0xff] }
0x1091   :  { %5428 = vmatmul.mubr.bf16.gmra.mrb[152].mxu1 %v5079_v46  ;;  %v5084_v16 = vpack.c.bf16 %v5052_v41, %v5048_v54  ;;  %v4537_v63 = vmul.f32 0.5, %v9944_v26  ;;  %v4541_v30 = vmul.f32 0.5, %v9945_v55  ;;  %v4985_v56 = vadd.f32 1.0, %v9747_v36 }
0x1092   :  { %v5086_v34 = vpack.c.bf16 %v5054_v60, %v5050_v6  ;;  %v5047_v20 = vmul.f32 %v4983_v7, %v4535_v21  ;;  %v5051_v33 = vmul.f32 %v4987_v40, %v4539_v2  ;;  %v4989_v15 = vadd.f32 1.0, %v9769_v18  ;;  %v9949_v21 = vld [vmem:[#allocation25_spill] sm:$0xff] }
0x1093   :  { %5525 = vmatmul.mubr.bf16.gmra.mrb[152].mxu0 %v5081_v53  ;;  %5435 = vmatprep.mubr.bf16.mxu1 %v5084_v16  ;;  %v5049_v29 = vmul.f32 %v4985_v56, %v4537_v63 }
0x1094   :  { %5532 = vmatprep.mubr.bf16.mxu0 %v5086_v34  ;;  %v5083_v51 = vpack.c.bf16 %v5051_v33, %v5047_v20  ;;  %v5053_v42 = vmul.f32 %v4989_v15, %v4541_v30  ;;  %v9950_v20 = vld [vmem:[#allocation27_spill] sm:$0xff] }
0x1096   :  { %v5085_v24 = vpack.c.bf16 %v5053_v42, %v5049_v29 }
0x1099   :  { %5436 = vmatmul.mubr.bf16.gmra.mrb[156].mxu1 %v5083_v51 }
0x109b   :  { %5533 = vmatmul.mubr.bf16.gmra.mrb[156].mxu0 %v5085_v24  ;;  %v9951_v24 = vld [vmem:[#allocation29_spill] sm:$0xff] }
0x10cf   :  { %v6000_v31 = vpop.f32.mrb[128].mxu1 }
0x10d0   :  { %v6001_v38 = vpop.f32.mrb[129].mxu1 }
0x10d1   :  { %v6002_v52 = vadd.f32 %v6001_v38, %v6000_v31  ;;  %v6003_v36 = vpop.f32.mrb[130].mxu1 }
0x10d2   :  { %v6064_v17 = vpop.f32.mrb[128].mxu0  ;;  %v6004_v13 = vpop.f32.mrb[131].mxu1 }
0x10d3   :  { %v5382_v49 = vadd.f32 %v6002_v52, %v9807_v48  ;;  %v6065_v18 = vpop.f32.mrb[129].mxu0  ;;  %v6005_v32 = vadd.f32 %v6004_v13, %v6003_v36 }
0x10d4   :  { %v6066_v10 = vadd.f32 %v6065_v18, %v6064_v17  ;;  %v6067_v25 = vpop.f32.mrb[130].mxu0 }
0x10d5   :  { %v5385_v1 = vadd.f32 %v6005_v32, %v9807_v48  ;;  %v6068_v3 = vpop.f32.mrb[131].mxu0 }
0x10d6   :  { %v5479_v22 = vadd.f32 %v6066_v10, %v5382_v49  ;;  %v6069_v11 = vadd.f32 %v6068_v3, %v6067_v25  ;;  %v9952_v3 = vld [vmem:[#allocation28_spill] sm:$0xff] }
0x10d7   :  { %v6006_v50 = vpop.f32.mrb[132].mxu1 }
0x10d8   :  { %v5541_v58 = vadd.f32 %v5479_v22, %v9946_v44  ;;  %v5482_v45 = vadd.f32 %v6069_v11, %v5385_v1  ;;  %v6007_v8 = vpop.f32.mrb[133].mxu1 }
0x10d9   :  { %v6008_v57 = vadd.f32 %v6007_v8, %v6006_v50  ;;  %v6009_v19 = vpop.f32.mrb[134].mxu1  ;;  %v9953_v50 = vld [vmem:[#allocation30_spill] sm:$0xff] }
0x10da   :  { %5557 = vst [vmem:[#allocation16] sm:$0xff] %v5541_v58  ;;  %v5542_v61 = vadd.f32 %v5482_v45, %v9947_v9  ;;  %v6070_v59 = vpop.f32.mrb[132].mxu0  ;;  %v6010_v35 = vpop.f32.mrb[135].mxu1 }
0x10db   :  { %v5390_v12 = vadd.f32 %v6008_v57, %v9807_v48  ;;  %v6071_v0 = vpop.f32.mrb[133].mxu0  ;;  %v6011_v27 = vadd.f32 %v6010_v35, %v6009_v19 }
0x10dc   :  { %5558 = vst [vmem:[#allocation16 + $0x8] sm:$0xff] %v5542_v61  ;;  %v6072_v23 = vadd.f32 %v6071_v0, %v6070_v59  ;;  %v6073_v46 = vpop.f32.mrb[134].mxu0 }
0x10dd   :  { %v5393_v4 = vadd.f32 %v6011_v27, %v9807_v48  ;;  %v6074_v47 = vpop.f32.mrb[135].mxu0 }
0x10de   :  { %v5487_v43 = vadd.f32 %v6072_v23, %v5390_v12  ;;  %v6075_v28 = vadd.f32 %v6074_v47, %v6073_v46  ;;  %v9954_v47 = vld [vmem:[#allocation31_spill] sm:$0xff] }
0x10df   :  { %v6012_v54 = vpop.f32.mrb[136].mxu1 }
0x10e0   :  { %v5543_v62 = vadd.f32 %v5487_v43, %v9948_v14  ;;  %v5490_v37 = vadd.f32 %v6075_v28, %v5393_v4  ;;  %v6013_v53 = vpop.f32.mrb[137].mxu1 }
0x10e1   :  { %v6014_v41 = vadd.f32 %v6013_v53, %v6012_v54  ;;  %v6015_v5 = vpop.f32.mrb[138].mxu1 }
0x10e2   :  { %5559 = vst [vmem:[#allocation16 + $0x10] sm:$0xff] %v5543_v62  ;;  %v5544_v39 = vadd.f32 %v5490_v37, %v9949_v21  ;;  %v6076_v2 = vpop.f32.mrb[136].mxu0  ;;  %v6016_v6 = vpop.f32.mrb[139].mxu1  ;;  %v9955_v62 = vld [vmem:[#allocation32_spill] sm:$0xff] }
0x10e3   :  { %v5398_v60 = vadd.f32 %v6014_v41, %v9807_v48  ;;  %v6077_v7 = vpop.f32.mrb[137].mxu0  ;;  %v6017_v40 = vadd.f32 %v6016_v6, %v6015_v5 }
0x10e4   :  { %5560 = vst [vmem:[#allocation16 + $0x18] sm:$0xff] %v5544_v39  ;;  %v6078_v16 = vadd.f32 %v6077_v7, %v6076_v2  ;;  %v6079_v26 = vpop.f32.mrb[138].mxu0 }
0x10e5   :  { %v5401_v63 = vadd.f32 %v6017_v40, %v9807_v48  ;;  %v6080_v55 = vpop.f32.mrb[139].mxu0 }
0x10e6   :  { %v5495_v30 = vadd.f32 %v6078_v16, %v5398_v60  ;;  %v6081_v56 = vadd.f32 %v6080_v55, %v6079_v26  ;;  %v9956_v55 = vld [vmem:[#allocation33_spill] sm:$0xff] }
0x10e7   :  { %v6018_v34 = vpop.f32.mrb[140].mxu1 }
0x10e8   :  { %v5545_v33 = vadd.f32 %v5495_v30, %v9950_v20  ;;  %v5498_v15 = vadd.f32 %v6081_v56, %v5401_v63  ;;  %v6019_v51 = vpop.f32.mrb[141].mxu1 }
0x10e9   :  { %v6020_v29 = vadd.f32 %v6019_v51, %v6018_v34  ;;  %v6021_v42 = vpop.f32.mrb[142].mxu1 }
0x10ea   :  { %5561 = vst [vmem:[#allocation16 + $0x20] sm:$0xff] %v5545_v33  ;;  %v5546_v31 = vadd.f32 %v5498_v15, %v9951_v24  ;;  %v6082_v38 = vpop.f32.mrb[140].mxu0  ;;  %v6022_v52 = vpop.f32.mrb[143].mxu1  ;;  %v9957_v33 = vld [vmem:[#allocation34_spill] sm:$0xff] }
0x10eb   :  { %v5406_v36 = vadd.f32 %v6020_v29, %v9807_v48  ;;  %v6083_v17 = vpop.f32.mrb[141].mxu0  ;;  %v6023_v13 = vadd.f32 %v6022_v52, %v6021_v42 }
0x10ec   :  { %5562 = vst [vmem:[#allocation16 + $0x28] sm:$0xff] %v5546_v31  ;;  %v6084_v49 = vadd.f32 %v6083_v17, %v6082_v38  ;;  %v6085_v18 = vpop.f32.mrb[142].mxu0 }
0x10ed   :  { %v5409_v32 = vadd.f32 %v6023_v13, %v9807_v48  ;;  %v6086_v10 = vpop.f32.mrb[143].mxu0 }
0x10ee   :  { %v5503_v25 = vadd.f32 %v6084_v49, %v5406_v36  ;;  %v6087_v1 = vadd.f32 %v6086_v10, %v6085_v18  ;;  %v9958_v10 = vld [vmem:[#allocation35_spill] sm:$0xff] }
0x10f0   :  { %v5547_v22 = vadd.f32 %v5503_v25, %v9952_v3  ;;  %v5506_v11 = vadd.f32 %v6087_v1, %v5409_v32 }
0x10f2   :  { %5563 = vst [vmem:[#allocation16 + $0x30] sm:$0xff] %v5547_v22  ;;  %v5548_v44 = vadd.f32 %v5506_v11, %v9953_v50  ;;  %v9959_v11 = vld [vmem:[#allocation36_spill] sm:$0xff] }
0x10f4   :  { %5564 = vst [vmem:[#allocation16 + $0x38] sm:$0xff] %v5548_v44 }
0x1154   :  { %v6024_v58 = vpop.f32.mrb[144].mxu1 }
0x1155   :  { %v6025_v45 = vpop.f32.mrb[145].mxu1 }
0x1156   :  { %v6088_v8 = vpop.f32.mrb[144].mxu0  ;;  %v6026_v57 = vadd.f32 %v6025_v45, %v6024_v58  ;;  %v6027_v19 = vpop.f32.mrb[146].mxu1 }
0x1157   :  { %v6089_v9 = vpop.f32.mrb[145].mxu0  ;;  %v6028_v61 = vpop.f32.mrb[147].mxu1 }
0x1158   :  { %v5414_v59 = vadd.f32 %v6026_v57, %v9807_v48  ;;  %v6090_v35 = vadd.f32 %v6089_v9, %v6088_v8  ;;  %v6091_v12 = vpop.f32.mrb[146].mxu0  ;;  %v6029_v0 = vadd.f32 %v6028_v61, %v6027_v19 }
0x1159   :  { %v6092_v27 = vpop.f32.mrb[147].mxu0 }
0x115a   :  { %v5511_v23 = vadd.f32 %v6090_v35, %v5414_v59  ;;  %v5417_v46 = vadd.f32 %v6029_v0, %v9807_v48  ;;  %v6093_v4 = vadd.f32 %v6092_v27, %v6091_v12 }
0x115c   :  { %v5549_v43 = vadd.f32 %v5511_v23, %v9954_v47  ;;  %v5514_v28 = vadd.f32 %v6093_v4, %v5417_v46  ;;  %v6030_v54 = vpop.f32.mrb[148].mxu1  ;;  %v9960_v23 = vld [vmem:[#allocation37_spill] sm:$0xff]  ;;  %v9961_v47 = vld [vmem:[#allocation38_spill] sm:$0xff] }
0x115d   :  { %v6031_v14 = vpop.f32.mrb[149].mxu1 }
0x115e   :  { %5565 = vst [vmem:[#allocation16 + $0x40] sm:$0xff] %v5549_v43  ;;  %v5550_v37 = vadd.f32 %v5514_v28, %v9955_v62  ;;  %v6094_v53 = vpop.f32.mrb[148].mxu0  ;;  %v6032_v41 = vadd.f32 %v6031_v14, %v6030_v54  ;;  %v6033_v5 = vpop.f32.mrb[150].mxu1 }
0x115f   :  { %v6095_v21 = vpop.f32.mrb[149].mxu0  ;;  %v6034_v39 = vpop.f32.mrb[151].mxu1 }
0x1160   :  { %5566 = vst [vmem:[#allocation16 + $0x48] sm:$0xff] %v5550_v37  ;;  %v5422_v2 = vadd.f32 %v6032_v41, %v9807_v48  ;;  %v6096_v6 = vadd.f32 %v6095_v21, %v6094_v53  ;;  %v6097_v60 = vpop.f32.mrb[150].mxu0  ;;  %v6035_v7 = vadd.f32 %v6034_v39, %v6033_v5 }
0x1161   :  { %v6098_v40 = vpop.f32.mrb[151].mxu0 }
0x1162   :  { %v5519_v16 = vadd.f32 %v6096_v6, %v5422_v2  ;;  %v5425_v26 = vadd.f32 %v6035_v7, %v9807_v48  ;;  %v6099_v63 = vadd.f32 %v6098_v40, %v6097_v60 }
0x1164   :  { %v5551_v30 = vadd.f32 %v5519_v16, %v9956_v55  ;;  %v5522_v56 = vadd.f32 %v6099_v63, %v5425_v26  ;;  %v6036_v34 = vpop.f32.mrb[152].mxu1 }
0x1165   :  { %v6037_v20 = vpop.f32.mrb[153].mxu1 }
0x1166   :  { %5567 = vst [vmem:[#allocation16 + $0x50] sm:$0xff] %v5551_v30  ;;  %v5552_v15 = vadd.f32 %v5522_v56, %v9957_v33  ;;  %v6100_v51 = vpop.f32.mrb[152].mxu0  ;;  %v6038_v29 = vadd.f32 %v6037_v20, %v6036_v34  ;;  %v6039_v42 = vpop.f32.mrb[154].mxu1 }
0x1167   :  { %v6101_v24 = vpop.f32.mrb[153].mxu0  ;;  %v6040_v31 = vpop.f32.mrb[155].mxu1 }
0x1168   :  { %5568 = vst [vmem:[#allocation16 + $0x58] sm:$0xff] %v5552_v15  ;;  %v5430_v38 = vadd.f32 %v6038_v29, %v9807_v48  ;;  %v6102_v52 = vadd.f32 %v6101_v24, %v6100_v51  ;;  %v6103_v36 = vpop.f32.mrb[154].mxu0  ;;  %v6041_v17 = vadd.f32 %v6040_v31, %v6039_v42 }
0x1169   :  { %v6104_v13 = vpop.f32.mrb[155].mxu0 }
0x116a   :  { %v5527_v49 = vadd.f32 %v6102_v52, %v5430_v38  ;;  %v5433_v18 = vadd.f32 %v6041_v17, %v9807_v48  ;;  %v6105_v32 = vadd.f32 %v6104_v13, %v6103_v36 }
0x116c   :  { %v5553_v25 = vadd.f32 %v5527_v49, %v9958_v10  ;;  %v5530_v1 = vadd.f32 %v6105_v32, %v5433_v18  ;;  %v6042_v3 = vpop.f32.mrb[156].mxu1 }
0x116d   :  { %v6043_v22 = vpop.f32.mrb[157].mxu1 }
0x116e   :  { %5569 = vst [vmem:[#allocation16 + $0x60] sm:$0xff] %v5553_v25  ;;  %v5554_v50 = vadd.f32 %v5530_v1, %v9959_v11  ;;  %v6106_v44 = vpop.f32.mrb[156].mxu0  ;;  %v6044_v58 = vadd.f32 %v6043_v22, %v6042_v3  ;;  %v6045_v45 = vpop.f32.mrb[158].mxu1 }
0x116f   :  { %v6107_v8 = vpop.f32.mrb[157].mxu0  ;;  %v6046_v57 = vpop.f32.mrb[159].mxu1 }
0x1170   :  { %5570 = vst [vmem:[#allocation16 + $0x68] sm:$0xff] %v5554_v50  ;;  %v5438_v19 = vadd.f32 %v6044_v58, %v9807_v48  ;;  %v6108_v9 = vadd.f32 %v6107_v8, %v6106_v44  ;;  %v6109_v61 = vpop.f32.mrb[158].mxu0  ;;  %v6047_v59 = vadd.f32 %v6046_v57, %v6045_v45 }
0x1171   :  { %v6110_v35 = vpop.f32.mrb[159].mxu0 }
0x1172   :  { %v5535_v12 = vadd.f32 %v6108_v9, %v5438_v19  ;;  %v5441_v0 = vadd.f32 %v6047_v59, %v9807_v48  ;;  %v6111_v27 = vadd.f32 %v6110_v35, %v6109_v61 }
0x1174   :  { %v5555_v46 = vadd.f32 %v5535_v12, %v9960_v23  ;;  %v5538_v4 = vadd.f32 %v6111_v27, %v5441_v0 }
0x1176   :  { %5571 = vst [vmem:[#allocation16 + $0x70] sm:$0xff] %v5555_v46  ;;  %v5556_v43 = vadd.f32 %v5538_v4, %v9961_v47 }
0x1178   :  { %5572 = vst [vmem:[#allocation16 + $0x78] sm:$0xff] %v5556_v43 }
0x1179   :  { %7373 = shalt.err (!%p7370_p12)
}
0x117a   :  { %s7374_s3 = scalar_lea.hbm %s9864_s8, 2048 }
0x117b   :  { %p7375_p13 = scmp.ne.s32.totalorder %s9864_s8, %s7374_s3  ;;  %p7378_p0 = scmp.lt.u32.totalorder %s7374_s3, %s9864_s8 }
0x117d   :  { %p7380_p1 = pnand %p7378_p0, %p7375_p13 }
0x117f   :  { %7383 = shalt.err (!%p7380_p1)
}
0x1180   :  { %5584 = dma.vmem_to_hbm [thread:$0]  %s5579_s15, 2048, %s9864_s8, [#allocation4], %s7402_s5, %s7402_s5, %s7403_s9  }
0x1181   :  { %7394 = dma.done.wait [#allocation4], 2048  }
0x1182   :  { %7395 = vsyncadd [#allocation4], 4294965248 }
0x1183   :  { %5588 = vsyncpa [#allocation3], 1 }
0x1184   :  { %5589 = vsyncpa [#allocation6], 1 }
0x1185   :  { %5590 = vsyncpa [#allocation9], 1 }
0x1186   :  { %5591 = vsyncpa [#allocation12], 1 }
0x1187   :  { %5592 = vsyncpa [#allocation15], 1 }
0x1188   :  { %5593 = vsyncpa [#allocation4], 1 }

</bundles_post_ra>
